<compile_context>
chip_gen: v5e
topology: v5e:2x2
jax: 0.10.0
libtpu: 0.0.40
codegen_flags: <defaults>
</compile_context>

<pallas_src>
import jax
import jax.numpy as jnp
from jax import lax
from jax.experimental import pallas as pl
from jax.experimental.pallas import tpu as pltpu


BN = 8                            # samples per grid step (=> BN*4 matmul slabs)
VMEM_LIMIT = 32 * 1024 * 1024     # safe on v5e/v6e (128 MiB) and v7x (64 MiB)


# ----------------------------------------------------------------------------
# Pallas kernels
# ----------------------------------------------------------------------------
def conv_relu_pool_kernel(p_ref, w_ref, b_ref, o_ref):
    """Fused conv (im2col matmul) + 2x2 max-pool + bias + ReLU.

    p_ref: (BN*4, K, Np)   bf16  quadrant-ordered im2col patches
                                 (dim0 = sample_in_block*4 + pool_quadrant)
    w_ref: (Cout, K)       bf16  flattened conv weight
    b_ref: (Cout, 1)       f32   bias
    o_ref: (BN, Cout, Np)  bf16  pooled activations (spatial dim on lanes)
    """
    bnq, k, npool = p_ref.shape
    cout = w_ref.shape[0]
    bn = o_ref.shape[0]

    # One stacked MXU call for every (sample, pool-quadrant) slab in the block.
    wb = jnp.broadcast_to(w_ref[...][None], (bnq, cout, k))
    r = jnp.einsum("nok,nkp->nop", wb, p_ref[...],
                   preferred_element_type=jnp.float32)       # (BN*4, Cout, Np)

    # 2x2 max-pool == max over the 4 quadrant slabs (leading-dim reshape: free).
    r = r.reshape(bn, 4, cout, npool)
    pooled = jnp.max(r, axis=1)                              # (BN, Cout, Np)

    # Bias + ReLU after the pool: relu(max(r)+b) == max(relu(r+b)).
    y = jnp.maximum(pooled + b_ref[...][None], 0.0)
    o_ref[...] = y.astype(o_ref.dtype)


def mlp_kernel(x_ref, w1_ref, b1_ref, w2_ref, b2_ref, o_ref):
    """fc1 + ReLU + (dropout = identity in eval) + fc2 (128-lane padded out)."""
    h = jnp.dot(x_ref[...], w1_ref[...], preferred_element_type=jnp.float32)
    h = jnp.maximum(h + b1_ref[...], 0.0)
    # TODO(synk): nn.Dropout(0.25) is identity at inference; training mask not modeled.
    o = jnp.dot(h.astype(w2_ref.dtype), w2_ref[...],
                preferred_element_type=jnp.float32) + b2_ref[...]
    o_ref[...] = o


# ----------------------------------------------------------------------------
# Pallas wrappers
# ----------------------------------------------------------------------------
def conv_relu_pool(patches, w, b, cout, npool):
    nq, k, _ = patches.shape
    n = nq // 4
    return pl.pallas_call(
        conv_relu_pool_kernel,
        out_shape=jax.ShapeDtypeStruct((n, cout, npool), jnp.bfloat16),
        grid_spec=pl.GridSpec(
            grid=(n // BN,),
            in_specs=[
                pl.BlockSpec((BN * 4, k, npool), lambda i: (i, 0, 0)),
                # constant block index -> tiny weights/bias stay VMEM-resident
                pl.BlockSpec((cout, k), lambda i: (0, 0)),
                pl.BlockSpec((cout, 1), lambda i: (0, 0)),
            ],
            out_specs=pl.BlockSpec((BN, cout, npool), lambda i: (i, 0, 0)),
        ),
        compiler_params=pltpu.CompilerParams(
            dimension_semantics=("parallel",),     # megacore sharding on v7x
            vmem_limit_bytes=VMEM_LIMIT,
        ),
    )(patches, w, b)


def mlp(x, w1, b1, w2, b2):
    n, d_in = x.shape
    h = w1.shape[1]
    d_out = w2.shape[1]
    return pl.pallas_call(
        mlp_kernel,
        out_shape=jax.ShapeDtypeStruct((n, d_out), jnp.float32),
        grid_spec=pl.GridSpec(
            grid=(n // BN,),                       # real grid over batch blocks
            in_specs=[
                pl.BlockSpec((BN, d_in), lambda i: (i, 0)),
                pl.BlockSpec((d_in, h), lambda i: (0, 0)),
                pl.BlockSpec((1, h), lambda i: (0, 0)),
                pl.BlockSpec((h, d_out), lambda i: (0, 0)),
                pl.BlockSpec((1, d_out), lambda i: (0, 0)),
            ],
            out_specs=pl.BlockSpec((BN, d_out), lambda i: (i, 0)),
        ),
        compiler_params=pltpu.CompilerParams(
            dimension_semantics=("parallel",),
            vmem_limit_bytes=VMEM_LIMIT,
        ),
    )(x, w1, b1, w2, b2)


# ----------------------------------------------------------------------------
# XLA glue: quadrant-ordered im2col in a lane-dense, bf16 layout
# ----------------------------------------------------------------------------
def conv_patches_quadrants(x_nchw, ksize=5, pad=2):
    """(N, C, H, W) -> (N*4, ksize*ksize*C, (H//2)*(W//2)) bf16 patches.

    dim0 = n*4 + dy*2 + dx (pool quadrant); column p = ho*(W//2)+wo is the conv
    output position (2*ho+dy, 2*wo+dx); row k = (kh*ksize+kw)*C + ci matches the
    (Cout, KH*KW*Cin) weight flattening.  K sits on sublanes, spatial on lanes.
    """
    n, c, hh, ww = x_nchw.shape
    xp = jnp.pad(x_nchw, ((0, 0), (0, 0), (pad, pad), (pad, pad)))
    taps = [xp[:, :, kh:kh + hh, kw:kw + ww]
            for kh in range(ksize) for kw in range(ksize)]
    p = jnp.stack(taps, axis=1)                      # (N, 25, C, H, W)
    k = ksize * ksize * c
    p = p.reshape(n, k, hh, ww)
    ho, wo = hh // 2, ww // 2
    p = p.reshape(n, k, ho, 2, wo, 2)
    p = p.transpose(0, 3, 5, 1, 2, 4)                # (N, dy, dx, K, Ho, Wo)
    return p.reshape(n * 4, k, ho * wo).astype(jnp.bfloat16)


# ----------------------------------------------------------------------------
# Full forward pass
# ----------------------------------------------------------------------------
def cnn_model2_forward(x_nchw, params):
    c1w, c1b, c2w, c2b, f1w, f1b, f2w, f2b = params
    n = x_nchw.shape[0]
    npad = ((n + BN - 1) // BN) * BN
    if npad != n:
        x_nchw = jnp.pad(x_nchw, ((0, npad - n), (0, 0), (0, 0), (0, 0)))

    # --- weight prep (one-time layout work; no runtime activation transposes) ---
    w1m = c1w.reshape(8, 25).astype(jnp.bfloat16)                       # (Cout, K)
    w2m = jnp.transpose(c2w, (0, 2, 3, 1)).reshape(16, 200).astype(jnp.bfloat16)
    b1c = c1b.reshape(8, 1).astype(jnp.float32)
    b2c = c2b.reshape(16, 1).astype(jnp.float32)
    w1f = jnp.transpose(f1w).astype(jnp.bfloat16)                       # (784, 196)
    b1f = f1b.reshape(1, 196).astype(jnp.float32)
    # fc2 zero-padded to 128 output lanes -> unmasked lane-dense store.
    w2f = jnp.zeros((196, 128), jnp.float32).at[:, :10].set(jnp.transpose(f2w))
    w2f = w2f.astype(jnp.bfloat16)
    b2f = jnp.zeros((1, 128), jnp.float32).at[0, :10].set(f2b)

    # conv1 (1->8, k5, pad2) + ReLU + maxpool2  -> (Npad, 8, 196)
    p1 = conv_patches_quadrants(x_nchw)                                 # (Npad*4, 25, 196)
    y1 = conv_relu_pool(p1, w1m, b1c, cout=8, npool=196)

    # conv2 (8->16, k5, pad2) + ReLU + maxpool2 -> (Npad, 16, 49)
    p2 = conv_patches_quadrants(y1.reshape(npad, 8, 14, 14))            # (Npad*4, 200, 49)
    y2 = conv_relu_pool(p2, w2m, b2c, cout=16, npool=49)

    # (Npad, 16, 49) is channel-major => reshape equals torch .view(-1, 784).
    flat = y2.reshape(npad, 16 * 7 * 7)

    out = mlp(flat, w1f, b1f, w2f, b2f)                                 # (Npad, 128)
    return out[:n, :10]


# ----------------------------------------------------------------------------
# Pure-JAX reference (verification only, f32)
# ----------------------------------------------------------------------------
def reference_forward(x_nchw, params):
    c1w, c1b, c2w, c2b, f1w, f1b, f2w, f2b = params

    def conv2d(x, w, b):
        y = lax.conv_general_dilated(x, w, (1, 1), ((2, 2), (2, 2)),
                                     dimension_numbers=("NCHW", "OIHW", "NCHW"))
        return y + b.reshape(1, -1, 1, 1)

    def maxpool2(x):
        return lax.reduce_window(x, -jnp.inf, lax.max,
                                 (1, 1, 2, 2), (1, 1, 2, 2), "VALID")

    h = maxpool2(jnp.maximum(conv2d(x_nchw, c1w, c1b), 0.0))
    h = maxpool2(jnp.maximum(conv2d(h, c2w, c2b), 0.0))
    h = h.reshape(h.shape[0], -1)
    h = jnp.maximum(h @ f1w.T + f1b, 0.0)
    return h @ f2w.T + f2b


# ----------------------------------------------------------------------------
if __name__ == "__main__":
    key = jax.random.PRNGKey(0)
    ks = jax.random.split(key, 9)

    N = 2
    # Input must be (N, 1, 28, 28): fc1's 784 = 16*7*7 input features fix the
    # spatial size (MNIST-style), as in the original module.
    x = jax.random.normal(ks[0], (N, 1, 28, 28), dtype=jnp.float32)

    # Deterministic params (torch layout). Only layers used by forward()
    # (conv1, conv2, fc1, fc2) are materialized; conv3..conv11 are dead params.
    conv1_w = 0.10 * jax.random.normal(ks[1], (8, 1, 5, 5), jnp.float32)
    conv1_b = 0.10 * jax.random.normal(ks[2], (8,), jnp.float32)
    conv2_w = 0.05 * jax.random.normal(ks[3], (16, 8, 5, 5), jnp.float32)
    conv2_b = 0.10 * jax.random.normal(ks[4], (16,), jnp.float32)
    fc1_w = 0.02 * jax.random.normal(ks[5], (196, 784), jnp.float32)    # (out, in)
    fc1_b = 0.10 * jax.random.normal(ks[6], (196,), jnp.float32)
    fc2_w = 0.05 * jax.random.normal(ks[7], (10, 196), jnp.float32)     # (out, in)
    fc2_b = 0.10 * jax.random.normal(ks[8], (10,), jnp.float32)

    params = (conv1_w, conv1_b, conv2_w, conv2_b, fc1_w, fc1_b, fc2_w, fc2_b)

    fwd = jax.jit(cnn_model2_forward)
    out = jax.block_until_ready(fwd(x, params))
    assert out.shape == (N, 10), out.shape

    ref = jax.block_until_ready(reference_forward(x, params))
    max_err = float(jnp.max(jnp.abs(out - ref)))
    # bf16 MXU operands with f32 accumulation -> allow ~1% numerical drift.
    assert jnp.allclose(out, ref, rtol=2e-2, atol=2e-2), ("mismatch", max_err)

    print("KERNEL_OK")
</pallas_src>

<mosaic_0001>
module attributes {stable_mosaic.version = 11 : i64} {
  func.func @conv_relu_pool_kernel(%arg0: i32, %arg1: memref<32x25x196xbf16, #tpu.memory_space<vmem>>, %arg2: memref<8x25xbf16, #tpu.memory_space<vmem>>, %arg3: memref<8x1xf32, #tpu.memory_space<vmem>>, %arg4: memref<8x8x196xbf16, #tpu.memory_space<vmem>>) attributes {dimension_semantics = [#tpu.dimension_semantics<parallel>], iteration_bounds = array<i64: 1>, scalar_prefetch = 0 : i64, scratch_operands = 0 : i64, tpu.core_type = #tpu.core_type<tc>, window_params = [{transform_indices = @transform_0, window_bounds = array<i64: 32, 25, 196>}, {pipeline_mode = #tpu.pipeline_mode<synchronous>, transform_indices = @transform_1, window_bounds = array<i64: 8, 25>}, {pipeline_mode = #tpu.pipeline_mode<synchronous>, transform_indices = @transform_2, window_bounds = array<i64: 8, 1>}, {transform_indices = @transform_3, window_bounds = array<i64: 8, 8, 196>}]} {
    %c0 = arith.constant 0 : index
    %c0_0 = arith.constant 0 : index
    %0 = vector.load %arg2[%c0, %c0_0] : memref<8x25xbf16, #tpu.memory_space<vmem>>, vector<8x25xbf16>
    %1 = vector.shape_cast %0 : vector<8x25xbf16> to vector<1x8x25xbf16>
    %2 = vector.shape_cast %1 : vector<1x8x25xbf16> to vector<1x8x25xbf16>
    %3 = vector.broadcast %2 : vector<1x8x25xbf16> to vector<32x8x25xbf16>
    %c0_1 = arith.constant 0 : index
    %c0_2 = arith.constant 0 : index
    %c0_3 = arith.constant 0 : index
    %4 = vector.load %arg1[%c0_1, %c0_2, %c0_3] : memref<32x25x196xbf16, #tpu.memory_space<vmem>>, vector<32x25x196xbf16>
    "tpu.trace_start"() <{level = 10 : i32, message = "nok,nkp->nop"}> : () -> ()
    %cst = arith.constant dense<0.000000e+00> : vector<32x8x196xf32>
    %5 = tpu.matmul %3, %4, %cst {dimension_numbers = #tpu.dot_dimension_numbers<[2], [1], [1], [2], [0, 0, 0, 1, 1, 2], [0], [0]>} : vector<32x8x25xbf16>, vector<32x25x196xbf16>, vector<32x8x196xf32> -> vector<32x8x196xf32>
    "tpu.trace_stop"() : () -> ()
    %6 = vector.shape_cast %5 : vector<32x8x196xf32> to vector<8x4x8x196xf32>
    %cst_4 = arith.constant dense<0xFF800000> : vector<8x8x196xf32>
    %7 = vector.multi_reduction <maximumf>, %6, %cst_4 [1] : vector<8x4x8x196xf32> to vector<8x8x196xf32>
    %c0_5 = arith.constant 0 : index
    %c0_6 = arith.constant 0 : index
    %8 = vector.load %arg3[%c0_5, %c0_6] : memref<8x1xf32, #tpu.memory_space<vmem>>, vector<8x1xf32>
    %9 = vector.shape_cast %8 : vector<8x1xf32> to vector<1x8x1xf32>
    %10 = vector.broadcast %9 : vector<1x8x1xf32> to vector<8x8x196xf32>
    %11 = arith.addf %7, %10 : vector<8x8x196xf32>
    %cst_7 = arith.constant 0.000000e+00 : f32
    %12 = vector.broadcast %cst_7 : f32 to vector<8x8x196xf32>
    %13 = arith.maximumf %11, %12 : vector<8x8x196xf32>
    %14 = arith.truncf %13 : vector<8x8x196xf32> to vector<8x8x196xbf16>
    %c0_8 = arith.constant 0 : index
    %c0_9 = arith.constant 0 : index
    %c0_10 = arith.constant 0 : index
    %15 = vector.load %arg4[%c0_8, %c0_9, %c0_10] : memref<8x8x196xbf16, #tpu.memory_space<vmem>>, vector<8x8x196xbf16>
    tpu.vector_store %arg4[%c0_8, %c0_9, %c0_10], %14 {strides = array<i32>} : memref<8x8x196xbf16, #tpu.memory_space<vmem>>, vector<8x8x196xbf16>,
    return
  }
  func.func @transform_0(%arg0: i32) -> (i32, i32, i32) {
    %c0_i32 = arith.constant 0 : i32
    %c0_i32_0 = arith.constant 0 : i32
    %c0_i32_1 = arith.constant 0 : i32
    return %arg0, %c0_i32, %c0_i32_0 : i32, i32, i32
  }
  func.func @transform_1(%arg0: i32) -> (i32, i32) {
    %c0_i32 = arith.constant 0 : i32
    %c0_i32_0 = arith.constant 0 : i32
    %c0_i32_1 = arith.constant 0 : i32
    return %c0_i32, %c0_i32_0 : i32, i32
  }
  func.func @transform_2(%arg0: i32) -> (i32, i32) {
    %c0_i32 = arith.constant 0 : i32
    %c0_i32_0 = arith.constant 0 : i32
    %c0_i32_1 = arith.constant 0 : i32
    return %c0_i32, %c0_i32_0 : i32, i32
  }
  func.func @transform_3(%arg0: i32) -> (i32, i32, i32) {
    %c0_i32 = arith.constant 0 : i32
    %c0_i32_0 = arith.constant 0 : i32
    %c0_i32_1 = arith.constant 0 : i32
    return %arg0, %c0_i32, %c0_i32_0 : i32, i32, i32
  }
}

module attributes {stable_mosaic.version = 11 : i64} {
  func.func @conv_relu_pool_kernel(%arg0: i32, %arg1: memref<32x200x49xbf16, #tpu.memory_space<vmem>>, %arg2: memref<16x200xbf16, #tpu.memory_space<vmem>>, %arg3: memref<16x1xf32, #tpu.memory_space<vmem>>, %arg4: memref<8x16x49xbf16, #tpu.memory_space<vmem>>) attributes {dimension_semantics = [#tpu.dimension_semantics<parallel>], iteration_bounds = array<i64: 1>, scalar_prefetch = 0 : i64, scratch_operands = 0 : i64, tpu.core_type = #tpu.core_type<tc>, window_params = [{transform_indices = @transform_0, window_bounds = array<i64: 32, 200, 49>}, {pipeline_mode = #tpu.pipeline_mode<synchronous>, transform_indices = @transform_1, window_bounds = array<i64: 16, 200>}, {pipeline_mode = #tpu.pipeline_mode<synchronous>, transform_indices = @transform_2, window_bounds = array<i64: 16, 1>}, {transform_indices = @transform_3, window_bounds = array<i64: 8, 16, 49>}]} {
    %c0 = arith.constant 0 : index
    %c0_0 = arith.constant 0 : index
    %0 = vector.load %arg2[%c0, %c0_0] : memref<16x200xbf16, #tpu.memory_space<vmem>>, vector<16x200xbf16>
    %1 = vector.shape_cast %0 : vector<16x200xbf16> to vector<1x16x200xbf16>
    %2 = vector.shape_cast %1 : vector<1x16x200xbf16> to vector<1x16x200xbf16>
    %3 = vector.broadcast %2 : vector<1x16x200xbf16> to vector<32x16x200xbf16>
    %c0_1 = arith.constant 0 : index
    %c0_2 = arith.constant 0 : index
    %c0_3 = arith.constant 0 : index
    %4 = vector.load %arg1[%c0_1, %c0_2, %c0_3] : memref<32x200x49xbf16, #tpu.memory_space<vmem>>, vector<32x200x49xbf16>
    "tpu.trace_start"() <{level = 10 : i32, message = "nok,nkp->nop"}> : () -> ()
    %cst = arith.constant dense<0.000000e+00> : vector<32x16x49xf32>
    %5 = tpu.matmul %3, %4, %cst {dimension_numbers = #tpu.dot_dimension_numbers<[2], [1], [1], [2], [0, 0, 0, 1, 1, 2], [0], [0]>} : vector<32x16x200xbf16>, vector<32x200x49xbf16>, vector<32x16x49xf32> -> vector<32x16x49xf32>
    "tpu.trace_stop"() : () -> ()
    %6 = vector.shape_cast %5 : vector<32x16x49xf32> to vector<8x4x16x49xf32>
    %cst_4 = arith.constant dense<0xFF800000> : vector<8x16x49xf32>
    %7 = vector.multi_reduction <maximumf>, %6, %cst_4 [1] : vector<8x4x16x49xf32> to vector<8x16x49xf32>
    %c0_5 = arith.constant 0 : index
    %c0_6 = arith.constant 0 : index
    %8 = vector.load %arg3[%c0_5, %c0_6] : memref<16x1xf32, #tpu.memory_space<vmem>>, vector<16x1xf32>
    %9 = vector.shape_cast %8 : vector<16x1xf32> to vector<1x16x1xf32>
    %10 = vector.broadcast %9 : vector<1x16x1xf32> to vector<8x16x49xf32>
    %11 = arith.addf %7, %10 : vector<8x16x49xf32>
    %cst_7 = arith.constant 0.000000e+00 : f32
    %12 = vector.broadcast %cst_7 : f32 to vector<8x16x49xf32>
    %13 = arith.maximumf %11, %12 : vector<8x16x49xf32>
    %14 = arith.truncf %13 : vector<8x16x49xf32> to vector<8x16x49xbf16>
    %c0_8 = arith.constant 0 : index
    %c0_9 = arith.constant 0 : index
    %c0_10 = arith.constant 0 : index
    %15 = vector.load %arg4[%c0_8, %c0_9, %c0_10] : memref<8x16x49xbf16, #tpu.memory_space<vmem>>, vector<8x16x49xbf16>
    tpu.vector_store %arg4[%c0_8, %c0_9, %c0_10], %14 {strides = array<i32>} : memref<8x16x49xbf16, #tpu.memory_space<vmem>>, vector<8x16x49xbf16>,
    return
  }
  func.func @transform_0(%arg0: i32) -> (i32, i32, i32) {
    %c0_i32 = arith.constant 0 : i32
    %c0_i32_0 = arith.constant 0 : i32
    %c0_i32_1 = arith.constant 0 : i32
    return %arg0, %c0_i32, %c0_i32_0 : i32, i32, i32
  }
  func.func @transform_1(%arg0: i32) -> (i32, i32) {
    %c0_i32 = arith.constant 0 : i32
    %c0_i32_0 = arith.constant 0 : i32
    %c0_i32_1 = arith.constant 0 : i32
    return %c0_i32, %c0_i32_0 : i32, i32
  }
  func.func @transform_2(%arg0: i32) -> (i32, i32) {
    %c0_i32 = arith.constant 0 : i32
    %c0_i32_0 = arith.constant 0 : i32
    %c0_i32_1 = arith.constant 0 : i32
    return %c0_i32, %c0_i32_0 : i32, i32
  }
  func.func @transform_3(%arg0: i32) -> (i32, i32, i32) {
    %c0_i32 = arith.constant 0 : i32
    %c0_i32_0 = arith.constant 0 : i32
    %c0_i32_1 = arith.constant 0 : i32
    return %arg0, %c0_i32, %c0_i32_0 : i32, i32, i32
  }
}

module attributes {stable_mosaic.version = 11 : i64} {
  func.func @mlp_kernel(%arg0: i32, %arg1: memref<8x784xbf16, #tpu.memory_space<vmem>>, %arg2: memref<784x196xbf16, #tpu.memory_space<vmem>>, %arg3: memref<1x196xf32, #tpu.memory_space<vmem>>, %arg4: memref<196x128xbf16, #tpu.memory_space<vmem>>, %arg5: memref<1x128xf32, #tpu.memory_space<vmem>>, %arg6: memref<8x128xf32, #tpu.memory_space<vmem>>) attributes {dimension_semantics = [#tpu.dimension_semantics<parallel>], iteration_bounds = array<i64: 1>, scalar_prefetch = 0 : i64, scratch_operands = 0 : i64, tpu.core_type = #tpu.core_type<tc>, window_params = [{transform_indices = @transform_0, window_bounds = array<i64: 8, 784>}, {pipeline_mode = #tpu.pipeline_mode<synchronous>, transform_indices = @transform_1, window_bounds = array<i64: 784, 196>}, {pipeline_mode = #tpu.pipeline_mode<synchronous>, transform_indices = @transform_2, window_bounds = array<i64: 1, 196>}, {pipeline_mode = #tpu.pipeline_mode<synchronous>, transform_indices = @transform_3, window_bounds = array<i64: 196, 128>}, {pipeline_mode = #tpu.pipeline_mode<synchronous>, transform_indices = @transform_4, window_bounds = array<i64: 1, 128>}, {transform_indices = @transform_5, window_bounds = array<i64: 8, 128>}]} {
    %c0 = arith.constant 0 : index
    %c0_0 = arith.constant 0 : index
    %0 = vector.load %arg1[%c0, %c0_0] : memref<8x784xbf16, #tpu.memory_space<vmem>>, vector<8x784xbf16>
    %c0_1 = arith.constant 0 : index
    %c0_2 = arith.constant 0 : index
    %1 = vector.load %arg2[%c0_1, %c0_2] : memref<784x196xbf16, #tpu.memory_space<vmem>>, vector<784x196xbf16>
    %cst = arith.constant dense<0.000000e+00> : vector<8x196xf32>
    %2 = tpu.matmul %0, %1, %cst {dimension_numbers = #tpu.dot_dimension_numbers<[1], [0], [0], [1], [0, 0, 1, 1], [], []>} : vector<8x784xbf16>, vector<784x196xbf16>, vector<8x196xf32> -> vector<8x196xf32>
    %c0_3 = arith.constant 0 : index
    %c0_4 = arith.constant 0 : index
    %3 = vector.load %arg3[%c0_3, %c0_4] : memref<1x196xf32, #tpu.memory_space<vmem>>, vector<1x196xf32>
    %4 = vector.broadcast %3 : vector<1x196xf32> to vector<8x196xf32>
    %5 = arith.addf %2, %4 : vector<8x196xf32>
    %cst_5 = arith.constant 0.000000e+00 : f32
    %6 = vector.broadcast %cst_5 : f32 to vector<8x196xf32>
    %7 = arith.maximumf %5, %6 : vector<8x196xf32>
    %8 = arith.truncf %7 : vector<8x196xf32> to vector<8x196xbf16>
    %c0_6 = arith.constant 0 : index
    %c0_7 = arith.constant 0 : index
    %9 = vector.load %arg4[%c0_6, %c0_7] : memref<196x128xbf16, #tpu.memory_space<vmem>>, vector<196x128xbf16>
    %cst_8 = arith.constant dense<0.000000e+00> : vector<8x128xf32>
    %10 = tpu.matmul %8, %9, %cst_8 {dimension_numbers = #tpu.dot_dimension_numbers<[1], [0], [0], [1], [0, 0, 1, 1], [], []>} : vector<8x196xbf16>, vector<196x128xbf16>, vector<8x128xf32> -> vector<8x128xf32>
    %c0_9 = arith.constant 0 : index
    %c0_10 = arith.constant 0 : index
    %11 = vector.load %arg5[%c0_9, %c0_10] : memref<1x128xf32, #tpu.memory_space<vmem>>, vector<1x128xf32>
    %12 = vector.broadcast %11 : vector<1x128xf32> to vector<8x128xf32>
    %13 = arith.addf %10, %12 : vector<8x128xf32>
    %c0_11 = arith.constant 0 : index
    %c0_12 = arith.constant 0 : index
    %14 = vector.load %arg6[%c0_11, %c0_12] : memref<8x128xf32, #tpu.memory_space<vmem>>, vector<8x128xf32>
    tpu.vector_store %arg6[%c0_11, %c0_12], %13 {strides = array<i32>} : memref<8x128xf32, #tpu.memory_space<vmem>>, vector<8x128xf32>,
    return
  }
  func.func @transform_0(%arg0: i32) -> (i32, i32) {
    %c0_i32 = arith.constant 0 : i32
    %c0_i32_0 = arith.constant 0 : i32
    return %arg0, %c0_i32 : i32, i32
  }
  func.func @transform_1(%arg0: i32) -> (i32, i32) {
    %c0_i32 = arith.constant 0 : i32
    %c0_i32_0 = arith.constant 0 : i32
    %c0_i32_1 = arith.constant 0 : i32
    return %c0_i32, %c0_i32_0 : i32, i32
  }
  func.func @transform_2(%arg0: i32) -> (i32, i32) {
    %c0_i32 = arith.constant 0 : i32
    %c0_i32_0 = arith.constant 0 : i32
    %c0_i32_1 = arith.constant 0 : i32
    return %c0_i32, %c0_i32_0 : i32, i32
  }
  func.func @transform_3(%arg0: i32) -> (i32, i32) {
    %c0_i32 = arith.constant 0 : i32
    %c0_i32_0 = arith.constant 0 : i32
    %c0_i32_1 = arith.constant 0 : i32
    return %c0_i32, %c0_i32_0 : i32, i32
  }
  func.func @transform_4(%arg0: i32) -> (i32, i32) {
    %c0_i32 = arith.constant 0 : i32
    %c0_i32_0 = arith.constant 0 : i32
    %c0_i32_1 = arith.constant 0 : i32
    return %c0_i32, %c0_i32_0 : i32, i32
  }
  func.func @transform_5(%arg0: i32) -> (i32, i32) {
    %c0_i32 = arith.constant 0 : i32
    %c0_i32_0 = arith.constant 0 : i32
    return %arg0, %c0_i32 : i32, i32
  }
}

</mosaic_0001>

<bundles_post_ra>
// kernel: cnn_model2_forward.3
= control target key start
LH: loop header
LB: loop body
LE: loop exit
PB: predicated region body
PF: predicated region fallthrough
CT: control target
= control target key end

     0   :  { %vm166_vm0 = vcmask 1043456   ;;  %vm167_vm1 = vcmask 1044480   ;;  %v2601_v2 = vmov 65535   ;;  %vm162_vm2 = vcmask 203776   ;;  %s3712_s0 = inlined_call_operand.vmem [shape: bf16[32,25,196], index: 0, kind: input, shape index: {}]   ;;  %s3713_s1 = inlined_call_operand.vmem [shape: bf16[8,25], index: 1, kind: input, shape index: {}]   ;;  %s3714_s2 = inlined_call_operand.vmem [shape: f32[8,1], index: 2, kind: input, shape index: {}]   ;;  %s3715_s3 = inlined_call_operand.vmem [shape: bf16[8,8,196], index: 3, kind: output, shape index: {}]  }
   0x1   :  { %v1903_v0 = vld [vmem:[%s3712_s0 + $0x10] sm:$0xf]  ;;  %v2472_v1 = vld [vmem:[%s3712_s0 + $0x14] sm:$0x10]  ;;  %v168_v3 = vsel %vm166_vm0, 4294967295, %v2601_v2  ;;  %vm1755_vm3 = vcmask 556032  }
   0x2   :  { %v1904_v4 = vor.u32 %v2472_v1, %v1903_v0  ;;  %v2630_v5 = vsel %vm167_vm1, %v168_v3, 0  ;;  %v2471_v6 = vld [vmem:[%s3712_s0 + $0x14] sm:$0xf]  ;;  %v1905_v7 = vld [vmem:[%s3712_s0 + $0x18] sm:$0x10]  ;;  %vm1879_vm4 = vcmask 556036  }
   0x3   :  { %v1908_v8 = vor.u32 %v2471_v6, %v1905_v7  ;;  %v1921_v9 = vld [vmem:[%s3712_s0 + $0x30] sm:$0xf]  ;;  %v2476_v10 = vld [vmem:[%s3712_s0 + $0x34] sm:$0x10]  ;;  %v2475_v11 = vld [vmem:[%s3712_s0 + $0x34] sm:$0xf] }
   0x4   :  { %v171_v12 = vand.u32 %v1904_v4, %v2630_v5  ;;  %v1922_v13 = vor.u32 %v2476_v10, %v1921_v9  ;;  %v1923_v14 = vld [vmem:[%s3712_s0 + $0x38] sm:$0x10]  ;;  %v1895_v15 = vld [vmem:[%s3712_s0] sm:$0xf]  ;;  %v2470_v16 = vld [vmem:[%s3712_s0 + $0x4] sm:$0xf0] }
   0x5   :  { %v174_v17 = vand.u32 %v1908_v8, %v2630_v5  ;;  %v1926_v18 = vor.u32 %v2475_v11, %v1923_v14  ;;  %v2469_v19 = vld [vmem:[%s3712_s0 + $0x4] sm:$0xf]  ;;  %v1897_v20 = vld [vmem:[%s3712_s0 + $0x8] sm:$0xf0]  ;;  %v1913_v21 = vld [vmem:[%s3712_s0 + $0x20] sm:$0xf]  ;;  %v1896_v23 = vor.u32 %v2470_v16, %v1895_v15 }
   0x6   :  { %182 = vmatpush.bf16.msra.mxu0 %v171_v12  ;;  %v221_v22 = vand.u32 %v1922_v13, %v2630_v5  ;;  %v2474_v24 = vld [vmem:[%s3712_s0 + $0x24] sm:$0xf0]  ;;  %v2473_v25 = vld [vmem:[%s3712_s0 + $0x24] sm:$0xf]  ;;  %v1915_v26 = vld [vmem:[%s3712_s0 + $0x28] sm:$0xf0]  ;;  %v1900_v28 = vor.u32 %v2469_v19, %v1897_v20 }
   0x7   :  { %195 = vmatpush.bf16.msra.mxu1 %v174_v17  ;;  %v224_v27 = vand.u32 %v1926_v18, %v2630_v5  ;;  %v2483_v29 = vld [vmem:[%s3712_s0 + $0x74] sm:$0xf]  ;;  %v1959_v30 = vld [vmem:[%s3712_s0 + $0x78] sm:$0x10]  ;;  %v1914_v31 = vor.u32 %v2474_v24, %v1913_v21  ;;  %v1957_v33 = vld [vmem:[%s3712_s0 + $0x70] sm:$0xf]  ;;  %v1918_v36 = vor.u32 %v2473_v25, %v1915_v26 }
   0x8   :  { %232 = vmatpush.bf16.msra.mxu2 %v221_v22  ;;  %v1962_v32 = vor.u32 %v2483_v29, %v1959_v30  ;;  %v2484_v34 = vld [vmem:[%s3712_s0 + $0x74] sm:$0x10]  ;;  %v2479_v35 = vld [vmem:[%s3712_s0 + $0x54] sm:$0xf]  ;;  %v1941_v38 = vld [vmem:[%s3712_s0 + $0x58] sm:$0x10] }
   0x9   :  { %245 = vmatpush.bf16.msra.mxu3 %v224_v27  ;;  %v1958_v37 = vor.u32 %v2484_v34, %v1957_v33  ;;  %v1939_v39 = vld [vmem:[%s3712_s0 + $0x50] sm:$0xf]  ;;  %v2480_v40 = vld [vmem:[%s3712_s0 + $0x54] sm:$0x10]  ;;  %v2705_v41 = vld [vmem:[%s3713_s1] sm:$0xf]  ;;  %v1944_v43 = vor.u32 %v2479_v35, %v1941_v38 }
   0xa   :  { %183 = vmatpush.bf16.msra.mxu0 %v1896_v23  ;;  %v324_v42 = vand.u32 %v1962_v32, %v2630_v5  ;;  %v1940_v44 = vor.u32 %v2480_v40, %v1939_v39  ;;  %v2481_v45 = vld [vmem:[%s3712_s0 + $0x64] sm:$0xf]  ;;  %v1951_v46 = vld [vmem:[%s3712_s0 + $0x68] sm:$0xf0]  ;;  %v1949_v47 = vld [vmem:[%s3712_s0 + $0x60] sm:$0xf] }
   0xb   :  { %196 = vmatpush.bf16.msra.mxu1 %v1900_v28  ;;  %v2482_v48 = vld [vmem:[%s3712_s0 + $0x64] sm:$0xf0]  ;;  %v2477_v49 = vld [vmem:[%s3712_s0 + $0x44] sm:$0xf]  ;;  %v1933_v50 = vld [vmem:[%s3712_s0 + $0x48] sm:$0xf0]  ;;  %v321_v51 = vand.u32 %v1958_v37, %v2630_v5  ;;  %v274_v52 = vand.u32 %v1944_v43, %v2630_v5  ;;  %v1954_v60 = vor.u32 %v2481_v45, %v1951_v46 }
   0xc   :  { %233 = vmatpush.bf16.msra.mxu2 %v1914_v31  ;;  %v1931_v53 = vld [vmem:[%s3712_s0 + $0x40] sm:$0xf]  ;;  %v2478_v54 = vld [vmem:[%s3712_s0 + $0x44] sm:$0xf0]  ;;  %v2491_v55 = vld [vmem:[%s3712_s0 + $0xb4] sm:$0xf]  ;;  %v271_v56 = vand.u32 %v1940_v44, %v2630_v5  ;;  %v1936_v2 = vor.u32 %v2477_v49, %v1933_v50  ;;  %v1950_v6 = vor.u32 %v2482_v48, %v1949_v47 }
   0xd   :  { %246 = vmatpush.bf16.msra.mxu3 %v1918_v36  ;;  %1909 = vmatmul.msk.bf16.vlgmr.msra.gmra.mxu0 %vm162_vm2, %v2705_v41  ;;  %v1995_v57 = vld [vmem:[%s3712_s0 + $0xb8] sm:$0x10]  ;;  %v1993_v58 = vld [vmem:[%s3712_s0 + $0xb0] sm:$0xf]  ;;  %v2492_v59 = vld [vmem:[%s3712_s0 + $0xb4] sm:$0x10]  ;;  %v1932_v11 = vor.u32 %v2478_v54, %v1931_v53 }
   0xe   :  { %1910 = vmatmul.msk.bf16.vlgmr.msra.gmra.mxu1 %vm162_vm2, %v2705_v41  ;;  %v1998_v61 = vor.u32 %v2491_v55, %v1995_v57  ;;  %v1994_v62 = vor.u32 %v2492_v59, %v1993_v58  ;;  %v2487_v63 = vld [vmem:[%s3712_s0 + $0x94] sm:$0xf]  ;;  %v1977_v0 = vld [vmem:[%s3712_s0 + $0x98] sm:$0x10]  ;;  %v1975_v1 = vld [vmem:[%s3712_s0 + $0x90] sm:$0xf]  ;;  %282 = vmatpush.bf16.msrb.mxu0 %v271_v56 }
   0xf   :  { %1927 = vmatmul.msk.bf16.vlgmr.msra.gmra.mxu2 %vm162_vm2, %v2705_v41  ;;  %295 = vmatpush.bf16.msrb.mxu1 %v274_v52  ;;  %v1980_v3 = vor.u32 %v2487_v63, %v1977_v0  ;;  %v2488_v4 = vld [vmem:[%s3712_s0 + $0x94] sm:$0x10]  ;;  %v2489_v9 = vld [vmem:[%s3712_s0 + $0xa4] sm:$0xf]  ;;  %v1987_v10 = vld [vmem:[%s3712_s0 + $0xa8] sm:$0xf0] }
  0x10   :  { %1928 = vmatmul.msk.bf16.vlgmr.msra.gmra.mxu3 %vm162_vm2, %v2705_v41  ;;  %332 = vmatpush.bf16.msrb.mxu2 %v321_v51  ;;  %v424_v7 = vand.u32 %v1998_v61, %v2630_v5  ;;  %v1976_v8 = vor.u32 %v2488_v4, %v1975_v1  ;;  %v421_v12 = vand.u32 %v1994_v62, %v2630_v5  ;;  %v2485_v14 = vld [vmem:[%s3712_s0 + $0x84] sm:$0xf]  ;;  %v1969_v15 = vld [vmem:[%s3712_s0 + $0x88] sm:$0xf0]  ;;  %v1985_v17 = vld [vmem:[%s3712_s0 + $0xa0] sm:$0xf] }
  0x11   :  { %345 = vmatpush.bf16.msrb.mxu3 %v324_v42  ;;  %v374_v13 = vand.u32 %v1980_v3, %v2630_v5  ;;  %v2490_v18 = vld [vmem:[%s3712_s0 + $0xa4] sm:$0xf0]  ;;  %v1967_v19 = vld [vmem:[%s3712_s0 + $0x80] sm:$0xf]  ;;  %v1990_v20 = vor.u32 %v2489_v9, %v1987_v10  ;;  %v2495_v23 = vld [vmem:[%s3712_s0 + $0xd4] sm:$0xf]  ;;  %v1972_v24 = vor.u32 %v2485_v14, %v1969_v15 }
  0x12   :  { %v371_v16 = vand.u32 %v1976_v8, %v2630_v5  ;;  %v2486_v21 = vld [vmem:[%s3712_s0 + $0x84] sm:$0xf0]  ;;  %v1833_v22 = vld [vmem:[%s3714_s2] sm:$0xff]  ;;  %v2013_v25 = vld [vmem:[%s3712_s0 + $0xd8] sm:$0x10]  ;;  %283 = vmatpush.bf16.msrb.mxu0 %v1932_v11  ;;  %v1986_v28 = vor.u32 %v2490_v18, %v1985_v17  ;;  %v2602_v34 = vmov 0  }
  0x13   :  { %296 = vmatpush.bf16.msrb.mxu1 %v1936_v2  ;;  %v2011_v26 = vld [vmem:[%s3712_s0 + $0xd0] sm:$0xf]  ;;  %v2496_v27 = vld [vmem:[%s3712_s0 + $0xd4] sm:$0x10]  ;;  %v1968_v31 = vor.u32 %v2486_v21, %v1967_v19  ;;  %v2499_v32 = vld [vmem:[%s3712_s0 + $0xf4] sm:$0xf]  ;;  %2599 = vset.pattern.permute.xlu0 %v2602_v34  ;;  %v2016_v36 = vor.u32 %v2495_v23, %v2013_v25 }
  0x14   :  { %333 = vmatpush.bf16.msrb.mxu2 %v1950_v6  ;;  %v2029_v29 = vld [vmem:[%s3712_s0 + $0xf0] sm:$0xf]  ;;  %v2500_v30 = vld [vmem:[%s3712_s0 + $0xf4] sm:$0x10]  ;;  %v2031_v33 = vld [vmem:[%s3712_s0 + $0xf8] sm:$0x10]  ;;  %v2012_v35 = vor.u32 %v2496_v27, %v2011_v26  ;;  %1836 = vperm.xlu0 %2599, %v1833_v22  }
  0x15   :  { %346 = vmatpush.bf16.msrb.mxu3 %v1954_v60  ;;  %v2030_v37 = vor.u32 %v2500_v30, %v2029_v29  ;;  %v2034_v38 = vor.u32 %v2499_v32, %v2031_v33  ;;  %v474_v40 = vand.u32 %v2016_v36, %v2630_v5  ;;  %v2003_v42 = vld [vmem:[%s3712_s0 + $0xc0] sm:$0xf]  ;;  %v2494_v43 = vld [vmem:[%s3712_s0 + $0xc4] sm:$0xf0]  ;;  %v2493_v45 = vld [vmem:[%s3712_s0 + $0xc4] sm:$0xf] }
  0x16   :  { %382 = vmatpush.bf16.msra.mxu0 %v371_v16  ;;  %v471_v39 = vand.u32 %v2012_v35, %v2630_v5  ;;  %v2005_v46 = vld [vmem:[%s3712_s0 + $0xc8] sm:$0xf0]  ;;  %v2021_v48 = vld [vmem:[%s3712_s0 + $0xe0] sm:$0xf]  ;;  %v2498_v49 = vld [vmem:[%s3712_s0 + $0xe4] sm:$0xf0]  ;;  %v2004_v52 = vor.u32 %v2494_v43, %v2003_v42 }
  0x17   :  { %395 = vmatpush.bf16.msra.mxu1 %v374_v13  ;;  %v521_v44 = vand.u32 %v2030_v37, %v2630_v5  ;;  %v524_v47 = vand.u32 %v2034_v38, %v2630_v5  ;;  %v2497_v50 = vld [vmem:[%s3712_s0 + $0xe4] sm:$0xf]  ;;  %v2023_v51 = vld [vmem:[%s3712_s0 + $0xe8] sm:$0xf0]  ;;  %v2008_v53 = vor.u32 %v2493_v45, %v2005_v46  ;;  %v2022_v54 = vor.u32 %v2498_v49, %v2021_v48  ;;  %v2047_v56 = vld [vmem:[%s3712_s0 + $0x110] sm:$0xf] }
  0x18   :  { %432 = vmatpush.bf16.msra.mxu2 %v421_v12  ;;  %v2026_v55 = vor.u32 %v2497_v50, %v2023_v51  ;;  %v2504_v57 = vld [vmem:[%s3712_s0 + $0x114] sm:$0x10]  ;;  %v2503_v58 = vld [vmem:[%s3712_s0 + $0x114] sm:$0xf]  ;;  %v2049_v59 = vld [vmem:[%s3712_s0 + $0x118] sm:$0x10] }
  0x19   :  { %445 = vmatpush.bf16.msra.mxu3 %v424_v7  ;;  %v2065_v60 = vld [vmem:[%s3712_s0 + $0x130] sm:$0xf]  ;;  %v2508_v61 = vld [vmem:[%s3712_s0 + $0x134] sm:$0x10]  ;;  %v2507_v62 = vld [vmem:[%s3712_s0 + $0x134] sm:$0xf]  ;;  %v2048_v0 = vor.u32 %v2504_v57, %v2047_v56  ;;  %v2052_v1 = vor.u32 %v2503_v58, %v2049_v59 }
  0x1a   :  { %383 = vmatpush.bf16.msra.mxu0 %v1968_v31  ;;  %v2067_v63 = vld [vmem:[%s3712_s0 + $0x138] sm:$0x10]  ;;  %v2066_v2 = vor.u32 %v2508_v61, %v2065_v60  ;;  %v2039_v7 = vld [vmem:[%s3712_s0 + $0x100] sm:$0xf]  ;;  %v2502_v8 = vld [vmem:[%s3712_s0 + $0x104] sm:$0xf0] }
  0x1b   :  { %396 = vmatpush.bf16.msra.mxu1 %v1972_v24  ;;  %v2070_v3 = vor.u32 %v2507_v62, %v2067_v63  ;;  %v571_v4 = vand.u32 %v2048_v0, %v2630_v5  ;;  %v574_v6 = vand.u32 %v2052_v1, %v2630_v5  ;;  %v2501_v10 = vld [vmem:[%s3712_s0 + $0x104] sm:$0xf]  ;;  %v2041_v11 = vld [vmem:[%s3712_s0 + $0x108] sm:$0xf0]  ;;  %v2057_v13 = vld [vmem:[%s3712_s0 + $0x120] sm:$0xf]  ;;  %v2040_v17 = vor.u32 %v2502_v8, %v2039_v7 }
  0x1c   :  { %433 = vmatpush.bf16.msra.mxu2 %v1986_v28  ;;  %v621_v9 = vand.u32 %v2066_v2, %v2630_v5  ;;  %v2506_v14 = vld [vmem:[%s3712_s0 + $0x124] sm:$0xf0]  ;;  %v2505_v15 = vld [vmem:[%s3712_s0 + $0x124] sm:$0xf]  ;;  %v2059_v16 = vld [vmem:[%s3712_s0 + $0x128] sm:$0xf0]  ;;  %v2044_v18 = vor.u32 %v2501_v10, %v2041_v11 }
  0x1d   :  { %446 = vmatpush.bf16.msra.mxu3 %v1990_v20  ;;  %1945 = vmatmul.msk.bf16.vlgmr.msrb.gmra.mxu0 %vm162_vm2, %v2705_v41  ;;  %v624_v12 = vand.u32 %v2070_v3, %v2630_v5  ;;  %v2058_v19 = vor.u32 %v2506_v14, %v2057_v13  ;;  %v2062_v20 = vor.u32 %v2505_v15, %v2059_v16  ;;  %v2083_v21 = vld [vmem:[%s3712_s0 + $0x150] sm:$0xf]  ;;  %v2512_v22 = vld [vmem:[%s3712_s0 + $0x154] sm:$0x10]  ;;  %v2511_v23 = vld [vmem:[%s3712_s0 + $0x154] sm:$0xf] }
  0x1e   :  { %1946 = vmatmul.msk.bf16.vlgmr.msrb.gmra.mxu1 %vm162_vm2, %v2705_v41  ;;  %482 = vmatpush.bf16.msrb.mxu0 %v471_v39  ;;  %v2085_v24 = vld [vmem:[%s3712_s0 + $0x158] sm:$0x10]  ;;  %v2101_v25 = vld [vmem:[%s3712_s0 + $0x170] sm:$0xf]  ;;  %v2516_v26 = vld [vmem:[%s3712_s0 + $0x174] sm:$0x10]  ;;  %v2084_v29 = vor.u32 %v2512_v22, %v2083_v21 }
  0x1f   :  { %1963 = vmatmul.msk.bf16.vlgmr.msrb.gmra.mxu2 %vm162_vm2, %v2705_v41  ;;  %495 = vmatpush.bf16.msrb.mxu1 %v474_v40  ;;  %v2515_v27 = vld [vmem:[%s3712_s0 + $0x174] sm:$0xf]  ;;  %v2103_v28 = vld [vmem:[%s3712_s0 + $0x178] sm:$0x10]  ;;  %v2088_v30 = vor.u32 %v2511_v23, %v2085_v24  ;;  %v2102_v31 = vor.u32 %v2516_v26, %v2101_v25  ;;  %v2075_v35 = vld [vmem:[%s3712_s0 + $0x140] sm:$0xf] }
  0x20   :  { %1964 = vmatmul.msk.bf16.vlgmr.msrb.gmra.mxu3 %vm162_vm2, %v2705_v41  ;;  %532 = vmatpush.bf16.msrb.mxu2 %v521_v44  ;;  %v2106_v32 = vor.u32 %v2515_v27, %v2103_v28  ;;  %v671_v33 = vand.u32 %v2084_v29, %v2630_v5  ;;  %v2510_v36 = vld [vmem:[%s3712_s0 + $0x144] sm:$0xf0]  ;;  %v2509_v38 = vld [vmem:[%s3712_s0 + $0x144] sm:$0xf]  ;;  %v2077_v39 = vld [vmem:[%s3712_s0 + $0x148] sm:$0xf0] }
  0x21   :  { %545 = vmatpush.bf16.msrb.mxu3 %v524_v47  ;;  %v674_v34 = vand.u32 %v2088_v30, %v2630_v5  ;;  %v721_v37 = vand.u32 %v2102_v31, %v2630_v5  ;;  %v2093_v42 = vld [vmem:[%s3712_s0 + $0x160] sm:$0xf]  ;;  %v2514_v43 = vld [vmem:[%s3712_s0 + $0x164] sm:$0xf0]  ;;  %v2513_v44 = vld [vmem:[%s3712_s0 + $0x164] sm:$0xf]  ;;  %v2076_v46 = vor.u32 %v2510_v36, %v2075_v35  ;;  %v2080_v47 = vor.u32 %v2509_v38, %v2077_v39 }
  0x22   :  { %483 = vmatpush.bf16.msrb.mxu0 %v2004_v52  ;;  %v724_v40 = vand.u32 %v2106_v32, %v2630_v5  ;;  %v2095_v45 = vld [vmem:[%s3712_s0 + $0x168] sm:$0xf0]  ;;  %v2094_v48 = vor.u32 %v2514_v43, %v2093_v42  ;;  %v2119_v50 = vld [vmem:[%s3712_s0 + $0x190] sm:$0xf]  ;;  %v2520_v51 = vld [vmem:[%s3712_s0 + $0x194] sm:$0x10] }
  0x23   :  { %496 = vmatpush.bf16.msrb.mxu1 %v2008_v53  ;;  %v2098_v49 = vor.u32 %v2513_v44, %v2095_v45  ;;  %v2519_v52 = vld [vmem:[%s3712_s0 + $0x194] sm:$0xf]  ;;  %v2121_v53 = vld [vmem:[%s3712_s0 + $0x198] sm:$0x10]  ;;  %v2120_v58 = vor.u32 %v2520_v51, %v2119_v50  ;;  %v2111_v0 = vld [vmem:[%s3712_s0 + $0x180] sm:$0xf] }
  0x24   :  { %533 = vmatpush.bf16.msrb.mxu2 %v2022_v54  ;;  %v2137_v54 = vld [vmem:[%s3712_s0 + $0x1b0] sm:$0xf]  ;;  %v2523_v56 = vld [vmem:[%s3712_s0 + $0x1b4] sm:$0xf]  ;;  %v2139_v57 = vld [vmem:[%s3712_s0 + $0x1b8] sm:$0x10]  ;;  %v2124_v59 = vor.u32 %v2519_v52, %v2121_v53 }
  0x25   :  { %546 = vmatpush.bf16.msrb.mxu3 %v2026_v55  ;;  %v2524_v55 = vld [vmem:[%s3712_s0 + $0x1b4] sm:$0x10]  ;;  %v2142_v61 = vor.u32 %v2523_v56, %v2139_v57  ;;  %v771_v62 = vand.u32 %v2120_v58, %v2630_v5  ;;  %v2518_v1 = vld [vmem:[%s3712_s0 + $0x184] sm:$0xf0]  ;;  %v2517_v3 = vld [vmem:[%s3712_s0 + $0x184] sm:$0xf] }
  0x26   :  { %v2138_v60 = vor.u32 %v2524_v55, %v2137_v54  ;;  %v774_v63 = vand.u32 %v2124_v59, %v2630_v5  ;;  %v2129_v7 = vld [vmem:[%s3712_s0 + $0x1a0] sm:$0xf]  ;;  %v2522_v8 = vld [vmem:[%s3712_s0 + $0x1a4] sm:$0xf0]  ;;  %v2131_v10 = vld [vmem:[%s3712_s0 + $0x1a8] sm:$0xf0]  ;;  %v2112_v11 = vor.u32 %v2518_v1, %v2111_v0 }
  0x27   :  { %v2130_v13 = vor.u32 %v2522_v8, %v2129_v7  ;;  %v2155_v15 = vld [vmem:[%s3712_s0 + $0x1d0] sm:$0xf]  ;;  %v2528_v16 = vld [vmem:[%s3712_s0 + $0x1d4] sm:$0x10]  ;;  %v2531_v21 = vld [vmem:[%s3712_s0 + $0x1f4] sm:$0xf] }
  0x28   :  { %v821_v2 = vand.u32 %v2138_v60, %v2630_v5  ;;  %v2175_v22 = vld [vmem:[%s3712_s0 + $0x1f8] sm:$0x10]  ;;  %v2156_v23 = vor.u32 %v2528_v16, %v2155_v15  ;;  %v2147_v29 = vld [vmem:[%s3712_s0 + $0x1c0] sm:$0xf]  ;;  %v2526_v30 = vld [vmem:[%s3712_s0 + $0x1c4] sm:$0xf0] }
  0x29   :  { %v2178_v26 = vor.u32 %v2531_v21, %v2175_v22  ;;  %v2525_v32 = vld [vmem:[%s3712_s0 + $0x1c4] sm:$0xf]  ;;  %v2165_v35 = vld [vmem:[%s3712_s0 + $0x1e0] sm:$0xf]  ;;  %v2530_v36 = vld [vmem:[%s3712_s0 + $0x1e4] sm:$0xf0]  ;;  %v2148_v39 = vor.u32 %v2526_v30, %v2147_v29 }
  0x2a   :  { %v871_v27 = vand.u32 %v2156_v23, %v2630_v5  ;;  %v2167_v38 = vld [vmem:[%s3712_s0 + $0x1e8] sm:$0xf0]  ;;  %v2166_v42 = vor.u32 %v2530_v36, %v2165_v35  ;;  %v2191_v44 = vld [vmem:[%s3712_s0 + $0x210] sm:$0xf]  ;;  %v2536_v45 = vld [vmem:[%s3712_s0 + $0x214] sm:$0x10] }
  0x2b   :  { %v2539_v50 = vld [vmem:[%s3712_s0 + $0x234] sm:$0xf]  ;;  %v2211_v51 = vld [vmem:[%s3712_s0 + $0x238] sm:$0x10]  ;;  %v2192_v52 = vor.u32 %v2536_v45, %v2191_v44  ;;  %v2183_v58 = vld [vmem:[%s3712_s0 + $0x200] sm:$0xf] }
  0x2c   :  { %v2214_v55 = vor.u32 %v2539_v50, %v2211_v51  ;;  %v2534_v59 = vld [vmem:[%s3712_s0 + $0x204] sm:$0xf0]  ;;  %v2201_v0 = vld [vmem:[%s3712_s0 + $0x220] sm:$0xf]  ;;  %v2547_v15 = vld [vmem:[%s3712_s0 + $0x274] sm:$0xf] }
  0x2d   :  { %1981 = vmatmul.msk.bf16.vlgmr.msra.gmra.mxu0 %vm162_vm2, %v2705_v41  ;;  %v971_v56 = vand.u32 %v2192_v52, %v2630_v5  ;;  %v2538_v1 = vld [vmem:[%s3712_s0 + $0x224] sm:$0xf0]  ;;  %v2247_v16 = vld [vmem:[%s3712_s0 + $0x278] sm:$0x10]  ;;  %v2219_v23 = vld [vmem:[%s3712_s0 + $0x240] sm:$0xf] }
  0x2e   :  { %1982 = vmatmul.msk.bf16.vlgmr.msra.gmra.mxu1 %vm162_vm2, %v2705_v41  ;;  %582 = vmatpush.bf16.msra.mxu0 %v571_v4  ;;  %v2113_v4 = vld [vmem:[%s3712_s0 + $0x188] sm:$0xf0]  ;;  %v2202_v7 = vor.u32 %v2538_v1, %v2201_v0  ;;  %v2237_v29 = vld [vmem:[%s3712_s0 + $0x260] sm:$0xf]  ;;  %v2546_v30 = vld [vmem:[%s3712_s0 + $0x264] sm:$0xf0] }
  0x2f   :  { %1999 = vmatmul.msk.bf16.vlgmr.msra.gmra.mxu2 %vm162_vm2, %v2705_v41  ;;  %595 = vmatpush.bf16.msra.mxu1 %v574_v6  ;;  %v824_v6 = vand.u32 %v2142_v61, %v2630_v5  ;;  %v2533_v61 = vld [vmem:[%s3712_s0 + $0x204] sm:$0xf]  ;;  %v2238_v35 = vor.u32 %v2546_v30, %v2237_v29  ;;  %v2555_v44 = vld [vmem:[%s3712_s0 + $0x2b4] sm:$0xf]  ;;  %v2283_v45 = vld [vmem:[%s3712_s0 + $0x2b8] sm:$0x10] }
  0x30   :  { %2000 = vmatmul.msk.bf16.vlgmr.msra.gmra.mxu3 %vm162_vm2, %v2705_v41  ;;  %632 = vmatpush.bf16.msra.mxu2 %v621_v9  ;;  %v2521_v9 = vld [vmem:[%s3712_s0 + $0x1a4] sm:$0xf]  ;;  %vm3379_vm5 = vmor %vm1879_vm4, %vm166_vm0 }
  0x31   :  { %645 = vmatpush.bf16.msra.mxu3 %v624_v12  ;;  %v2116_v12 = vor.u32 %v2517_v3, %v2113_v4  ;;  %v2134_v14 = vor.u32 %v2521_v9, %v2131_v10  ;;  %v2203_v3 = vld [vmem:[%s3712_s0 + $0x228] sm:$0xf0]  ;;  %v2184_v4 = vor.u32 %v2534_v59, %v2183_v58  ;;  %v2543_v9 = vld [vmem:[%s3712_s0 + $0x254] sm:$0xf]  ;;  %v2229_v10 = vld [vmem:[%s3712_s0 + $0x258] sm:$0x10] }
  0x32   :  { %583 = vmatpush.bf16.msra.mxu0 %v2040_v17  ;;  %v2527_v17 = vld [vmem:[%s3712_s0 + $0x1d4] sm:$0xf]  ;;  %v2257_v58 = vld [vmem:[%s3712_s0 + $0x288] sm:$0xf0]  ;;  %v2557_v30 = vld [vmem:[%s3712_s0 + $0x2c4] sm:$0xf] }
  0x33   :  { %596 = vmatpush.bf16.msra.mxu1 %v2044_v18  ;;  %v2157_v18 = vld [vmem:[%s3712_s0 + $0x1d8] sm:$0x10] }
  0x34   :  { %633 = vmatpush.bf16.msra.mxu2 %v2058_v19  ;;  %v2173_v19 = vld [vmem:[%s3712_s0 + $0x1f0] sm:$0xf]  ;;  %v2160_v24 = vor.u32 %v2527_v17, %v2157_v18  ;;  %v2232_v18 = vor.u32 %v2543_v9, %v2229_v10  ;;  %v2559_v10 = vld [vmem:[%s3712_s0 + $0x2d4] sm:$0xf] }
  0x35   :  { %646 = vmatpush.bf16.msra.mxu3 %v2062_v20  ;;  %v2532_v20 = vld [vmem:[%s3712_s0 + $0x1f4] sm:$0x10]  ;;  %v2317_v9 = vld [vmem:[%s3712_s0 + $0x2f0] sm:$0xf] }
  0x36   :  { %v2174_v25 = vor.u32 %v2532_v20, %v2173_v19  ;;  %v874_v28 = vand.u32 %v2160_v24, %v2630_v5  ;;  %v2250_v20 = vor.u32 %v2547_v15, %v2247_v16  ;;  %v1074_v22 = vand.u32 %v2232_v18, %v2630_v5  ;;  %v2542_v24 = vld [vmem:[%s3712_s0 + $0x244] sm:$0xf0]  ;;  %v2563_v15 = vld [vmem:[%s3712_s0 + $0x2f4] sm:$0xf]  ;;  %v2319_v16 = vld [vmem:[%s3712_s0 + $0x2f8] sm:$0x10] }
  0x38   :  { %v921_v31 = vand.u32 %v2174_v25, %v2630_v5 }
  0x3d   :  { %2017 = vmatmul.msk.bf16.vlgmr.msrb.gmra.mxu0 %vm162_vm2, %v2705_v41 }
  0x3e   :  { %2018 = vmatmul.msk.bf16.vlgmr.msrb.gmra.mxu1 %vm162_vm2, %v2705_v41  ;;  %682 = vmatpush.bf16.msrb.mxu0 %v671_v33  ;;  %v2149_v33 = vld [vmem:[%s3712_s0 + $0x1c8] sm:$0xf0] }
  0x3f   :  { %2035 = vmatmul.msk.bf16.vlgmr.msrb.gmra.mxu2 %vm162_vm2, %v2705_v41  ;;  %695 = vmatpush.bf16.msrb.mxu1 %v674_v34  ;;  %v924_v34 = vand.u32 %v2178_v26, %v2630_v5  ;;  %v2541_v26 = vld [vmem:[%s3712_s0 + $0x244] sm:$0xf] }
  0x40   :  { %2036 = vmatmul.msk.bf16.vlgmr.msrb.gmra.mxu3 %vm162_vm2, %v2705_v41  ;;  %732 = vmatpush.bf16.msrb.mxu2 %v721_v37  ;;  %v2529_v37 = vld [vmem:[%s3712_s0 + $0x1e4] sm:$0xf] }
  0x41   :  { %745 = vmatpush.bf16.msrb.mxu3 %v724_v40  ;;  %v2152_v40 = vor.u32 %v2525_v32, %v2149_v33  ;;  %v2170_v43 = vor.u32 %v2529_v37, %v2167_v38  ;;  %v2239_v32 = vld [vmem:[%s3712_s0 + $0x268] sm:$0xf0]  ;;  %v2220_v33 = vor.u32 %v2542_v24, %v2219_v23  ;;  %v2551_v37 = vld [vmem:[%s3712_s0 + $0x294] sm:$0xf]  ;;  %v2265_v38 = vld [vmem:[%s3712_s0 + $0x298] sm:$0x10] }
  0x42   :  { %683 = vmatpush.bf16.msrb.mxu0 %v2076_v46  ;;  %v2535_v46 = vld [vmem:[%s3712_s0 + $0x214] sm:$0xf] }
  0x43   :  { %696 = vmatpush.bf16.msrb.mxu1 %v2080_v47  ;;  %v2193_v47 = vld [vmem:[%s3712_s0 + $0x218] sm:$0x10] }
  0x44   :  { %733 = vmatpush.bf16.msrb.mxu2 %v2094_v48  ;;  %v2209_v48 = vld [vmem:[%s3712_s0 + $0x230] sm:$0xf]  ;;  %v2196_v53 = vor.u32 %v2535_v46, %v2193_v47  ;;  %v2268_v47 = vor.u32 %v2551_v37, %v2265_v38  ;;  %v2311_v37 = vld [vmem:[%s3712_s0 + $0x2e8] sm:$0xf0] }
  0x45   :  { %746 = vmatpush.bf16.msrb.mxu3 %v2098_v49  ;;  %v2540_v49 = vld [vmem:[%s3712_s0 + $0x234] sm:$0x10] }
  0x46   :  { %v2210_v54 = vor.u32 %v2540_v49, %v2209_v48  ;;  %v974_v57 = vand.u32 %v2196_v53, %v2630_v5  ;;  %v2286_v49 = vor.u32 %v2555_v44, %v2283_v45  ;;  %v1174_v53 = vand.u32 %v2268_v47, %v2630_v5 }
  0x48   :  { %v1021_v60 = vand.u32 %v2210_v54, %v2630_v5  ;;  %v2255_v54 = vld [vmem:[%s3712_s0 + $0x280] sm:$0xf]  ;;  %v1224_v59 = vand.u32 %v2286_v49, %v2630_v5 }
  0x4d   :  { %2053 = vmatmul.msk.bf16.vlgmr.msra.gmra.mxu0 %vm162_vm2, %v2705_v41 }
  0x4e   :  { %2054 = vmatmul.msk.bf16.vlgmr.msra.gmra.mxu1 %vm162_vm2, %v2705_v41  ;;  %782 = vmatpush.bf16.msra.mxu0 %v771_v62  ;;  %v2185_v62 = vld [vmem:[%s3712_s0 + $0x208] sm:$0xf0] }
  0x4f   :  { %2071 = vmatmul.msk.bf16.vlgmr.msra.gmra.mxu2 %vm162_vm2, %v2705_v41  ;;  %795 = vmatpush.bf16.msra.mxu1 %v774_v63  ;;  %v1024_v63 = vand.u32 %v2214_v55, %v2630_v5  ;;  %v2550_v55 = vld [vmem:[%s3712_s0 + $0x284] sm:$0xf0] }
  0x50   :  { %2072 = vmatmul.msk.bf16.vlgmr.msra.gmra.mxu3 %vm162_vm2, %v2705_v41  ;;  %832 = vmatpush.bf16.msra.mxu2 %v821_v2  ;;  %v2537_v2 = vld [vmem:[%s3712_s0 + $0x224] sm:$0xf]  ;;  %v2256_v0 = vor.u32 %v2550_v55, %v2255_v54  ;;  %v2353_v55 = vld [vmem:[%s3712_s0 + $0x330] sm:$0xf] }
  0x51   :  { %845 = vmatpush.bf16.msra.mxu3 %v824_v6  ;;  %v2188_v6 = vor.u32 %v2533_v61, %v2185_v62  ;;  %v2206_v8 = vor.u32 %v2537_v2, %v2203_v3  ;;  %v2554_v61 = vld [vmem:[%s3712_s0 + $0x2a4] sm:$0xf0]  ;;  %v2553_v62 = vld [vmem:[%s3712_s0 + $0x2a4] sm:$0xf] }
  0x52   :  { %783 = vmatpush.bf16.msra.mxu0 %v2112_v11  ;;  %v2227_v11 = vld [vmem:[%s3712_s0 + $0x250] sm:$0xf] }
  0x53   :  { %796 = vmatpush.bf16.msra.mxu1 %v2116_v12  ;;  %v2245_v12 = vld [vmem:[%s3712_s0 + $0x270] sm:$0xf] }
  0x54   :  { %833 = vmatpush.bf16.msra.mxu2 %v2130_v13  ;;  %v2548_v13 = vld [vmem:[%s3712_s0 + $0x274] sm:$0x10] }
  0x55   :  { %846 = vmatpush.bf16.msra.mxu3 %v2134_v14  ;;  %v2544_v14 = vld [vmem:[%s3712_s0 + $0x254] sm:$0x10]  ;;  %v2246_v19 = vor.u32 %v2548_v13, %v2245_v12  ;;  %v2299_v13 = vld [vmem:[%s3712_s0 + $0x2d0] sm:$0xf] }
  0x56   :  { %v2228_v17 = vor.u32 %v2544_v14, %v2227_v11  ;;  %v2301_v11 = vld [vmem:[%s3712_s0 + $0x2d8] sm:$0x10]  ;;  %v2564_v12 = vld [vmem:[%s3712_s0 + $0x2f4] sm:$0x10] }
  0x57   :  { %v1121_v25 = vand.u32 %v2246_v19, %v2630_v5  ;;  %v2560_v14 = vld [vmem:[%s3712_s0 + $0x2d4] sm:$0x10]  ;;  %v2304_v18 = vor.u32 %v2559_v10, %v2301_v11  ;;  %v2318_v19 = vor.u32 %v2564_v12, %v2317_v9 }
  0x58   :  { %v1071_v21 = vand.u32 %v2228_v17, %v2630_v5  ;;  %v2300_v17 = vor.u32 %v2560_v14, %v2299_v13 }
  0x59   :  { %v1321_v29 = vand.u32 %v2318_v19, %v2630_v5 }
  0x5a   :  { %v1271_v23 = vand.u32 %v2300_v17, %v2630_v5 }
  0x5d   :  { %2089 = vmatmul.msk.bf16.vlgmr.msrb.gmra.mxu0 %vm162_vm2, %v2705_v41 }
  0x5e   :  { %2090 = vmatmul.msk.bf16.vlgmr.msrb.gmra.mxu1 %vm162_vm2, %v2705_v41  ;;  %882 = vmatpush.bf16.msrb.mxu0 %v871_v27  ;;  %v2221_v27 = vld [vmem:[%s3712_s0 + $0x248] sm:$0xf0] }
  0x5f   :  { %2107 = vmatmul.msk.bf16.vlgmr.msrb.gmra.mxu2 %vm162_vm2, %v2705_v41  ;;  %895 = vmatpush.bf16.msrb.mxu1 %v874_v28  ;;  %v1124_v28 = vand.u32 %v2250_v20, %v2630_v5  ;;  %v2322_v20 = vor.u32 %v2563_v15, %v2319_v16 }
  0x60   :  { %2108 = vmatmul.msk.bf16.vlgmr.msrb.gmra.mxu3 %vm162_vm2, %v2705_v41  ;;  %932 = vmatpush.bf16.msrb.mxu2 %v921_v31  ;;  %v2545_v31 = vld [vmem:[%s3712_s0 + $0x264] sm:$0xf] }
  0x61   :  { %945 = vmatpush.bf16.msrb.mxu3 %v924_v34  ;;  %v2224_v34 = vor.u32 %v2541_v26, %v2221_v27  ;;  %v2242_v36 = vor.u32 %v2545_v31, %v2239_v32  ;;  %v1274_v26 = vand.u32 %v2304_v18, %v2630_v5  ;;  %v2291_v27 = vld [vmem:[%s3712_s0 + $0x2c0] sm:$0xf]  ;;  %v2293_v31 = vld [vmem:[%s3712_s0 + $0x2c8] sm:$0xf0]  ;;  %v1324_v32 = vand.u32 %v2322_v20, %v2630_v5  ;;  %v2565_v18 = vld [vmem:[%s3712_s0 + $0x304] sm:$0xf] }
  0x62   :  { %883 = vmatpush.bf16.msrb.mxu0 %v2148_v39  ;;  %v2263_v39 = vld [vmem:[%s3712_s0 + $0x290] sm:$0xf]  ;;  %v2329_v20 = vld [vmem:[%s3712_s0 + $0x308] sm:$0xf0] }
  0x63   :  { %896 = vmatpush.bf16.msrb.mxu1 %v2152_v40  ;;  %v2281_v40 = vld [vmem:[%s3712_s0 + $0x2b0] sm:$0xf] }
  0x64   :  { %933 = vmatpush.bf16.msrb.mxu2 %v2166_v42  ;;  %v2556_v42 = vld [vmem:[%s3712_s0 + $0x2b4] sm:$0x10] }
  0x65   :  { %946 = vmatpush.bf16.msrb.mxu3 %v2170_v43  ;;  %v2552_v43 = vld [vmem:[%s3712_s0 + $0x294] sm:$0x10]  ;;  %v2282_v48 = vor.u32 %v2556_v42, %v2281_v40  ;;  %v2296_v40 = vor.u32 %v2557_v30, %v2293_v31 }
  0x66   :  { %v2264_v46 = vor.u32 %v2552_v43, %v2263_v39 }
  0x68   :  { %v1171_v51 = vand.u32 %v2264_v46, %v2630_v5 }
  0x6d   :  { %2125 = vmatmul.msk.bf16.vlgmr.msra.gmra.mxu0 %vm162_vm2, %v2705_v41 }
  0x6e   :  { %2126 = vmatmul.msk.bf16.vlgmr.msra.gmra.mxu1 %vm162_vm2, %v2705_v41  ;;  %982 = vmatpush.bf16.msra.mxu0 %v971_v56  ;;  %v1221_v56 = vand.u32 %v2282_v48, %v2630_v5 }
  0x6f   :  { %2143 = vmatmul.msk.bf16.vlgmr.msra.gmra.mxu2 %vm162_vm2, %v2705_v41  ;;  %995 = vmatpush.bf16.msra.mxu1 %v974_v57  ;;  %v2549_v57 = vld [vmem:[%s3712_s0 + $0x284] sm:$0xf] }
  0x70   :  { %2144 = vmatmul.msk.bf16.vlgmr.msra.gmra.mxu3 %vm162_vm2, %v2705_v41  ;;  %1032 = vmatpush.bf16.msra.mxu2 %v1021_v60  ;;  %v2273_v60 = vld [vmem:[%s3712_s0 + $0x2a0] sm:$0xf]  ;;  %v2260_v1 = vor.u32 %v2549_v57, %v2257_v58  ;;  %v2567_v57 = vld [vmem:[%s3712_s0 + $0x314] sm:$0xf]  ;;  %v2337_v58 = vld [vmem:[%s3712_s0 + $0x318] sm:$0x10] }
  0x71   :  { %1045 = vmatpush.bf16.msra.mxu3 %v1024_v63  ;;  %v2275_v63 = vld [vmem:[%s3712_s0 + $0x2a8] sm:$0xf0]  ;;  %v2274_v2 = vor.u32 %v2554_v61, %v2273_v60  ;;  %v2572_v60 = vld [vmem:[%s3712_s0 + $0x334] sm:$0x10] }
  0x72   :  { %983 = vmatpush.bf16.msra.mxu0 %v2184_v4  ;;  %v2278_v3 = vor.u32 %v2553_v62, %v2275_v63  ;;  %v2335_v62 = vld [vmem:[%s3712_s0 + $0x310] sm:$0xf]  ;;  %v2568_v63 = vld [vmem:[%s3712_s0 + $0x314] sm:$0x10] }
  0x73   :  { %996 = vmatpush.bf16.msra.mxu1 %v2188_v6 }
  0x74   :  { %1033 = vmatpush.bf16.msra.mxu2 %v2202_v7 }
  0x75   :  { %1046 = vmatpush.bf16.msra.mxu3 %v2206_v8 }
  0x7d   :  { %2161 = vmatmul.msk.bf16.vlgmr.msrb.gmra.mxu0 %vm162_vm2, %v2705_v41 }
  0x7e   :  { %2162 = vmatmul.msk.bf16.vlgmr.msrb.gmra.mxu1 %vm162_vm2, %v2705_v41  ;;  %1082 = vmatpush.bf16.msrb.mxu0 %v1071_v21 }
  0x7f   :  { %2179 = vmatmul.msk.bf16.vlgmr.msrb.gmra.mxu2 %vm162_vm2, %v2705_v41  ;;  %1095 = vmatpush.bf16.msrb.mxu1 %v1074_v22 }
  0x80   :  { %2180 = vmatmul.msk.bf16.vlgmr.msrb.gmra.mxu3 %vm162_vm2, %v2705_v41  ;;  %1132 = vmatpush.bf16.msrb.mxu2 %v1121_v25 }
  0x81   :  { %1145 = vmatpush.bf16.msrb.mxu3 %v1124_v28  ;;  %v2558_v28 = vld [vmem:[%s3712_s0 + $0x2c4] sm:$0xf0] }
  0x82   :  { %1083 = vmatpush.bf16.msrb.mxu0 %v2220_v33  ;;  %v2309_v33 = vld [vmem:[%s3712_s0 + $0x2e0] sm:$0xf]  ;;  %v2292_v38 = vor.u32 %v2558_v28, %v2291_v27  ;;  %v2347_v27 = vld [vmem:[%s3712_s0 + $0x328] sm:$0xf0] }
  0x83   :  { %1096 = vmatpush.bf16.msrb.mxu1 %v2224_v34  ;;  %v2562_v34 = vld [vmem:[%s3712_s0 + $0x2e4] sm:$0xf0] }
  0x84   :  { %1133 = vmatpush.bf16.msrb.mxu2 %v2238_v35  ;;  %v2310_v44 = vor.u32 %v2562_v34, %v2309_v33 }
  0x85   :  { %1146 = vmatpush.bf16.msrb.mxu3 %v2242_v36  ;;  %v2561_v36 = vld [vmem:[%s3712_s0 + $0x2e4] sm:$0xf] }
  0x86   :  { %v3347_v47 = vpop.permute.xlu0 %1836  ;;  %v2314_v48 = vor.u32 %v2561_v36, %v2311_v37  ;;  %v2389_v36 = vld [vmem:[%s3712_s0 + $0x370] sm:$0xf]  ;;  %v2575_v37 = vld [vmem:[%s3712_s0 + $0x354] sm:$0xf] }
  0x8a   :  { %v3242_v50 = vpop.f32.mrf.mxu0 }
  0x8b   :  { %v3245_v52 = vpop.f32.mrf.mxu1 }
  0x8c   :  { %v1756_v42 = vsel %vm1755_vm3, %v3245_v52, -inf }
  0x8d   :  { %2197 = vmatmul.msk.bf16.vlgmr.msra.gmra.mxu0 %vm162_vm2, %v2705_v41 }
  0x8e   :  { %2198 = vmatmul.msk.bf16.vlgmr.msra.gmra.mxu1 %vm162_vm2, %v2705_v41  ;;  %1182 = vmatpush.bf16.msra.mxu0 %v1171_v51 }
  0x8f   :  { %2215 = vmatmul.msk.bf16.vlgmr.msra.gmra.mxu2 %vm162_vm2, %v2705_v41  ;;  %1195 = vmatpush.bf16.msra.mxu1 %v1174_v53 }
  0x90   :  { %2216 = vmatmul.msk.bf16.vlgmr.msra.gmra.mxu3 %vm162_vm2, %v2705_v41  ;;  %1232 = vmatpush.bf16.msra.mxu2 %v1221_v56 }
  0x91   :  { %1245 = vmatpush.bf16.msra.mxu3 %v1224_v59 }
  0x92   :  { %v235_v4 = vpop.f32.mrf.mxu2  ;;  %v187_v6 = vpop.f32.mrf.mxu0  ;;  %1183 = vmatpush.bf16.msra.mxu0 %v2256_v0  ;;  %v2571_v0 = vld [vmem:[%s3712_s0 + $0x334] sm:$0xf] }
  0x93   :  { %v248_v7 = vpop.f32.mrf.mxu3  ;;  %v200_v8 = vpop.f32.mrf.mxu1  ;;  %1196 = vmatpush.bf16.msra.mxu1 %v2260_v1  ;;  %v1752_v39 = vmax.f32 %v3242_v50, %v235_v4  ;;  %v2355_v1 = vld [vmem:[%s3712_s0 + $0x338] sm:$0x10]  ;;  %v2340_v6 = vor.u32 %v2567_v57, %v2337_v58  ;;  %v2573_v58 = vld [vmem:[%s3712_s0 + $0x344] sm:$0xf] }
  0x94   :  { %1233 = vmatpush.bf16.msra.mxu2 %v2274_v2  ;;  %v1757_v35 = vsel %vm1755_vm3, %v248_v7, -inf  ;;  %v2336_v2 = vor.u32 %v2568_v63, %v2335_v62  ;;  %v2354_v7 = vor.u32 %v2572_v60, %v2353_v55  ;;  %v2358_v8 = vor.u32 %v2571_v0, %v2355_v1  ;;  %v2363_v55 = vld [vmem:[%s3712_s0 + $0x340] sm:$0xf]  ;;  %v2578_v63 = vld [vmem:[%s3712_s0 + $0x364] sm:$0xf0] }
  0x95   :  { %1246 = vmatpush.bf16.msra.mxu3 %v2278_v3  ;;  %v1758_v45 = vmax.f32 %v1756_v42, %v1757_v35  ;;  %v1374_v17 = vand.u32 %v2340_v6, %v2630_v5  ;;  %v2579_v42 = vld [vmem:[%s3712_s0 + $0x374] sm:$0xf]  ;;  %v3468_v60 = vld [vmem:[%s3713_s1] sm:$0xf]  ;;  %v2577_v1 = vld [vmem:[%s3712_s0 + $0x364] sm:$0xf] }
  0x96   :  { %v1371_v13 = vand.u32 %v2336_v2, %v2630_v5  ;;  %v1421_v19 = vand.u32 %v2354_v7, %v2630_v5  ;;  %v2381_v62 = vld [vmem:[%s3712_s0 + $0x360] sm:$0xf]  ;;  %v2383_v2 = vld [vmem:[%s3712_s0 + $0x368] sm:$0xf0] }
  0x9a   :  { %v237_v21 = vpop.f32.mrf.mxu2  ;;  %v285_v22 = vpop.f32.mrf.mxu0 }
  0x9b   :  { %v250_v24 = vpop.f32.mrf.mxu3  ;;  %v298_v25 = vpop.f32.mrf.mxu1  ;;  %v1753_v46 = vmax.f32 %v1752_v39, %v285_v22  ;;  %v2327_v21 = vld [vmem:[%s3712_s0 + $0x300] sm:$0xf]  ;;  %v2566_v22 = vld [vmem:[%s3712_s0 + $0x304] sm:$0xf0]  ;;  %v2371_v39 = vld [vmem:[%s3712_s0 + $0x350] sm:$0xf] }
  0x9c   :  { %v1759_v43 = vsel %vm1755_vm3, %v298_v25, -inf  ;;  %v2345_v24 = vld [vmem:[%s3712_s0 + $0x320] sm:$0xf]  ;;  %v2570_v25 = vld [vmem:[%s3712_s0 + $0x324] sm:$0xf0]  ;;  %v2328_v28 = vor.u32 %v2566_v22, %v2327_v21 }
  0x9d   :  { %2233 = vmatmul.msk.bf16.vlgmr.msrb.gmra.mxu0 %vm162_vm2, %v2705_v41  ;;  %v1760_v51 = vmax.f32 %v1758_v45, %v1759_v43  ;;  %v2346_v30 = vor.u32 %v2570_v25, %v2345_v24  ;;  %v2391_v43 = vld [vmem:[%s3712_s0 + $0x378] sm:$0x10]  ;;  %v2583_v22 = vld [vmem:[%s3712_s0 + $0x394] sm:$0xf] }
  0x9e   :  { %2234 = vmatmul.msk.bf16.vlgmr.msrb.gmra.mxu1 %vm162_vm2, %v2705_v41  ;;  %1282 = vmatpush.bf16.msrb.mxu0 %v1271_v23  ;;  %v1424_v23 = vand.u32 %v2358_v8, %v2630_v5 }
  0x9f   :  { %2251 = vmatmul.msk.bf16.vlgmr.msrb.gmra.mxu2 %vm162_vm2, %v2705_v41  ;;  %1295 = vmatpush.bf16.msrb.mxu1 %v1274_v26  ;;  %v2569_v26 = vld [vmem:[%s3712_s0 + $0x324] sm:$0xf] }
  0xa0   :  { %2252 = vmatmul.msk.bf16.vlgmr.msrb.gmra.mxu3 %vm162_vm2, %v2705_v41  ;;  %1332 = vmatpush.bf16.msrb.mxu2 %v1321_v29  ;;  %v2332_v29 = vor.u32 %v2565_v18, %v2329_v20  ;;  %v2350_v31 = vor.u32 %v2569_v26, %v2347_v27  ;;  %v2588_v26 = vld [vmem:[%s3712_s0 + $0x3b4] sm:$0x10]  ;;  %v2407_v27 = vld [vmem:[%s3712_s0 + $0x390] sm:$0xf] }
  0xa1   :  { %1345 = vmatpush.bf16.msrb.mxu3 %v1324_v32 }
  0xa2   :  { %v335_v49 = vpop.f32.mrf.mxu2  ;;  %v287_v50 = vpop.f32.mrf.mxu0  ;;  %1283 = vmatpush.bf16.msrb.mxu0 %v2292_v38  ;;  %v2580_v38 = vld [vmem:[%s3712_s0 + $0x374] sm:$0x10] }
  0xa3   :  { %v1754_v53 = vmax.f32 %v1753_v46, %v335_v49  ;;  %v348_v54 = vpop.f32.mrf.mxu3  ;;  %v300_v52 = vpop.f32.mrf.mxu1  ;;  %1296 = vmatpush.bf16.msrb.mxu1 %v2296_v40  ;;  %v2576_v40 = vld [vmem:[%s3712_s0 + $0x354] sm:$0x10]  ;;  %v2390_v46 = vor.u32 %v2580_v38, %v2389_v36 }
  0xa4   :  { %v1761_v56 = vsel %vm1755_vm3, %v348_v54, -inf  ;;  %1333 = vmatpush.bf16.msrb.mxu2 %v2310_v44  ;;  %v2372_v44 = vor.u32 %v2576_v40, %v2371_v39 }
  0xa5   :  { %v1762_v59 = vmax.f32 %v1760_v51, %v1761_v56  ;;  %1346 = vmatpush.bf16.msrb.mxu3 %v2314_v48  ;;  %v1839_v61 = vadd.f32 %v3347_v47, %v1754_v53  ;;  %v2394_v48 = vor.u32 %v2579_v42, %v2391_v43  ;;  %v2574_v56 = vld [vmem:[%s3712_s0 + $0x344] sm:$0xf0]  ;;  %v1521_v57 = vand.u32 %v2390_v46, %v2630_v5 }
  0xa6   :  { %v1471_v51 = vand.u32 %v2372_v44, %v2630_v5 }
  0xa7   :  { %v1840_v3 = vadd.f32 %v3347_v47, %v1762_v59  ;;  %v1855_v4 = vmax.f32 %v1839_v61, 0.0  ;;  %v2365_v59 = vld [vmem:[%s3712_s0 + $0x348] sm:$0xf0]  ;;  %v1524_v61 = vand.u32 %v2394_v48, %v2630_v5 }
  0xa8   :  { %v2368_v6 = vor.u32 %v2573_v58, %v2365_v59  ;;  %v2401_v48 = vld [vmem:[%s3712_s0 + $0x388] sm:$0xf0] }
  0xa9   :  { %v1856_v9 = vmax.f32 %v1840_v3, 0.0  ;;  %v2364_v3 = vor.u32 %v2574_v56, %v2363_v55  ;;  %v2419_v55 = vld [vmem:[%s3712_s0 + $0x3a8] sm:$0xf0] }
  0xaa   :  { %v337_v10 = vpop.f32.mrf.mxu2  ;;  %v3376_v11 = vpop.f32.mrf.mxu0 }
  0xab   :  { %v350_v14 = vpop.f32.mrf.mxu3  ;;  %v3384_v15 = vpop.f32.mrf.mxu1  ;;  %v1871_v16 = vpack.c.bf16 %v1856_v9, %v1855_v4  ;;  %v2382_v9 = vor.u32 %v2578_v63, %v2381_v62 }
  0xac   :  { %v1766_v7 = vsel %vm1755_vm3, %v3384_v15, -inf  ;;  %v2386_v14 = vor.u32 %v2577_v1, %v2383_v2  ;;  %v2425_v15 = vld [vmem:[%s3712_s0 + $0x3b0] sm:$0xf]  ;;  %v2591_v2 = vld [vmem:[%s3712_s0 + $0x3d4] sm:$0xf] }
  0xad   :  { %2269 = vmatmul.msk.bf16.vlgmr.msra.gmra.mxu0 %vm162_vm2, %v2705_v41  ;;  %1881 = vst.msk [vmem:[%s3715_s3] sm:$0xff] %vm3379_vm5, %v1871_v16  ;;  %v2461_v1 = vld [vmem:[%s3712_s0 + $0x3f0] sm:$0xf] }
  0xae   :  { %2270 = vmatmul.msk.bf16.vlgmr.msra.gmra.mxu1 %vm162_vm2, %v2705_v41  ;;  %1382 = vmatpush.bf16.msra.mxu0 %v1371_v13 }
  0xaf   :  { %2287 = vmatmul.msk.bf16.vlgmr.msra.gmra.mxu2 %vm162_vm2, %v2705_v41  ;;  %1395 = vmatpush.bf16.msra.mxu1 %v1374_v17 }
  0xb0   :  { %2288 = vmatmul.msk.bf16.vlgmr.msra.gmra.mxu3 %vm162_vm2, %v2705_v41  ;;  %1432 = vmatpush.bf16.msra.mxu2 %v1421_v19  ;;  %v2373_v41 = vld [vmem:[%s3712_s0 + $0x358] sm:$0x10] }
  0xb1   :  { %1445 = vmatpush.bf16.msra.mxu3 %v1424_v23  ;;  %v2376_v45 = vor.u32 %v2575_v37, %v2373_v41  ;;  %v2409_v23 = vld [vmem:[%s3712_s0 + $0x398] sm:$0x10] }
  0xb2   :  { %v435_v32 = vpop.f32.mrf.mxu2  ;;  %v387_v33 = vpop.f32.mrf.mxu0  ;;  %1383 = vmatpush.bf16.msra.mxu0 %v2328_v28  ;;  %v2584_v28 = vld [vmem:[%s3712_s0 + $0x394] sm:$0x10] }
  0xb3   :  { %v448_v34 = vpop.f32.mrf.mxu3  ;;  %v400_v35 = vpop.f32.mrf.mxu1  ;;  %1396 = vmatpush.bf16.msra.mxu1 %v2332_v29  ;;  %v1474_v52 = vand.u32 %v2376_v45, %v2630_v5  ;;  %v1763_v4 = vmax.f32 %v3376_v11, %v435_v32  ;;  %v2587_v29 = vld [vmem:[%s3712_s0 + $0x3b4] sm:$0xf]  ;;  %v2581_v45 = vld [vmem:[%s3712_s0 + $0x384] sm:$0xf] }
  0xb4   :  { %1433 = vmatpush.bf16.msra.mxu2 %v2346_v30  ;;  %v1767_v0 = vsel %vm1755_vm3, %v448_v34, -inf  ;;  %v2427_v30 = vld [vmem:[%s3712_s0 + $0x3b8] sm:$0x10]  ;;  %v2412_v34 = vor.u32 %v2583_v22, %v2409_v23  ;;  %v2426_v35 = vor.u32 %v2588_v26, %v2425_v15  ;;  %v2590_v22 = vld [vmem:[%s3712_s0 + $0x3c4] sm:$0xf0] }
  0xb5   :  { %1446 = vmatpush.bf16.msra.mxu3 %v2350_v31  ;;  %v1768_v10 = vmax.f32 %v1766_v7, %v1767_v0  ;;  %v2408_v31 = vor.u32 %v2584_v28, %v2407_v27  ;;  %v2430_v37 = vor.u32 %v2587_v29, %v2427_v30  ;;  %v2592_v7 = vld [vmem:[%s3712_s0 + $0x3d4] sm:$0x10]  ;;  %v2453_v27 = vld [vmem:[%s3712_s0 + $0x3e0] sm:$0xf]  ;;  %v2594_v28 = vld [vmem:[%s3712_s0 + $0x3e4] sm:$0xf0] }
  0xb6   :  { %v1574_v44 = vand.u32 %v2412_v34, %v2630_v5  ;;  %v1621_v46 = vand.u32 %v2426_v35, %v2630_v5  ;;  %v2593_v30 = vld [vmem:[%s3712_s0 + $0x3e4] sm:$0xf] }
  0xb7   :  { %v1571_v39 = vand.u32 %v2408_v31, %v2630_v5 }
  0xba   :  { %v437_v49 = vpop.f32.mrf.mxu2  ;;  %v485_v50 = vpop.f32.mrf.mxu0 }
  0xbb   :  { %v450_v53 = vpop.f32.mrf.mxu3  ;;  %v498_v54 = vpop.f32.mrf.mxu1  ;;  %v1764_v13 = vmax.f32 %v1763_v4, %v485_v50  ;;  %v2399_v49 = vld [vmem:[%s3712_s0 + $0x380] sm:$0xf]  ;;  %v2582_v50 = vld [vmem:[%s3712_s0 + $0x384] sm:$0xf0]  ;;  %v2596_v4 = vld [vmem:[%s3712_s0 + $0x3f4] sm:$0x10] }
  0xbc   :  { %v1769_v8 = vsel %vm1755_vm3, %v498_v54, -inf  ;;  %v2417_v53 = vld [vmem:[%s3712_s0 + $0x3a0] sm:$0xf]  ;;  %v2586_v54 = vld [vmem:[%s3712_s0 + $0x3a4] sm:$0xf0]  ;;  %v2400_v56 = vor.u32 %v2582_v50, %v2399_v49 }
  0xbd   :  { %2305 = vmatmul.msk.bf16.vlgmr.msrb.gmra.mxu0 %vm162_vm2, %v3468_v60  ;;  %v1770_v17 = vmax.f32 %v1768_v10, %v1769_v8  ;;  %v2418_v58 = vor.u32 %v2586_v54, %v2417_v53  ;;  %v2595_v8 = vld [vmem:[%s3712_s0 + $0x3f4] sm:$0xf] }
  0xbe   :  { %2306 = vmatmul.msk.bf16.vlgmr.msrb.gmra.mxu1 %vm162_vm2, %v3468_v60  ;;  %1482 = vmatpush.bf16.msrb.mxu0 %v1471_v51  ;;  %v1624_v51 = vand.u32 %v2430_v37, %v2630_v5 }
  0xbf   :  { %2323 = vmatmul.msk.bf16.vlgmr.msrb.gmra.mxu2 %vm162_vm2, %v3468_v60  ;;  %1495 = vmatpush.bf16.msrb.mxu1 %v1474_v52  ;;  %v2585_v52 = vld [vmem:[%s3712_s0 + $0x3a4] sm:$0xf] }
  0xc0   :  { %2324 = vmatmul.msk.bf16.vlgmr.msrb.gmra.mxu3 %vm162_vm2, %v3468_v60  ;;  %1532 = vmatpush.bf16.msrb.mxu2 %v1521_v57  ;;  %v2404_v57 = vor.u32 %v2581_v45, %v2401_v48  ;;  %v2422_v59 = vor.u32 %v2585_v52, %v2419_v55 }
  0xc1   :  { %1545 = vmatpush.bf16.msrb.mxu3 %v1524_v61 }
  0xc2   :  { %v535_v11 = vpop.f32.mrf.mxu2  ;;  %v487_v16 = vpop.f32.mrf.mxu0  ;;  %1483 = vmatpush.bf16.msrb.mxu0 %v2364_v3  ;;  %v2445_v3 = vld [vmem:[%s3712_s0 + $0x3d8] sm:$0x10] }
  0xc3   :  { %v1765_v18 = vmax.f32 %v1764_v13, %v535_v11  ;;  %v548_v19 = vpop.f32.mrf.mxu3  ;;  %v500_v20 = vpop.f32.mrf.mxu1  ;;  %1496 = vmatpush.bf16.msrb.mxu1 %v2368_v6  ;;  %v2443_v6 = vld [vmem:[%s3712_s0 + $0x3d0] sm:$0xf]  ;;  %v2448_v13 = vor.u32 %v2591_v2, %v2445_v3 }
  0xc4   :  { %v1771_v21 = vsel %vm1755_vm3, %v548_v19, -inf  ;;  %1533 = vmatpush.bf16.msrb.mxu2 %v2382_v9  ;;  %v2463_v9 = vld [vmem:[%s3712_s0 + $0x3f8] sm:$0x10]  ;;  %v2444_v10 = vor.u32 %v2592_v7, %v2443_v6 }
  0xc5   :  { %v1841_v24 = vadd.f32 %v3347_v47, %v1765_v18  ;;  %v1772_v25 = vmax.f32 %v1770_v17, %v1771_v21  ;;  %1546 = vmatpush.bf16.msrb.mxu3 %v2386_v14  ;;  %v2462_v14 = vor.u32 %v2596_v4, %v2461_v1  ;;  %v2466_v11 = vor.u32 %v2595_v8, %v2463_v9  ;;  %v2435_v21 = vld [vmem:[%s3712_s0 + $0x3c0] sm:$0xf] }
  0xc6   :  { %v1671_v18 = vand.u32 %v2444_v10, %v2630_v5  ;;  %v1674_v15 = vand.u32 %v2448_v13, %v2630_v5  ;;  %v2436_v31 = vor.u32 %v2590_v22, %v2435_v21 }
  0xc7   :  { %v1857_v32 = vmax.f32 %v1841_v24, 0.0  ;;  %v1842_v33 = vadd.f32 %v3347_v47, %v1772_v25  ;;  %v1721_v23 = vand.u32 %v2462_v14, %v2630_v5  ;;  %v2589_v24 = vld [vmem:[%s3712_s0 + $0x3c4] sm:$0xf]  ;;  %v2437_v25 = vld [vmem:[%s3712_s0 + $0x3c8] sm:$0xf0]  ;;  %v1724_v26 = vand.u32 %v2466_v11, %v2630_v5 }
  0xc8   :  { %v2455_v5 = vld [vmem:[%s3712_s0 + $0x3e8] sm:$0xf0] }
  0xc9   :  { %v1858_v36 = vmax.f32 %v1842_v33, 0.0  ;;  %v2440_v33 = vor.u32 %v2589_v24, %v2437_v25 }
  0xca   :  { %v537_v41 = vpop.f32.mrf.mxu2  ;;  %v3523_v38 = vpop.f32.mrf.mxu0 }
  0xcb   :  { %v1872_v40 = vpack.c.bf16 %v1858_v36, %v1857_v32  ;;  %v550_v42 = vpop.f32.mrf.mxu3  ;;  %v3526_v43 = vpop.f32.mrf.mxu1  ;;  %v2454_v36 = vor.u32 %v2594_v28, %v2453_v27 }
  0xcc   :  { %v1776_v34 = vsel %vm1755_vm3, %v3526_v43, -inf }
  0xcd   :  { %1882 = vst.msk [vmem:[%s3715_s3 + $0x8] sm:$0xff] %vm3379_vm5, %v1872_v40  ;;  %2341 = vmatmul.msk.bf16.vlgmr.msra.gmra.mxu0 %vm162_vm2, %v3468_v60 }
  0xce   :  { %2342 = vmatmul.msk.bf16.vlgmr.msra.gmra.mxu1 %vm162_vm2, %v3468_v60  ;;  %1582 = vmatpush.bf16.msra.mxu0 %v1571_v39  ;;  %v2458_v39 = vor.u32 %v2593_v30, %v2455_v5 }
  0xcf   :  { %2359 = vmatmul.msk.bf16.vlgmr.msra.gmra.mxu2 %vm162_vm2, %v3468_v60  ;;  %1595 = vmatpush.bf16.msra.mxu1 %v1574_v44 }
  0xd0   :  { %2360 = vmatmul.msk.bf16.vlgmr.msra.gmra.mxu3 %vm162_vm2, %v3468_v60  ;;  %1632 = vmatpush.bf16.msra.mxu2 %v1621_v46 }
  0xd1   :  { %1645 = vmatpush.bf16.msra.mxu3 %v1624_v51 }
  0xd2   :  { %v635_v61 = vpop.f32.mrf.mxu2  ;;  %v587_v62 = vpop.f32.mrf.mxu0  ;;  %1583 = vmatpush.bf16.msra.mxu0 %v2400_v56 }
  0xd3   :  { %v648_v63 = vpop.f32.mrf.mxu3  ;;  %v600_v0 = vpop.f32.mrf.mxu1  ;;  %1596 = vmatpush.bf16.msra.mxu1 %v2404_v57  ;;  %v1773_v32 = vmax.f32 %v3523_v38, %v635_v61 }
  0xd4   :  { %1633 = vmatpush.bf16.msra.mxu2 %v2418_v58  ;;  %v1777_v29 = vsel %vm1755_vm3, %v648_v63, -inf }
  0xd5   :  { %1646 = vmatpush.bf16.msra.mxu3 %v2422_v59  ;;  %v1778_v37 = vmax.f32 %v1776_v34, %v1777_v29 }
  0xda   :  { %v637_v16 = vpop.f32.mrf.mxu2  ;;  %v685_v17 = vpop.f32.mrf.mxu0 }
  0xdb   :  { %v650_v19 = vpop.f32.mrf.mxu3  ;;  %v698_v20 = vpop.f32.mrf.mxu1  ;;  %v1774_v41 = vmax.f32 %v1773_v32, %v685_v17 }
  0xdc   :  { %v1779_v35 = vsel %vm1755_vm3, %v698_v20, -inf }
  0xdd   :  { %2377 = vmatmul.msk.bf16.vlgmr.msrb.gmra.mxu0 %vm162_vm2, %v3468_v60  ;;  %v1780_v42 = vmax.f32 %v1778_v37, %v1779_v35 }
  0xde   :  { %2378 = vmatmul.msk.bf16.vlgmr.msrb.gmra.mxu1 %vm162_vm2, %v3468_v60  ;;  %1682 = vmatpush.bf16.msrb.mxu0 %v1671_v18 }
  0xdf   :  { %2395 = vmatmul.msk.bf16.vlgmr.msrb.gmra.mxu2 %vm162_vm2, %v3468_v60  ;;  %1695 = vmatpush.bf16.msrb.mxu1 %v1674_v15 }
  0xe0   :  { %2396 = vmatmul.msk.bf16.vlgmr.msrb.gmra.mxu3 %vm162_vm2, %v3468_v60  ;;  %1732 = vmatpush.bf16.msrb.mxu2 %v1721_v23 }
  0xe1   :  { %1745 = vmatpush.bf16.msrb.mxu3 %v1724_v26 }
  0xe2   :  { %v735_v38 = vpop.f32.mrf.mxu2  ;;  %v687_v40 = vpop.f32.mrf.mxu0  ;;  %1683 = vmatpush.bf16.msrb.mxu0 %v2436_v31 }
  0xe3   :  { %v1775_v44 = vmax.f32 %v1774_v41, %v735_v38  ;;  %v748_v45 = vpop.f32.mrf.mxu3  ;;  %v700_v46 = vpop.f32.mrf.mxu1  ;;  %1696 = vmatpush.bf16.msrb.mxu1 %v2440_v33 }
  0xe4   :  { %v1781_v43 = vsel %vm1755_vm3, %v748_v45, -inf  ;;  %1733 = vmatpush.bf16.msrb.mxu2 %v2454_v36 }
  0xe5   :  { %v1843_v48 = vadd.f32 %v3347_v47, %v1775_v44  ;;  %v1782_v49 = vmax.f32 %v1780_v42, %v1781_v43  ;;  %1746 = vmatpush.bf16.msrb.mxu3 %v2458_v39 }
  0xe7   :  { %v1859_v50 = vmax.f32 %v1843_v48, 0.0  ;;  %v1844_v51 = vadd.f32 %v3347_v47, %v1782_v49 }
  0xe9   :  { %v1860_v53 = vmax.f32 %v1844_v51, 0.0 }
  0xea   :  { %v737_v54 = vpop.f32.mrf.mxu2  ;;  %v785_v52 = vpop.f32.mrf.mxu0 }
  0xeb   :  { %v1873_v55 = vpack.c.bf16 %v1860_v53, %v1859_v50  ;;  %v750_v56 = vpop.f32.mrf.mxu3  ;;  %v798_v57 = vpop.f32.mrf.mxu1 }
  0xec   :  { %v1786_v6 = vsel %vm1755_vm3, %v798_v57, -inf }
  0xed   :  { %1883 = vst.msk [vmem:[%s3715_s3 + $0x10] sm:$0xff] %vm3379_vm5, %v1873_v55  ;;  %2413 = vmatmul.msk.bf16.vlgmr.msra.gmra.mxu0 %vm162_vm2, %v3468_v60 }
  0xee   :  { %2414 = vmatmul.msk.bf16.vlgmr.msra.gmra.mxu1 %vm162_vm2, %v3468_v60 }
  0xef   :  { %2431 = vmatmul.msk.bf16.vlgmr.msra.gmra.mxu2 %vm162_vm2, %v3468_v60 }
  0xf0   :  { %2432 = vmatmul.msk.bf16.vlgmr.msra.gmra.mxu3 %vm162_vm2, %v3468_v60 }
  0xf2   :  { %v835_v58 = vpop.f32.mrf.mxu2  ;;  %v787_v59 = vpop.f32.mrf.mxu0 }
  0xf3   :  { %v848_v61 = vpop.f32.mrf.mxu3  ;;  %v800_v62 = vpop.f32.mrf.mxu1  ;;  %v1783_v4 = vmax.f32 %v785_v52, %v835_v58 }
  0xf4   :  { %v1787_v3 = vsel %vm1755_vm3, %v848_v61, -inf }
  0xf5   :  { %v1788_v8 = vmax.f32 %v1786_v6, %v1787_v3 }
  0xfa   :  { %v837_v63 = vpop.f32.mrf.mxu2  ;;  %v885_v0 = vpop.f32.mrf.mxu0 }
  0xfb   :  { %v850_v1 = vpop.f32.mrf.mxu3  ;;  %v898_v2 = vpop.f32.mrf.mxu1  ;;  %v1784_v9 = vmax.f32 %v1783_v4, %v885_v0 }
  0xfc   :  { %v1789_v7 = vsel %vm1755_vm3, %v898_v2, -inf }
  0xfd   :  { %2449 = vmatmul.msk.bf16.vlgmr.msrb.gmra.mxu0 %vm162_vm2, %v3468_v60  ;;  %v1790_v14 = vmax.f32 %v1788_v8, %v1789_v7 }
  0xfe   :  { %2450 = vmatmul.msk.bf16.vlgmr.msrb.gmra.mxu1 %vm162_vm2, %v3468_v60 }
  0xff   :  { %2467 = vmatmul.msk.bf16.vlgmr.msrb.gmra.mxu2 %vm162_vm2, %v3468_v60 }
 0x100   :  { %2468 = vmatmul.msk.bf16.vlgmr.msrb.gmra.mxu3 %vm162_vm2, %v3468_v60 }
 0x102   :  { %v935_v10 = vpop.f32.mrf.mxu2  ;;  %v887_v13 = vpop.f32.mrf.mxu0 }
 0x103   :  { %v1785_v11 = vmax.f32 %v1784_v9, %v935_v10  ;;  %v948_v16 = vpop.f32.mrf.mxu3  ;;  %v900_v17 = vpop.f32.mrf.mxu1 }
 0x104   :  { %v1791_v18 = vsel %vm1755_vm3, %v948_v16, -inf }
 0x105   :  { %v1845_v19 = vadd.f32 %v3347_v47, %v1785_v11  ;;  %v1792_v20 = vmax.f32 %v1790_v14, %v1791_v18 }
 0x107   :  { %v1861_v15 = vmax.f32 %v1845_v19, 0.0  ;;  %v1846_v21 = vadd.f32 %v3347_v47, %v1792_v20 }
 0x109   :  { %v1862_v22 = vmax.f32 %v1846_v21, 0.0 }
 0x10a   :  { %v937_v23 = vpop.f32.mrf.mxu2  ;;  %v985_v24 = vpop.f32.mrf.mxu0 }
 0x10b   :  { %v1874_v60 = vpack.c.bf16 %v1862_v22, %v1861_v15  ;;  %v950_v25 = vpop.f32.mrf.mxu3  ;;  %v998_v26 = vpop.f32.mrf.mxu1 }
 0x10c   :  { %v1796_v36 = vsel %vm1755_vm3, %v998_v26, -inf }
 0x10d   :  { %1884 = vst.msk [vmem:[%s3715_s3 + $0x18] sm:$0xff] %vm3379_vm5, %v1874_v60 }
 0x112   :  { %v1035_v27 = vpop.f32.mrf.mxu2  ;;  %v987_v28 = vpop.f32.mrf.mxu0 }
 0x113   :  { %v1048_v29 = vpop.f32.mrf.mxu3  ;;  %v1000_v30 = vpop.f32.mrf.mxu1  ;;  %v1793_v35 = vmax.f32 %v985_v24, %v1035_v27 }
 0x114   :  { %v1797_v34 = vsel %vm1755_vm3, %v1048_v29, -inf }
 0x115   :  { %v1798_v41 = vmax.f32 %v1796_v36, %v1797_v34 }
 0x11a   :  { %v1037_v5 = vpop.f32.mrf.mxu2  ;;  %v1085_v31 = vpop.f32.mrf.mxu0 }
 0x11b   :  { %v1050_v32 = vpop.f32.mrf.mxu3  ;;  %v1098_v33 = vpop.f32.mrf.mxu1  ;;  %v1794_v39 = vmax.f32 %v1793_v35, %v1085_v31 }
 0x11c   :  { %v1799_v37 = vsel %vm1755_vm3, %v1098_v33, -inf }
 0x11d   :  { %v1800_v42 = vmax.f32 %v1798_v41, %v1799_v37 }
 0x122   :  { %v1135_v38 = vpop.f32.mrf.mxu2  ;;  %v1087_v40 = vpop.f32.mrf.mxu0 }
 0x123   :  { %v1795_v44 = vmax.f32 %v1794_v39, %v1135_v38  ;;  %v1148_v45 = vpop.f32.mrf.mxu3  ;;  %v1100_v46 = vpop.f32.mrf.mxu1 }
 0x124   :  { %v1801_v43 = vsel %vm1755_vm3, %v1148_v45, -inf }
 0x125   :  { %v1847_v48 = vadd.f32 %v3347_v47, %v1795_v44  ;;  %v1802_v49 = vmax.f32 %v1800_v42, %v1801_v43 }
 0x127   :  { %v1863_v50 = vmax.f32 %v1847_v48, 0.0  ;;  %v1848_v51 = vadd.f32 %v3347_v47, %v1802_v49 }
 0x129   :  { %v1864_v53 = vmax.f32 %v1848_v51, 0.0 }
 0x12a   :  { %v1137_v54 = vpop.f32.mrf.mxu2  ;;  %v1185_v52 = vpop.f32.mrf.mxu0 }
 0x12b   :  { %v1875_v55 = vpack.c.bf16 %v1864_v53, %v1863_v50  ;;  %v1150_v56 = vpop.f32.mrf.mxu3  ;;  %v1198_v57 = vpop.f32.mrf.mxu1 }
 0x12c   :  { %v1806_v6 = vsel %vm1755_vm3, %v1198_v57, -inf }
 0x12d   :  { %1885 = vst.msk [vmem:[%s3715_s3 + $0x20] sm:$0xff] %vm3379_vm5, %v1875_v55 }
 0x132   :  { %v1235_v58 = vpop.f32.mrf.mxu2  ;;  %v1187_v59 = vpop.f32.mrf.mxu0 }
 0x133   :  { %v1248_v61 = vpop.f32.mrf.mxu3  ;;  %v1200_v62 = vpop.f32.mrf.mxu1  ;;  %v1803_v4 = vmax.f32 %v1185_v52, %v1235_v58 }
 0x134   :  { %v1807_v3 = vsel %vm1755_vm3, %v1248_v61, -inf }
 0x135   :  { %v1808_v8 = vmax.f32 %v1806_v6, %v1807_v3 }
 0x13a   :  { %v1237_v63 = vpop.f32.mrf.mxu2  ;;  %v1285_v0 = vpop.f32.mrf.mxu0 }
 0x13b   :  { %v1250_v1 = vpop.f32.mrf.mxu3  ;;  %v1298_v2 = vpop.f32.mrf.mxu1  ;;  %v1804_v9 = vmax.f32 %v1803_v4, %v1285_v0 }
 0x13c   :  { %v1809_v7 = vsel %vm1755_vm3, %v1298_v2, -inf }
 0x13d   :  { %v1810_v14 = vmax.f32 %v1808_v8, %v1809_v7 }
 0x142   :  { %v1335_v10 = vpop.f32.mrf.mxu2  ;;  %v1287_v13 = vpop.f32.mrf.mxu0 }
 0x143   :  { %v1805_v11 = vmax.f32 %v1804_v9, %v1335_v10  ;;  %v1348_v16 = vpop.f32.mrf.mxu3  ;;  %v1300_v17 = vpop.f32.mrf.mxu1 }
 0x144   :  { %v1811_v18 = vsel %vm1755_vm3, %v1348_v16, -inf }
 0x145   :  { %v1849_v19 = vadd.f32 %v3347_v47, %v1805_v11  ;;  %v1812_v20 = vmax.f32 %v1810_v14, %v1811_v18 }
 0x147   :  { %v1865_v15 = vmax.f32 %v1849_v19, 0.0  ;;  %v1850_v21 = vadd.f32 %v3347_v47, %v1812_v20 }
 0x149   :  { %v1866_v22 = vmax.f32 %v1850_v21, 0.0 }
 0x14a   :  { %v1337_v23 = vpop.f32.mrf.mxu2  ;;  %v1385_v24 = vpop.f32.mrf.mxu0 }
 0x14b   :  { %v1876_v60 = vpack.c.bf16 %v1866_v22, %v1865_v15  ;;  %v1350_v25 = vpop.f32.mrf.mxu3  ;;  %v1398_v26 = vpop.f32.mrf.mxu1 }
 0x14c   :  { %v1816_v36 = vsel %vm1755_vm3, %v1398_v26, -inf }
 0x14d   :  { %1886 = vst.msk [vmem:[%s3715_s3 + $0x28] sm:$0xff] %vm3379_vm5, %v1876_v60 }
 0x152   :  { %v1435_v27 = vpop.f32.mrf.mxu2  ;;  %v1387_v28 = vpop.f32.mrf.mxu0 }
 0x153   :  { %v1448_v29 = vpop.f32.mrf.mxu3  ;;  %v1400_v30 = vpop.f32.mrf.mxu1  ;;  %v1813_v35 = vmax.f32 %v1385_v24, %v1435_v27 }
 0x154   :  { %v1817_v34 = vsel %vm1755_vm3, %v1448_v29, -inf }
 0x155   :  { %v1818_v41 = vmax.f32 %v1816_v36, %v1817_v34 }
 0x15a   :  { %v1437_v5 = vpop.f32.mrf.mxu2  ;;  %v1485_v31 = vpop.f32.mrf.mxu0 }
 0x15b   :  { %v1450_v32 = vpop.f32.mrf.mxu3  ;;  %v1498_v33 = vpop.f32.mrf.mxu1  ;;  %v1814_v39 = vmax.f32 %v1813_v35, %v1485_v31 }
 0x15c   :  { %v1819_v37 = vsel %vm1755_vm3, %v1498_v33, -inf }
 0x15d   :  { %v1820_v42 = vmax.f32 %v1818_v41, %v1819_v37 }
 0x162   :  { %v1535_v38 = vpop.f32.mrf.mxu2  ;;  %v1487_v40 = vpop.f32.mrf.mxu0 }
 0x163   :  { %v1815_v44 = vmax.f32 %v1814_v39, %v1535_v38  ;;  %v1548_v45 = vpop.f32.mrf.mxu3  ;;  %v1500_v46 = vpop.f32.mrf.mxu1 }
 0x164   :  { %v1821_v43 = vsel %vm1755_vm3, %v1548_v45, -inf }
 0x165   :  { %v1851_v48 = vadd.f32 %v3347_v47, %v1815_v44  ;;  %v1822_v49 = vmax.f32 %v1820_v42, %v1821_v43 }
 0x167   :  { %v1867_v50 = vmax.f32 %v1851_v48, 0.0  ;;  %v1852_v51 = vadd.f32 %v3347_v47, %v1822_v49 }
 0x169   :  { %v1868_v53 = vmax.f32 %v1852_v51, 0.0 }
 0x16a   :  { %v1537_v54 = vpop.f32.mrf.mxu2  ;;  %v1585_v52 = vpop.f32.mrf.mxu0 }
 0x16b   :  { %v1877_v55 = vpack.c.bf16 %v1868_v53, %v1867_v50  ;;  %v1550_v56 = vpop.f32.mrf.mxu3  ;;  %v1598_v57 = vpop.f32.mrf.mxu1 }
 0x16c   :  { %v1826_v6 = vsel %vm1755_vm3, %v1598_v57, -inf }
 0x16d   :  { %1887 = vst.msk [vmem:[%s3715_s3 + $0x30] sm:$0xff] %vm3379_vm5, %v1877_v55 }
 0x172   :  { %v1635_v58 = vpop.f32.mrf.mxu2  ;;  %v1587_v59 = vpop.f32.mrf.mxu0 }
 0x173   :  { %v1648_v61 = vpop.f32.mrf.mxu3  ;;  %v1600_v62 = vpop.f32.mrf.mxu1  ;;  %v1823_v4 = vmax.f32 %v1585_v52, %v1635_v58 }
 0x174   :  { %v1827_v3 = vsel %vm1755_vm3, %v1648_v61, -inf }
 0x175   :  { %v1828_v8 = vmax.f32 %v1826_v6, %v1827_v3 }
 0x17a   :  { %v1637_v63 = vpop.f32.mrf.mxu2  ;;  %v1685_v0 = vpop.f32.mrf.mxu0 }
 0x17b   :  { %v1650_v1 = vpop.f32.mrf.mxu3  ;;  %v1698_v2 = vpop.f32.mrf.mxu1  ;;  %v1824_v9 = vmax.f32 %v1823_v4, %v1685_v0 }
 0x17c   :  { %v1829_v7 = vsel %vm1755_vm3, %v1698_v2, -inf }
 0x17d   :  { %v1830_v14 = vmax.f32 %v1828_v8, %v1829_v7 }
 0x182   :  { %v1735_v10 = vpop.f32.mrf.mxu2  ;;  %v1687_v13 = vpop.f32.mrf.mxu0 }
 0x183   :  { %v1825_v11 = vmax.f32 %v1824_v9, %v1735_v10  ;;  %v1748_v16 = vpop.f32.mrf.mxu3  ;;  %v1700_v17 = vpop.f32.mrf.mxu1 }
 0x184   :  { %v1831_v18 = vsel %vm1755_vm3, %v1748_v16, -inf }
 0x185   :  { %v1853_v19 = vadd.f32 %v3347_v47, %v1825_v11  ;;  %v1832_v20 = vmax.f32 %v1830_v14, %v1831_v18 }
 0x187   :  { %v1869_v15 = vmax.f32 %v1853_v19, 0.0  ;;  %v1854_v21 = vadd.f32 %v3347_v47, %v1832_v20 }
 0x189   :  { %v1870_v22 = vmax.f32 %v1854_v21, 0.0 }
 0x18a   :  { %v1737_v23 = vpop.f32.mrf.mxu2 }
 0x18b   :  { %v1878_v24 = vpack.c.bf16 %v1870_v22, %v1869_v15  ;;  %v1750_v60 = vpop.f32.mrf.mxu3 }
 0x18d   :  { %1888 = vst.msk [vmem:[%s3715_s3 + $0x38] sm:$0xff] %vm3379_vm5, %v1878_v24 }

// kernel: cnn_model2_forward.4
= control target key start
LH: loop header
LB: loop body
LE: loop exit
PB: predicated region body
PF: predicated region fallthrough
CT: control target
= control target key end

     0   :  { %vm905_vm0 = vcmask 1043456   ;;  %vm901_vm1 = vcmask 588800   ;;  %vm4223_vm2 = vcmask 400384   ;;  %vm4396_vm3 = vcmask 396288   ;;  %s7990_s0 = inlined_call_operand.vmem [shape: bf16[32,200,49], index: 0, kind: input, shape index: {}]   ;;  %s7991_s1 = inlined_call_operand.vmem [shape: bf16[16,200], index: 1, kind: input, shape index: {}]   ;;  %s7992_s2 = inlined_call_operand.vmem [shape: f32[16,1], index: 2, kind: input, shape index: {}]   ;;  %s7993_s3 = inlined_call_operand.vmem [shape: bf16[8,16,49], index: 3, kind: output, shape index: {}]  }
   0x1   :  { %v6002_v0 = vld [vmem:[%s7990_s0 + $0x38] sm:$0xff]  ;;  %v41_v2 = vld [vmem:[%s7990_s0 + $0x60] sm:$0xf]  ;;  %v66_v4 = vld [vmem:[%s7990_s0 + $0xc4] sm:$0xf] }
   0x2   :  { %v6014_v1 = vld [vmem:[%s7990_s0 + $0x9c] sm:$0xff]  ;;  %v875_v3 = vunpack.c.l.b16 %v41_v2  ;;  %909 = vmatpush.bf16.msra.mxu0 %v6002_v0  ;;  %v986_v5 = vunpack.c.l.b16 %v66_v4  ;;  %v6001_v6 = vld [vmem:[%s7990_s0 + $0x30] sm:$0xff]  ;;  %v6000_v13 = vld [vmem:[%s7990_s0 + $0x28] sm:$0xff] }
   0x3   :  { %1015 = vmatpush.bf16.msra.mxu2 %v6014_v1  ;;  %v6013_v8 = vld [vmem:[%s7990_s0 + $0x94] sm:$0xff]  ;;  %v6018_v14 = vld [vmem:[%s7990_s0 + $0xbc] sm:$0xff]  ;;  %v6012_v15 = vld [vmem:[%s7990_s0 + $0x8c] sm:$0xff] }
   0x4   :  { %v888_v7 = vpack.c.b16 %v875_v3, %v875_v3  ;;  %v999_v9 = vpack.c.b16 %v986_v5, %v986_v5  ;;  %v6006_v12 = vld [vmem:[%s7990_s0 + $0x58] sm:$0xff]  ;;  %v6005_v16 = vld [vmem:[%s7990_s0 + $0x50] sm:$0xff]  ;;  %v5999_v17 = vld [vmem:[%s7990_s0 + $0x20] sm:$0xff] }
   0x5   :  { %v91_v18 = vld [vmem:[%s7990_s0 + $0x128] sm:$0xf]  ;;  %v6017_v19 = vld [vmem:[%s7990_s0 + $0xb4] sm:$0xff]  ;;  %v6016_v24 = vld [vmem:[%s7990_s0 + $0xac] sm:$0xff] }
   0x6   :  { %v907_v10 = vsel %vm905_vm0, %v888_v7, 0  ;;  %v1013_v11 = vsel %vm905_vm0, %v999_v9, 0  ;;  %910 = vmatpush.bf16.msra.mxu0 %v6001_v6  ;;  %v6011_v20 = vld [vmem:[%s7990_s0 + $0x84] sm:$0xff]  ;;  %v1092_v21 = vunpack.c.l.b16 %v91_v18  ;;  %v5998_v23 = vld [vmem:[%s7990_s0 + $0x18] sm:$0xff]  ;;  %v5997_v29 = vld [vmem:[%s7990_s0 + $0x10] sm:$0xff]  ;;  %v6381_v9 = vmov 0  }
   0x7   :  { %926 = vmatpush.bf16.msra.mxu1 %v907_v10  ;;  %1032 = vmatpush.bf16.msra.mxu3 %v1013_v11  ;;  %v6004_v22 = vld [vmem:[%s7990_s0 + $0x48] sm:$0xff]  ;;  %v6010_v25 = vld [vmem:[%s7990_s0 + $0x7c] sm:$0xff]  ;;  %v6009_v30 = vld [vmem:[%s7990_s0 + $0x74] sm:$0xff] }
   0x8   :  { %1016 = vmatpush.bf16.msra.mxu2 %v6013_v8  ;;  %v6003_v26 = vld [vmem:[%s7990_s0 + $0x40] sm:$0xff]  ;;  %v1105_v27 = vpack.c.b16 %v1092_v21, %v1092_v21  ;;  %v4421_v32 = vld [vmem:[%s7991_s1 + $0x8] sm:$0xf0]  ;;  %v6025_v40 = vld [vmem:[%s7990_s0 + $0xf8] sm:$0xff]  ;;  %6380 = vset.pattern.permute.xlu0 %v6381_v9 }
   0x9   :  { %v6015_v28 = vld [vmem:[%s7990_s0 + $0xa4] sm:$0xff]  ;;  %v116_v33 = vld [vmem:[%s7990_s0 + $0x18c] sm:$0xf]  ;;  %v4419_v46 = vld [vmem:[%s7991_s1] sm:$0xf] }
   0xa   :  { %911 = vmatpush.bf16.msra.mxu0 %v6000_v13  ;;  %v5993_v31 = vld [vmem:[%s7991_s1 + $0x4] sm:$0xf]  ;;  %v1119_v35 = vsel %vm905_vm0, %v1105_v27, 0  ;;  %v5996_v36 = vld [vmem:[%s7990_s0 + $0x8] sm:$0xff]  ;;  %v1198_v38 = vunpack.c.l.b16 %v116_v33  ;;  %v6024_v48 = vld [vmem:[%s7990_s0 + $0xf0] sm:$0xff] }
   0xb   :  { %927 = vmatpush.bf16.msra.mxu1 %v6006_v12  ;;  %1033 = vmatpush.bf16.msra.mxu3 %v6018_v14  ;;  %v6026_v34 = vld [vmem:[%s7990_s0 + $0x100] sm:$0xff]  ;;  %v6489_v37 = vor.u32 %v5993_v31, %v4421_v32  ;;  %v6008_v39 = vld [vmem:[%s7990_s0 + $0x6c] sm:$0xff]  ;;  %v5994_v47 = vld [vmem:[%s7991_s1 + $0x4] sm:$0xf0] }
   0xc   :  { %1017 = vmatpush.bf16.msra.mxu2 %v6012_v15  ;;  %v6030_v41 = vld [vmem:[%s7990_s0 + $0x120] sm:$0xff]  ;;  %v1211_v44 = vpack.c.b16 %v1198_v38, %v1198_v38  ;;  %v6029_v49 = vld [vmem:[%s7990_s0 + $0x118] sm:$0xff]  ;;  %v6525_v50 = vor.u32 %v5994_v47, %v4419_v46  ;;  %v6023_v53 = vld [vmem:[%s7990_s0 + $0xe8] sm:$0xff] }
   0xd   :  { %v5995_v42 = vld [vmem:[%s7990_s0] sm:$0xff]  ;;  %v6028_v54 = vld [vmem:[%s7990_s0 + $0x110] sm:$0xff]  ;;  %v6027_v58 = vld [vmem:[%s7990_s0 + $0x108] sm:$0xff] }
   0xe   :  { %912 = vmatpush.bf16.msra.mxu0 %v5999_v17  ;;  %v6007_v43 = vld [vmem:[%s7990_s0 + $0x64] sm:$0xff]  ;;  %v1225_v51 = vsel %vm905_vm0, %v1211_v44, 0  ;;  %v6037_v52 = vld [vmem:[%s7990_s0 + $0x15c] sm:$0xff]  ;;  %v6036_v56 = vld [vmem:[%s7990_s0 + $0x154] sm:$0xff] }
   0xf   :  { %928 = vmatpush.bf16.msra.mxu1 %v6005_v16  ;;  %1034 = vmatpush.bf16.msra.mxu3 %v6017_v19  ;;  %v6038_v45 = vld [vmem:[%s7990_s0 + $0x164] sm:$0xff]  ;;  %v6041_v60 = vld [vmem:[%s7990_s0 + $0x17c] sm:$0xff]  ;;  %v6035_v61 = vld [vmem:[%s7990_s0 + $0x14c] sm:$0xff] }
  0x10   :  { %1018 = vmatpush.bf16.msra.mxu2 %v6011_v20  ;;  %v6042_v55 = vld [vmem:[%s7990_s0 + $0x184] sm:$0xff]  ;;  %v141_v62 = vld [vmem:[%s7990_s0 + $0x1f0] sm:$0xf]  ;;  %v6021_v63 = vld [vmem:[%s7990_s0 + $0xd8] sm:$0xff] }
  0x11   :  { %v6022_v57 = vld [vmem:[%s7990_s0 + $0xe0] sm:$0xff]  ;;  %v6050_v59 = vld [vmem:[%s7990_s0 + $0x1c8] sm:$0xff]  ;;  %v6040_v1 = vld [vmem:[%s7990_s0 + $0x174] sm:$0xff]  ;;  %v1304_v2 = vunpack.c.l.b16 %v141_v62 }
  0x12   :  { %913 = vmatpush.bf16.msra.mxu0 %v5998_v23  ;;  %v6049_v0 = vld [vmem:[%s7990_s0 + $0x1c0] sm:$0xff]  ;;  %v6020_v4 = vld [vmem:[%s7990_s0 + $0xd0] sm:$0xff]  ;;  %v6048_v5 = vld [vmem:[%s7990_s0 + $0x1b8] sm:$0xff] }
  0x13   :  { %929 = vmatpush.bf16.msra.mxu1 %v6004_v22  ;;  %1035 = vmatpush.bf16.msra.mxu3 %v6016_v24  ;;  %v6034_v3 = vld [vmem:[%s7990_s0 + $0x144] sm:$0xff]  ;;  %v6039_v6 = vld [vmem:[%s7990_s0 + $0x16c] sm:$0xff]  ;;  %v1317_v8 = vpack.c.b16 %v1304_v2, %v1304_v2  ;;  %v6033_v11 = vld [vmem:[%s7990_s0 + $0x13c] sm:$0xff] }
  0x14   :  { %1019 = vmatpush.bf16.msra.mxu2 %v6010_v25  ;;  %v6062_v7 = vld [vmem:[%s7990_s0 + $0x22c] sm:$0xff]  ;;  %v4336_v10 = vld [vmem:[%s7992_s2] sm:$0xff]  ;;  %v6032_v16 = vld [vmem:[%s7990_s0 + $0x134] sm:$0xff] }
  0x15   :  { %4340 = vperm.xlu0 %6380, %v4336_v10   ;;  %v6019_v12 = vld [vmem:[%s7990_s0 + $0xc8] sm:$0xff]  ;;  %v6047_v13 = vld [vmem:[%s7990_s0 + $0x1b0] sm:$0xff]  ;;  %v1331_v14 = vsel %vm905_vm0, %v1317_v8, 0  ;;  %v6060_v19 = vld [vmem:[%s7990_s0 + $0x21c] sm:$0xff] }
  0x16   :  { %914 = vmatpush.bf16.msra.mxu0 %v5997_v29  ;;  %v6061_v15 = vld [vmem:[%s7990_s0 + $0x224] sm:$0xff]  ;;  %v6031_v21 = vld [vmem:[%s7990_s0 + $0x12c] sm:$0xff]  ;;  %v166_v22 = vld [vmem:[%s7990_s0 + $0x254] sm:$0xf] }
  0x17   :  { %930 = vmatpush.bf16.msra.mxu1 %v6003_v26  ;;  %1036 = vmatpush.bf16.msra.mxu3 %v6015_v28  ;;  %v6046_v17 = vld [vmem:[%s7990_s0 + $0x1a8] sm:$0xff]  ;;  %v6086_v23 = vld [vmem:[%s7990_s0 + $0x2f4] sm:$0xff]  ;;  %v6045_v24 = vld [vmem:[%s7990_s0 + $0x1a0] sm:$0xff]  ;;  %v1410_v27 = vunpack.c.l.b16 %v166_v22 }
  0x18   :  { %1020 = vmatpush.bf16.msra.mxu2 %v6009_v30  ;;  %v6054_v18 = vld [vmem:[%s7990_s0 + $0x1e8] sm:$0xff]  ;;  %v6053_v25 = vld [vmem:[%s7990_s0 + $0x1e0] sm:$0xff]  ;;  %v6059_v26 = vld [vmem:[%s7990_s0 + $0x214] sm:$0xff] }
  0x19   :  { %v4337_v20 = vld [vmem:[%s7992_s2 + $0x8] sm:$0xff]  ;;  %v6044_v29 = vld [vmem:[%s7990_s0 + $0x198] sm:$0xff]  ;;  %v1423_v32 = vpack.c.b16 %v1410_v27, %v1410_v27 }
  0x1a   :  { %4473 = vmatmul.msk.bf16.vlgmr.msra.gmra.mxu1 %vm901_vm1, %v6489_v37  ;;  %915 = vmatpush.bf16.msra.mxu0 %v5996_v36  ;;  %v6085_v28 = vld [vmem:[%s7990_s0 + $0x2ec] sm:$0xff]  ;;  %v6052_v30 = vld [vmem:[%s7990_s0 + $0x1d8] sm:$0xff]  ;;  %v6084_v33 = vld [vmem:[%s7990_s0 + $0x2e4] sm:$0xff] }
  0x1b   :  { %1121 = vmatpush.bf16.msrb.mxu1 %v6026_v34  ;;  %1138 = vmatpush.bf16.msrb.mxu3 %v1119_v35  ;;  %v6058_v31 = vld [vmem:[%s7990_s0 + $0x20c] sm:$0xff]  ;;  %v216_v36 = vld [vmem:[%s7990_s0 + $0x31c] sm:$0xf]  ;;  %v6057_v38 = vld [vmem:[%s7990_s0 + $0x204] sm:$0xff] }
  0x1c   :  { %4522 = vmatmul.msk.bf16.vlgmr.msra.gmra.mxu3 %vm901_vm1, %v6489_v37  ;;  %1021 = vmatpush.bf16.msra.mxu2 %v6008_v39  ;;  %v6043_v34 = vld [vmem:[%s7990_s0 + $0x190] sm:$0xff]  ;;  %v1437_v39 = vsel %vm905_vm0, %v1423_v32, 0  ;;  %v6056_v44 = vld [vmem:[%s7990_s0 + $0x1fc] sm:$0xff]  ;;  %v191_v47 = vld [vmem:[%s7990_s0 + $0x2b8] sm:$0xf] }
  0x1d   :  { %4345 = vperm.xlu0 %6380, %v4337_v20   ;;  %v6051_v35 = vld [vmem:[%s7990_s0 + $0x1d0] sm:$0xff]  ;;  %v6080_v62 = vld [vmem:[%s7990_s0 + $0x2c4] sm:$0xff]  ;;  %v6133_v32 = vld [vmem:[%s7990_s0 + $0x47c] sm:$0xff] }
  0x1e   :  { %916 = vmatpush.bf16.msra.mxu0 %v5995_v42  ;;  %v6083_v42 = vld [vmem:[%s7990_s0 + $0x2dc] sm:$0xff]  ;;  %v6088_v9 = vld [vmem:[%s7990_s0 + $0x304] sm:$0xff]  ;;  %v6112_v22 = vld [vmem:[%s7990_s0 + $0x3cc] sm:$0xff] }
  0x1f   :  { %1122 = vmatpush.bf16.msrb.mxu1 %v6025_v40  ;;  %1139 = vmatpush.bf16.msrb.mxu3 %v6030_v41  ;;  %v6074_v40 = vld [vmem:[%s7990_s0 + $0x290] sm:$0xff]  ;;  %v1622_v41 = vunpack.c.l.b16 %v216_v36  ;;  %v6111_v27 = vld [vmem:[%s7990_s0 + $0x3c4] sm:$0xff] }
  0x20   :  { %1022 = vmatpush.bf16.msra.mxu2 %v6007_v43  ;;  %v6066_v43 = vld [vmem:[%s7990_s0 + $0x24c] sm:$0xff]  ;;  %v6132_v36 = vld [vmem:[%s7990_s0 + $0x474] sm:$0xff] }
  0x21   :  { %917 = vmatmul.bf16.vlgmr.msra.gmra.mxu0 %v6525_v50  ;;  %v1635_v46 = vpack.c.b16 %v1622_v41, %v1622_v41  ;;  %v6105_v41 = vld [vmem:[%s7990_s0 + $0x394] sm:$0xff] }
  0x22   :  { %1227 = vmatpush.bf16.msrb.mxu0 %v6038_v45  ;;  %v6073_v45 = vld [vmem:[%s7990_s0 + $0x288] sm:$0xff] }
  0x23   :  { %1123 = vmatpush.bf16.msrb.mxu1 %v6024_v48  ;;  %1140 = vmatpush.bf16.msrb.mxu3 %v6029_v49  ;;  %v6082_v48 = vld [vmem:[%s7990_s0 + $0x2d4] sm:$0xff]  ;;  %v6065_v49 = vld [vmem:[%s7990_s0 + $0x244] sm:$0xff] }
  0x24   :  { %1244 = vmatpush.bf16.msrb.mxu2 %v1225_v51  ;;  %v6055_v51 = vld [vmem:[%s7990_s0 + $0x1f4] sm:$0xff] }
  0x25   :  { %1023 = vmatmul.bf16.vlgmr.msra.gmra.mxu2 %v6525_v50 }
  0x26   :  { %1228 = vmatpush.bf16.msrb.mxu0 %v6037_v52  ;;  %v6072_v52 = vld [vmem:[%s7990_s0 + $0x280] sm:$0xff] }
  0x27   :  { %1124 = vmatpush.bf16.msrb.mxu1 %v6023_v53  ;;  %1141 = vmatpush.bf16.msrb.mxu3 %v6028_v54  ;;  %v1649_v53 = vsel %vm905_vm0, %v1635_v46, 0  ;;  %v1516_v54 = vunpack.c.l.b16 %v191_v47  ;;  %v6104_v46 = vld [vmem:[%s7990_s0 + $0x38c] sm:$0xff]  ;;  %v6121_v47 = vld [vmem:[%s7990_s0 + $0x418] sm:$0xff] }
  0x28   :  { %1245 = vmatpush.bf16.msrb.mxu2 %v6042_v55  ;;  %v266_v55 = vld [vmem:[%s7990_s0 + $0x3e4] sm:$0xf] }
  0x2a   :  { %1229 = vmatpush.bf16.msrb.mxu0 %v6036_v56  ;;  %v6081_v56 = vld [vmem:[%s7990_s0 + $0x2cc] sm:$0xff] }
  0x2b   :  { %1125 = vmatpush.bf16.msrb.mxu1 %v6022_v57  ;;  %1142 = vmatpush.bf16.msrb.mxu3 %v6027_v58  ;;  %v6064_v57 = vld [vmem:[%s7990_s0 + $0x23c] sm:$0xff] }
  0x2c   :  { %1246 = vmatpush.bf16.msrb.mxu2 %v6041_v60  ;;  %v6071_v58 = vld [vmem:[%s7990_s0 + $0x278] sm:$0xff]  ;;  %v1834_v60 = vunpack.c.l.b16 %v266_v55 }
  0x2e   :  { %1230 = vmatpush.bf16.msrb.mxu0 %v6035_v61  ;;  %4571 = vmatmul.msk.bf16.vlgmr.msrb.gmra.mxu3 %vm901_vm1, %v6489_v37  ;;  %v1529_v61 = vpack.c.b16 %v1516_v54, %v1516_v54  ;;  %v6120_v54 = vld [vmem:[%s7990_s0 + $0x410] sm:$0xff] }
  0x2f   :  { %1333 = vmatpush.bf16.msra.mxu3 %v6050_v59  ;;  %1126 = vmatpush.bf16.msrb.mxu1 %v6021_v63  ;;  %v6090_v59 = vld [vmem:[%s7990_s0 + $0x314] sm:$0xff] }
  0x30   :  { %1247 = vmatpush.bf16.msrb.mxu2 %v6040_v1  ;;  %v6063_v63 = vld [vmem:[%s7990_s0 + $0x234] sm:$0xff]  ;;  %v1847_v1 = vpack.c.b16 %v1834_v60, %v1834_v60  ;;  %v1543_v2 = vsel %vm905_vm0, %v1529_v61, 0  ;;  %v6119_v60 = vld [vmem:[%s7990_s0 + $0x408] sm:$0xff] }
  0x32   :  { %1231 = vmatpush.bf16.msrb.mxu0 %v6034_v3  ;;  %v6089_v3 = vld [vmem:[%s7990_s0 + $0x30c] sm:$0xff]  ;;  %v1861_v8 = vsel %vm905_vm0, %v1847_v1, 0  ;;  %v6091_v1 = vld [vmem:[%s7990_s0 + $0x320] sm:$0xff] }
  0x33   :  { %1334 = vmatpush.bf16.msra.mxu3 %v6049_v0  ;;  %1127 = vmatpush.bf16.msrb.mxu1 %v6020_v4  ;;  %v6070_v0 = vld [vmem:[%s7990_s0 + $0x270] sm:$0xff]  ;;  %v6079_v4 = vld [vmem:[%s7990_s0 + $0x2bc] sm:$0xff] }
  0x34   :  { %1248 = vmatpush.bf16.msrb.mxu2 %v6039_v6  ;;  %v6078_v6 = vld [vmem:[%s7990_s0 + $0x2b0] sm:$0xff] }
  0x36   :  { %1232 = vmatpush.bf16.msrb.mxu0 %v6033_v11  ;;  %v6114_v11 = vld [vmem:[%s7990_s0 + $0x3dc] sm:$0xff] }
  0x37   :  { %1335 = vmatpush.bf16.msra.mxu3 %v6048_v5  ;;  %1128 = vmatpush.bf16.msrb.mxu1 %v6019_v12  ;;  %v241_v5 = vld [vmem:[%s7990_s0 + $0x380] sm:$0xf]  ;;  %v6077_v12 = vld [vmem:[%s7990_s0 + $0x2a8] sm:$0xff] }
  0x38   :  { %1439 = vmatpush.bf16.msra.mxu2 %v6062_v7  ;;  %v6069_v7 = vld [vmem:[%s7990_s0 + $0x268] sm:$0xff]  ;;  %v1728_v10 = vunpack.c.l.b16 %v241_v5  ;;  %v6137_v5 = vld [vmem:[%s7990_s0 + $0x49c] sm:$0xff] }
  0x39   :  { %4620 = vmatmul.msk.bf16.vlgmr.msrb.gmra.mxu2 %vm901_vm1, %v6489_v37 }
  0x3a   :  { %1129 = vmatmul.bf16.vlgmr.msrb.gmra.mxu1 %v6525_v50  ;;  %1233 = vmatpush.bf16.msrb.mxu0 %v6032_v16  ;;  %v1741_v16 = vpack.c.b16 %v1728_v10, %v1728_v10 }
  0x3b   :  { %1336 = vmatpush.bf16.msra.mxu3 %v6047_v13  ;;  %1350 = vmatpush.bf16.msra.mxu1 %v1331_v14  ;;  %v6068_v13 = vld [vmem:[%s7990_s0 + $0x260] sm:$0xff] }
  0x3c   :  { %1440 = vmatpush.bf16.msra.mxu2 %v6061_v15  ;;  %v6087_v14 = vld [vmem:[%s7990_s0 + $0x2fc] sm:$0xff]  ;;  %v1755_v20 = vsel %vm905_vm0, %v1741_v16, 0  ;;  %v6135_v16 = vld [vmem:[%s7990_s0 + $0x48c] sm:$0xff] }
  0x3d   :  { %v6110_v15 = vld [vmem:[%s7990_s0 + $0x3bc] sm:$0xff] }
  0x3e   :  { %1234 = vmatpush.bf16.msrb.mxu0 %v6031_v21  ;;  %v6109_v21 = vld [vmem:[%s7990_s0 + $0x3b4] sm:$0xff] }
  0x3f   :  { %1337 = vmatpush.bf16.msra.mxu3 %v6046_v17  ;;  %1351 = vmatpush.bf16.msra.mxu1 %v6054_v18  ;;  %v6113_v17 = vld [vmem:[%s7990_s0 + $0x3d4] sm:$0xff]  ;;  %v6076_v18 = vld [vmem:[%s7990_s0 + $0x2a0] sm:$0xff] }
  0x40   :  { %1441 = vmatpush.bf16.msra.mxu2 %v6060_v19  ;;  %v6067_v19 = vld [vmem:[%s7990_s0 + $0x258] sm:$0xff] }
  0x41   :  { %1235 = vmatmul.bf16.vlgmr.msrb.gmra.mxu0 %v6525_v50 }
  0x42   :  { %1651 = vmatpush.bf16.msra.mxu0 %v6086_v23  ;;  %v6075_v23 = vld [vmem:[%s7990_s0 + $0x298] sm:$0xff] }
  0x43   :  { %1338 = vmatpush.bf16.msra.mxu3 %v6045_v24  ;;  %1352 = vmatpush.bf16.msra.mxu1 %v6053_v25  ;;  %v6098_v24 = vld [vmem:[%s7990_s0 + $0x358] sm:$0xff] }
  0x44   :  { %1442 = vmatpush.bf16.msra.mxu2 %v6059_v26  ;;  %v6102_v25 = vld [vmem:[%s7990_s0 + $0x378] sm:$0xff]  ;;  %v6108_v26 = vld [vmem:[%s7990_s0 + $0x3ac] sm:$0xff] }
  0x46   :  { %1652 = vmatpush.bf16.msra.mxu0 %v6085_v28  ;;  %v6134_v28 = vld [vmem:[%s7990_s0 + $0x484] sm:$0xff] }
  0x47   :  { %1339 = vmatpush.bf16.msra.mxu3 %v6044_v29  ;;  %1353 = vmatpush.bf16.msra.mxu1 %v6052_v30  ;;  %v6097_v29 = vld [vmem:[%s7990_s0 + $0x350] sm:$0xff] }
  0x48   :  { %1443 = vmatpush.bf16.msra.mxu2 %v6058_v31  ;;  %v6101_v30 = vld [vmem:[%s7990_s0 + $0x370] sm:$0xff]  ;;  %v6107_v31 = vld [vmem:[%s7990_s0 + $0x3a4] sm:$0xff] }
  0x4a   :  { %1653 = vmatpush.bf16.msra.mxu0 %v6084_v33  ;;  %v6096_v33 = vld [vmem:[%s7990_s0 + $0x348] sm:$0xff] }
  0x4b   :  { %1340 = vmatpush.bf16.msra.mxu3 %v6043_v34  ;;  %1354 = vmatpush.bf16.msra.mxu1 %v6051_v35  ;;  %v6100_v34 = vld [vmem:[%s7990_s0 + $0x368] sm:$0xff]  ;;  %v6106_v35 = vld [vmem:[%s7990_s0 + $0x39c] sm:$0xff] }
  0x4c   :  { %1444 = vmatpush.bf16.msra.mxu2 %v6057_v38  ;;  %v6095_v38 = vld [vmem:[%s7990_s0 + $0x340] sm:$0xff] }
  0x4e   :  { %1341 = vmatmul.bf16.vlgmr.msra.gmra.mxu3 %v6525_v50  ;;  %4669 = vmatmul.msk.bf16.vlgmr.msra.gmra.mxu1 %vm901_vm1, %v6489_v37 }
  0x4f   :  { %1456 = vmatpush.bf16.msrb.mxu3 %v1437_v39  ;;  %1545 = vmatpush.bf16.msrb.mxu1 %v6074_v40  ;;  %v6099_v39 = vld [vmem:[%s7990_s0 + $0x360] sm:$0xff]  ;;  %v316_v40 = vld [vmem:[%s7990_s0 + $0x4ac] sm:$0xf] }
  0x50   :  { %1654 = vmatpush.bf16.msra.mxu0 %v6083_v42  ;;  %1445 = vmatpush.bf16.msra.mxu2 %v6056_v44  ;;  %v6122_v42 = vld [vmem:[%s7990_s0 + $0x420] sm:$0xff]  ;;  %v6131_v44 = vld [vmem:[%s7990_s0 + $0x46c] sm:$0xff] }
  0x53   :  { %1457 = vmatpush.bf16.msrb.mxu3 %v6066_v43  ;;  %1546 = vmatpush.bf16.msrb.mxu1 %v6073_v45  ;;  %v2046_v43 = vunpack.c.l.b16 %v316_v40  ;;  %v6094_v45 = vld [vmem:[%s7990_s0 + $0x338] sm:$0xff]  ;;  %v6180_v40 = vld [vmem:[%s7990_s0 + $0x604] sm:$0xff] }
  0x54   :  { %1655 = vmatpush.bf16.msra.mxu0 %v6082_v48  ;;  %1446 = vmatpush.bf16.msra.mxu2 %v6055_v51  ;;  %v6130_v51 = vld [vmem:[%s7990_s0 + $0x464] sm:$0xff] }
  0x55   :  { %v2059_v48 = vpack.c.b16 %v2046_v43, %v2046_v43  ;;  %v416_v43 = vld [vmem:[%s7990_s0 + $0x63c] sm:$0xf] }
  0x57   :  { %1458 = vmatpush.bf16.msrb.mxu3 %v6065_v49  ;;  %1547 = vmatpush.bf16.msrb.mxu1 %v6072_v52  ;;  %v291_v49 = vld [vmem:[%s7990_s0 + $0x448] sm:$0xf]  ;;  %v6093_v52 = vld [vmem:[%s7990_s0 + $0x330] sm:$0xff] }
  0x58   :  { %1668 = vmatpush.bf16.msrb.mxu2 %v1649_v53  ;;  %1656 = vmatpush.bf16.msra.mxu0 %v6081_v56  ;;  %v6103_v53 = vld [vmem:[%s7990_s0 + $0x384] sm:$0xff]  ;;  %v1940_v55 = vunpack.c.l.b16 %v291_v49  ;;  %v366_v56 = vld [vmem:[%s7990_s0 + $0x574] sm:$0xf] }
  0x59   :  { %1447 = vmatmul.bf16.vlgmr.msra.gmra.mxu2 %v6525_v50  ;;  %v2258_v61 = vunpack.c.l.b16 %v366_v56  ;;  %v6142_v49 = vld [vmem:[%s7990_s0 + $0x4c8] sm:$0xff]  ;;  %v6178_v56 = vld [vmem:[%s7990_s0 + $0x5f4] sm:$0xff] }
  0x5b   :  { %1459 = vmatpush.bf16.msrb.mxu3 %v6064_v57  ;;  %1548 = vmatpush.bf16.msrb.mxu1 %v6071_v58  ;;  %v2073_v57 = vsel %vm905_vm0, %v2059_v48, 0  ;;  %v6129_v58 = vld [vmem:[%s7990_s0 + $0x45c] sm:$0xff] }
  0x5c   :  { %1669 = vmatpush.bf16.msrb.mxu2 %v6090_v59  ;;  %1657 = vmatpush.bf16.msra.mxu0 %v6080_v62  ;;  %v6092_v59 = vld [vmem:[%s7990_s0 + $0x328] sm:$0xff]  ;;  %v6179_v48 = vld [vmem:[%s7990_s0 + $0x5fc] sm:$0xff] }
  0x5d   :  { %v6138_v62 = vld [vmem:[%s7990_s0 + $0x4a4] sm:$0xff] }
  0x5f   :  { %1460 = vmatpush.bf16.msrb.mxu3 %v6063_v63  ;;  %1549 = vmatpush.bf16.msrb.mxu1 %v6070_v0  ;;  %v1953_v63 = vpack.c.b16 %v1940_v55, %v1940_v55  ;;  %v6128_v0 = vld [vmem:[%s7990_s0 + $0x454] sm:$0xff] }
  0x60   :  { %1670 = vmatpush.bf16.msrb.mxu2 %v6089_v3  ;;  %1658 = vmatpush.bf16.msra.mxu0 %v6079_v4  ;;  %v2271_v3 = vpack.c.b16 %v2258_v61, %v2258_v61  ;;  %v391_v55 = vld [vmem:[%s7990_s0 + $0x5d8] sm:$0xf] }
  0x61   :  { %v1967_v4 = vsel %vm905_vm0, %v1953_v63, 0  ;;  %v2364_v61 = vunpack.c.l.b16 %v391_v55 }
  0x62   :  { %4718 = vmatmul.msk.bf16.vlgmr.msrb.gmra.mxu3 %vm901_vm1, %v6489_v37  ;;  %v2285_v10 = vsel %vm905_vm0, %v2271_v3, 0  ;;  %v6140_v3 = vld [vmem:[%s7990_s0 + $0x4b8] sm:$0xff] }
  0x63   :  { %1562 = vmatpush.bf16.msra.mxu3 %v1543_v2  ;;  %1550 = vmatpush.bf16.msrb.mxu1 %v6069_v7  ;;  %v6118_v2 = vld [vmem:[%s7990_s0 + $0x400] sm:$0xff]  ;;  %v341_v7 = vld [vmem:[%s7990_s0 + $0x510] sm:$0xf] }
  0x64   :  { %1880 = vmatpush.bf16.msrb.mxu0 %v1861_v8  ;;  %1671 = vmatpush.bf16.msrb.mxu2 %v6088_v9  ;;  %v6126_v8 = vld [vmem:[%s7990_s0 + $0x440] sm:$0xff]  ;;  %v6117_v9 = vld [vmem:[%s7990_s0 + $0x3f8] sm:$0xff] }
  0x65   :  { %1659 = vmatmul.bf16.vlgmr.msra.gmra.mxu0 %v6525_v50 }
  0x67   :  { %1563 = vmatpush.bf16.msra.mxu3 %v6078_v6  ;;  %1551 = vmatpush.bf16.msrb.mxu1 %v6068_v13  ;;  %v6127_v6 = vld [vmem:[%s7990_s0 + $0x44c] sm:$0xff] }
  0x68   :  { %1881 = vmatpush.bf16.msrb.mxu0 %v6114_v11  ;;  %1672 = vmatpush.bf16.msrb.mxu2 %v6087_v14  ;;  %v6136_v11 = vld [vmem:[%s7990_s0 + $0x494] sm:$0xff]  ;;  %v6162_v13 = vld [vmem:[%s7990_s0 + $0x56c] sm:$0xff] }
  0x69   :  { %v6125_v14 = vld [vmem:[%s7990_s0 + $0x438] sm:$0xff] }
  0x6b   :  { %1564 = vmatpush.bf16.msra.mxu3 %v6077_v12  ;;  %1552 = vmatpush.bf16.msrb.mxu1 %v6067_v19  ;;  %v2152_v12 = vunpack.c.l.b16 %v341_v7  ;;  %v6161_v19 = vld [vmem:[%s7990_s0 + $0x564] sm:$0xff]  ;;  %v2377_v7 = vpack.c.b16 %v2364_v61, %v2364_v61  ;;  %v6194_v61 = vld [vmem:[%s7990_s0 + $0x678] sm:$0xff] }
  0x6c   :  { %1863 = vmatpush.bf16.msra.mxu2 %v6110_v15  ;;  %1882 = vmatpush.bf16.msrb.mxu0 %v6113_v17  ;;  %v6116_v15 = vld [vmem:[%s7990_s0 + $0x3f0] sm:$0xff] }
  0x6d   :  { %4816 = vmatmul.msk.bf16.vlgmr.msrb.gmra.mxu2 %vm901_vm1, %v6489_v37  ;;  %v6158_v17 = vld [vmem:[%s7990_s0 + $0x54c] sm:$0xff] }
  0x6e   :  { %1553 = vmatmul.bf16.vlgmr.msrb.gmra.mxu1 %v6525_v50 }
  0x6f   :  { %1565 = vmatpush.bf16.msra.mxu3 %v6076_v18  ;;  %1774 = vmatpush.bf16.msra.mxu1 %v1755_v20  ;;  %v2165_v18 = vpack.c.b16 %v2152_v12, %v2152_v12  ;;  %v6124_v20 = vld [vmem:[%s7990_s0 + $0x430] sm:$0xff] }
  0x70   :  { %1864 = vmatpush.bf16.msra.mxu2 %v6109_v21  ;;  %1883 = vmatpush.bf16.msrb.mxu0 %v6112_v22  ;;  %v6115_v21 = vld [vmem:[%s7990_s0 + $0x3e8] sm:$0xff] }
  0x71   :  { %v2179_v22 = vsel %vm905_vm0, %v2165_v18, 0 }
  0x73   :  { %1566 = vmatpush.bf16.msra.mxu3 %v6075_v23  ;;  %1775 = vmatpush.bf16.msra.mxu1 %v6102_v25  ;;  %v6157_v23 = vld [vmem:[%s7990_s0 + $0x544] sm:$0xff] }
  0x74   :  { %1865 = vmatpush.bf16.msra.mxu2 %v6108_v26  ;;  %1884 = vmatpush.bf16.msrb.mxu0 %v6111_v27  ;;  %v6123_v25 = vld [vmem:[%s7990_s0 + $0x428] sm:$0xff] }
  0x75   :  { %v6146_v26 = vld [vmem:[%s7990_s0 + $0x4e8] sm:$0xff] }
  0x76   :  { %4767 = vmatmul.msk.bf16.vlgmr.msra.gmra.mxu3 %vm901_vm1, %v6489_v37  ;;  %v6150_v27 = vld [vmem:[%s7990_s0 + $0x508] sm:$0xff] }
  0x77   :  { %1757 = vmatpush.bf16.msrb.mxu3 %v6098_v24  ;;  %1776 = vmatpush.bf16.msra.mxu1 %v6101_v30  ;;  %v6160_v24 = vld [vmem:[%s7990_s0 + $0x55c] sm:$0xff]  ;;  %v6182_v30 = vld [vmem:[%s7990_s0 + $0x614] sm:$0xff] }
  0x78   :  { %2075 = vmatpush.bf16.msra.mxu0 %v6134_v28  ;;  %1866 = vmatpush.bf16.msra.mxu2 %v6107_v31  ;;  %v6156_v28 = vld [vmem:[%s7990_s0 + $0x53c] sm:$0xff] }
  0x79   :  { %4914 = vmatmul.msk.bf16.vlgmr.msrb.gmra.mxu0 %vm901_vm1, %v6489_v37  ;;  %v6145_v31 = vld [vmem:[%s7990_s0 + $0x4e0] sm:$0xff] }
  0x7b   :  { %1758 = vmatpush.bf16.msrb.mxu3 %v6097_v29  ;;  %1777 = vmatpush.bf16.msra.mxu1 %v6100_v34  ;;  %v6159_v29 = vld [vmem:[%s7990_s0 + $0x554] sm:$0xff]  ;;  %v6181_v34 = vld [vmem:[%s7990_s0 + $0x60c] sm:$0xff] }
  0x7c   :  { %2076 = vmatpush.bf16.msra.mxu0 %v6133_v32  ;;  %1867 = vmatpush.bf16.msra.mxu2 %v6106_v35  ;;  %v6149_v32 = vld [vmem:[%s7990_s0 + $0x500] sm:$0xff]  ;;  %v6144_v35 = vld [vmem:[%s7990_s0 + $0x4d8] sm:$0xff] }
  0x7f   :  { %1759 = vmatpush.bf16.msrb.mxu3 %v6096_v33  ;;  %1778 = vmatpush.bf16.msra.mxu1 %v6099_v39  ;;  %v6155_v33 = vld [vmem:[%s7990_s0 + $0x534] sm:$0xff] }
  0x80   :  { %2077 = vmatpush.bf16.msra.mxu0 %v6132_v36  ;;  %1868 = vmatpush.bf16.msra.mxu2 %v6105_v41  ;;  %v6148_v36 = vld [vmem:[%s7990_s0 + $0x4f8] sm:$0xff]  ;;  %v6143_v41 = vld [vmem:[%s7990_s0 + $0x4d0] sm:$0xff] }
  0x82   :  { %4865 = vmatmul.msk.bf16.vlgmr.msra.gmra.mxu1 %vm901_vm1, %v6489_v37 }
  0x83   :  { %1760 = vmatpush.bf16.msrb.mxu3 %v6095_v38  ;;  %1969 = vmatpush.bf16.msrb.mxu1 %v6122_v42  ;;  %v6154_v38 = vld [vmem:[%s7990_s0 + $0x52c] sm:$0xff] }
  0x84   :  { %2078 = vmatpush.bf16.msra.mxu0 %v6131_v44  ;;  %1869 = vmatpush.bf16.msra.mxu2 %v6104_v46  ;;  %v6147_v42 = vld [vmem:[%s7990_s0 + $0x4f0] sm:$0xff]  ;;  %v6153_v44 = vld [vmem:[%s7990_s0 + $0x524] sm:$0xff] }
  0x87   :  { %1761 = vmatpush.bf16.msrb.mxu3 %v6094_v45  ;;  %1970 = vmatpush.bf16.msrb.mxu1 %v6121_v47  ;;  %v6170_v45 = vld [vmem:[%s7990_s0 + $0x5b0] sm:$0xff]  ;;  %v2470_v47 = vunpack.c.l.b16 %v416_v43  ;;  %v6172_v43 = vld [vmem:[%s7990_s0 + $0x5c0] sm:$0xff] }
  0x88   :  { %2079 = vmatpush.bf16.msra.mxu0 %v6130_v51  ;;  %1870 = vmatpush.bf16.msra.mxu2 %v6103_v53  ;;  %v6152_v51 = vld [vmem:[%s7990_s0 + $0x51c] sm:$0xff] }
  0x8b   :  { %1762 = vmatpush.bf16.msrb.mxu3 %v6093_v52  ;;  %1971 = vmatpush.bf16.msrb.mxu1 %v6120_v54  ;;  %v6169_v52 = vld [vmem:[%s7990_s0 + $0x5a8] sm:$0xff]  ;;  %v2483_v54 = vpack.c.b16 %v2470_v47, %v2470_v47 }
  0x8c   :  { %2092 = vmatpush.bf16.msrb.mxu2 %v2073_v57  ;;  %2080 = vmatpush.bf16.msra.mxu0 %v6129_v58  ;;  %v6141_v57 = vld [vmem:[%s7990_s0 + $0x4c0] sm:$0xff] }
  0x8d   :  { %1871 = vmatmul.bf16.vlgmr.msra.gmra.mxu2 %v6525_v50 }
  0x8f   :  { %1763 = vmatpush.bf16.msrb.mxu3 %v6092_v59  ;;  %1972 = vmatpush.bf16.msrb.mxu1 %v6119_v60  ;;  %v6151_v59 = vld [vmem:[%s7990_s0 + $0x514] sm:$0xff]  ;;  %v6168_v60 = vld [vmem:[%s7990_s0 + $0x5a0] sm:$0xff] }
  0x90   :  { %2093 = vmatpush.bf16.msrb.mxu2 %v6138_v62  ;;  %2081 = vmatpush.bf16.msra.mxu0 %v6128_v0  ;;  %v466_v62 = vld [vmem:[%s7990_s0 + $0x704] sm:$0xf]  ;;  %v2497_v0 = vsel %vm905_vm0, %v2483_v54, 0 }
  0x93   :  { %1764 = vmatpush.bf16.msrb.mxu3 %v6091_v1  ;;  %1973 = vmatpush.bf16.msrb.mxu1 %v6118_v2  ;;  %v6177_v1 = vld [vmem:[%s7990_s0 + $0x5ec] sm:$0xff] }
  0x94   :  { %2094 = vmatpush.bf16.msrb.mxu2 %v6137_v5  ;;  %2082 = vmatpush.bf16.msra.mxu0 %v6127_v6  ;;  %v2682_v5 = vunpack.c.l.b16 %v466_v62  ;;  %v6186_v6 = vld [vmem:[%s7990_s0 + $0x634] sm:$0xff] }
  0x95   :  { %v6198_v62 = vld [vmem:[%s7990_s0 + $0x698] sm:$0xff] }
  0x96   :  { %1765 = vmatmul.bf16.vlgmr.msrb.gmra.mxu3 %v6525_v50  ;;  %v2695_v12 = vpack.c.b16 %v2682_v5, %v2682_v5 }
  0x97   :  { %1986 = vmatpush.bf16.msra.mxu3 %v1967_v4  ;;  %1974 = vmatpush.bf16.msrb.mxu1 %v6117_v9  ;;  %v7021_v46 = vpop.f32.mrf.mxu1  ;;  %v6167_v4 = vld [vmem:[%s7990_s0 + $0x598] sm:$0xff]  ;;  %v6139_v9 = vld [vmem:[%s7990_s0 + $0x4b0] sm:$0xff] }
  0x98   :  { %2304 = vmatpush.bf16.msrb.mxu0 %v2285_v10  ;;  %2095 = vmatpush.bf16.msrb.mxu2 %v6136_v11  ;;  %v6166_v11 = vld [vmem:[%s7990_s0 + $0x590] sm:$0xff] }
  0x99   :  { %2083 = vmatmul.bf16.vlgmr.msra.gmra.mxu0 %v6525_v50 }
  0x9b   :  { %1987 = vmatpush.bf16.msra.mxu3 %v6126_v8  ;;  %1975 = vmatpush.bf16.msrb.mxu1 %v6116_v15  ;;  %v6176_v8 = vld [vmem:[%s7990_s0 + $0x5e4] sm:$0xff] }
  0x9c   :  { %2305 = vmatpush.bf16.msrb.mxu0 %v6162_v13  ;;  %2096 = vmatpush.bf16.msrb.mxu2 %v6135_v16  ;;  %v2391_v13 = vsel %vm905_vm0, %v2377_v7, 0  ;;  %v6175_v16 = vld [vmem:[%s7990_s0 + $0x5dc] sm:$0xff]  ;;  %v6230_v7 = vld [vmem:[%s7990_s0 + $0x7a4] sm:$0xff] }
  0x9e   :  { %v918_v63 = vpop.f32.mrf.mxu0 }
  0x9f   :  { %1988 = vmatpush.bf16.msra.mxu3 %v6125_v14  ;;  %1976 = vmatpush.bf16.msrb.mxu1 %v6115_v21  ;;  %v7001_v39 = vpop.f32.mrf.mxu3  ;;  %v7061_v2 = vpop.f32.mrf.mxu1  ;;  %v6185_v14 = vld [vmem:[%s7990_s0 + $0x62c] sm:$0xff]  ;;  %v2709_v21 = vsel %vm905_vm0, %v2695_v12, 0 }
  0xa0   :  { %2287 = vmatpush.bf16.msra.mxu2 %v6158_v17  ;;  %2306 = vmatpush.bf16.msrb.mxu0 %v6161_v19  ;;  %v441_v17 = vld [vmem:[%s7990_s0 + $0x6a0] sm:$0xf]  ;;  %v6174_v19 = vld [vmem:[%s7990_s0 + $0x5d0] sm:$0xff] }
  0xa1   :  { %5012 = vmatmul.msk.bf16.vlgmr.msrb.gmra.mxu2 %vm901_vm1, %v6489_v37 }
  0xa2   :  { %1977 = vmatmul.bf16.vlgmr.msrb.gmra.mxu1 %v6525_v50 }
  0xa3   :  { %1989 = vmatpush.bf16.msra.mxu3 %v6124_v20  ;;  %2198 = vmatpush.bf16.msra.mxu1 %v2179_v22  ;;  %v6165_v20 = vld [vmem:[%s7990_s0 + $0x588] sm:$0xff]  ;;  %v933_v22 = vadd.f32 %v7021_v46, %v918_v63 }
  0xa4   :  { %2288 = vmatpush.bf16.msra.mxu2 %v6157_v23  ;;  %2307 = vmatpush.bf16.msrb.mxu0 %v6160_v24 }
  0xa6   :  { %v920_v18 = vpop.f32.mrf.mxu0 }
  0xa7   :  { %1990 = vmatpush.bf16.msra.mxu3 %v6123_v25  ;;  %2199 = vmatpush.bf16.msra.mxu1 %v6150_v27  ;;  %v7046_v58 = vpop.f32.mrf.mxu3  ;;  %v6184_v25 = vld [vmem:[%s7990_s0 + $0x624] sm:$0xff] }
  0xa8   :  { %2289 = vmatpush.bf16.msra.mxu2 %v6156_v28  ;;  %2308 = vmatpush.bf16.msrb.mxu0 %v6159_v29  ;;  %v1024_v53 = vpop.f32.mrf.mxu2  ;;  %v6210_v28 = vld [vmem:[%s7990_s0 + $0x6fc] sm:$0xff]  ;;  %v6173_v29 = vld [vmem:[%s7990_s0 + $0x5c8] sm:$0xff] }
  0xa9   :  { %v1039_v23 = vadd.f32 %v7001_v39, %v1024_v53  ;;  %v6209_v39 = vld [vmem:[%s7990_s0 + $0x6f4] sm:$0xff] }
  0xaa   :  { %4963 = vmatmul.msk.bf16.vlgmr.msra.gmra.mxu3 %vm901_vm1, %v6489_v37  ;;  %v6205_v53 = vld [vmem:[%s7990_s0 + $0x6d4] sm:$0xff] }
  0xab   :  { %2181 = vmatpush.bf16.msrb.mxu3 %v6146_v26  ;;  %2200 = vmatpush.bf16.msra.mxu1 %v6149_v32  ;;  %v2576_v26 = vunpack.c.l.b16 %v441_v17  ;;  %v4224_v32 = vsel %vm4223_vm2, %v933_v22, -inf  ;;  %v6229_v17 = vld [vmem:[%s7990_s0 + $0x79c] sm:$0xff] }
  0xac   :  { %2499 = vmatpush.bf16.msra.mxu0 %v6182_v30  ;;  %2290 = vmatpush.bf16.msra.mxu2 %v6155_v33  ;;  %v4225_v33 = vsel %vm4223_vm2, %v1039_v23, -inf }
  0xad   :  { %5110 = vmatmul.msk.bf16.vlgmr.msrb.gmra.mxu0 %vm901_vm1, %v6489_v37 }
  0xaf   :  { %2182 = vmatpush.bf16.msrb.mxu3 %v6145_v31  ;;  %2201 = vmatpush.bf16.msra.mxu1 %v6148_v36  ;;  %v6164_v31 = vld [vmem:[%s7990_s0 + $0x580] sm:$0xff]  ;;  %v2589_v36 = vpack.c.b16 %v2576_v26, %v2576_v26 }
  0xb0   :  { %2500 = vmatpush.bf16.msra.mxu0 %v6181_v34  ;;  %2291 = vmatpush.bf16.msra.mxu2 %v6154_v38  ;;  %v1026_v10 = vpop.f32.mrf.mxu2  ;;  %v6183_v34 = vld [vmem:[%s7990_s0 + $0x61c] sm:$0xff] }
  0xb1   :  { %v1144_v15 = vpop.f32.mrf.mxu3  ;;  %v1041_v46 = vadd.f32 %v7046_v58, %v1026_v10  ;;  %v6171_v58 = vld [vmem:[%s7990_s0 + $0x5b8] sm:$0xff]  ;;  %v6197_v10 = vld [vmem:[%s7990_s0 + $0x690] sm:$0xff]  ;;  %v6195_v26 = vld [vmem:[%s7990_s0 + $0x680] sm:$0xff] }
  0xb3   :  { %2183 = vmatpush.bf16.msrb.mxu3 %v6144_v35  ;;  %2202 = vmatpush.bf16.msra.mxu1 %v6147_v42  ;;  %v6206_v35 = vld [vmem:[%s7990_s0 + $0x6dc] sm:$0xff] }
  0xb4   :  { %2501 = vmatpush.bf16.msra.mxu0 %v6180_v40  ;;  %2292 = vmatpush.bf16.msra.mxu2 %v6153_v44  ;;  %v4226_v40 = vmax.f32 %v4224_v32, %v4225_v33  ;;  %v6163_v44 = vld [vmem:[%s7990_s0 + $0x578] sm:$0xff]  ;;  %v6227_v32 = vld [vmem:[%s7990_s0 + $0x78c] sm:$0xff] }
  0xb5   :  { %v6190_v33 = vld [vmem:[%s7990_s0 + $0x658] sm:$0xff] }
  0xb6   :  { %5061 = vmatmul.msk.bf16.vlgmr.msra.gmra.mxu1 %vm901_vm1, %v6489_v37 }
  0xb7   :  { %2184 = vmatpush.bf16.msrb.mxu3 %v6143_v41  ;;  %2393 = vmatpush.bf16.msrb.mxu1 %v6170_v45  ;;  %v1130_v24 = vpop.f32.mrf.mxu1  ;;  %v935_v45 = vadd.f32 %v7061_v2, %v920_v18  ;;  %v6192_v18 = vld [vmem:[%s7990_s0 + $0x668] sm:$0xff] }
  0xb8   :  { %2502 = vmatpush.bf16.msra.mxu0 %v6179_v48  ;;  %2293 = vmatpush.bf16.msra.mxu2 %v6152_v51  ;;  %v1145_v27 = vadd.f32 %v1144_v15, %v1130_v24  ;;  %v6228_v24 = vld [vmem:[%s7990_s0 + $0x794] sm:$0xff] }
  0xb9   :  { %v1146_v41 = vpop.f32.mrf.mxu3 }
  0xba   :  { %v4227_v38 = vsel %vm4223_vm2, %v1145_v27, -inf  ;;  %v516_v27 = vld [vmem:[%s7990_s0 + $0x7cc] sm:$0xf] }
  0xbb   :  { %2185 = vmatpush.bf16.msrb.mxu3 %v6142_v49  ;;  %2394 = vmatpush.bf16.msrb.mxu1 %v6169_v52  ;;  %v7135_v49 = vpop.permute.xlu0 %4340  ;;  %v4228_v51 = vmax.f32 %v4226_v40, %v4227_v38  ;;  %v2603_v52 = vsel %vm905_vm0, %v2589_v36, 0  ;;  %v6226_v40 = vld [vmem:[%s7990_s0 + $0x784] sm:$0xff] }
  0xbc   :  { %2503 = vmatpush.bf16.msra.mxu0 %v6178_v56  ;;  %2294 = vmatpush.bf16.msra.mxu2 %v6151_v59  ;;  %v1250_v30 = vpop.f32.mrf.mxu2  ;;  %v6208_v56 = vld [vmem:[%s7990_s0 + $0x6ec] sm:$0xff]  ;;  %v4231_v59 = vsel %vm4223_vm2, %v935_v45, -inf }
  0xbe   :  { %v1236_v42 = vpop.f32.mrf.mxu0 }
  0xbf   :  { %2186 = vmatpush.bf16.msrb.mxu3 %v6141_v57  ;;  %2395 = vmatpush.bf16.msrb.mxu1 %v6168_v60  ;;  %v1132_v47 = vpop.f32.mrf.mxu1  ;;  %v1251_v48 = vadd.f32 %v1250_v30, %v1236_v42  ;;  %v4232_v60 = vsel %vm4223_vm2, %v1041_v46, -inf  ;;  %v6218_v30 = vld [vmem:[%s7990_s0 + $0x740] sm:$0xff]  ;;  %v566_v46 = vld [vmem:[%s7990_s0 + $0x894] sm:$0xf] }
  0xc0   :  { %2516 = vmatpush.bf16.msrb.mxu2 %v2497_v0  ;;  %2504 = vmatpush.bf16.msra.mxu0 %v6177_v1  ;;  %v1147_v54 = vadd.f32 %v1146_v41, %v1132_v47  ;;  %v6204_v1 = vld [vmem:[%s7990_s0 + $0x6cc] sm:$0xff]  ;;  %v6199_v42 = vld [vmem:[%s7990_s0 + $0x6a4] sm:$0xff] }
  0xc1   :  { %2295 = vmatmul.bf16.vlgmr.msra.gmra.mxu2 %v6525_v50  ;;  %v4229_v55 = vsel %vm4223_vm2, %v1251_v48, -inf  ;;  %v6189_v41 = vld [vmem:[%s7990_s0 + $0x650] sm:$0xff] }
  0xc2   :  { %v4230_v57 = vmax.f32 %v4228_v51, %v4229_v55  ;;  %v4234_v2 = vsel %vm4223_vm2, %v1147_v54, -inf  ;;  %v6225_v51 = vld [vmem:[%s7990_s0 + $0x77c] sm:$0xff]  ;;  %v3106_v54 = vunpack.c.l.b16 %v566_v46  ;;  %v6234_v55 = vld [vmem:[%s7990_s0 + $0x7c4] sm:$0xff] }
  0xc3   :  { %2187 = vmatpush.bf16.msrb.mxu3 %v6140_v3  ;;  %2396 = vmatpush.bf16.msrb.mxu1 %v6167_v4  ;;  %v6207_v3 = vld [vmem:[%s7990_s0 + $0x6e4] sm:$0xff]  ;;  %v4233_v4 = vmax.f32 %v4231_v59, %v4232_v60  ;;  %v7182_v15 = vpop.permute.xlu0 %4345 }
  0xc4   :  { %2517 = vmatpush.bf16.msrb.mxu2 %v6186_v6  ;;  %2505 = vmatpush.bf16.msra.mxu0 %v6176_v8  ;;  %v4348_v63 = vadd.f32 %v7135_v49, %v4230_v57  ;;  %v1252_v0 = vpop.f32.mrf.mxu2  ;;  %v6224_v57 = vld [vmem:[%s7990_s0 + $0x774] sm:$0xff]  ;;  %v6187_v59 = vld [vmem:[%s7990_s0 + $0x640] sm:$0xff] }
  0xc5   :  { %v6214_v60 = vld [vmem:[%s7990_s0 + $0x720] sm:$0xff] }
  0xc6   :  { %v4364_v5 = vmax.f32 %v4348_v63, 0.0  ;;  %v1238_v6 = vpop.f32.mrf.mxu0  ;;  %v6233_v63 = vld [vmem:[%s7990_s0 + $0x7bc] sm:$0xff] }
  0xc7   :  { %2188 = vmatpush.bf16.msrb.mxu3 %v6139_v9  ;;  %2397 = vmatpush.bf16.msrb.mxu1 %v6166_v11  ;;  %v1253_v8 = vadd.f32 %v1252_v0, %v1238_v6  ;;  %v6193_v9 = vld [vmem:[%s7990_s0 + $0x670] sm:$0xff]  ;;  %v4235_v11 = vmax.f32 %v4233_v4, %v4234_v2  ;;  %v6222_v4 = vld [vmem:[%s7990_s0 + $0x760] sm:$0xff] }
  0xc8   :  { %2518 = vmatpush.bf16.msrb.mxu2 %v6185_v14  ;;  %2506 = vmatpush.bf16.msra.mxu0 %v6175_v16  ;;  %v4380_v12 = vpack.c.bf16 %v4364_v5, %v4364_v5  ;;  %v541_v2 = vld [vmem:[%s7990_s0 + $0x830] sm:$0xf]  ;;  %v6213_v5 = vld [vmem:[%s7990_s0 + $0x718] sm:$0xff] }
  0xc9   :  { %v4236_v14 = vsel %vm4223_vm2, %v1253_v8, -inf  ;;  %v3000_v8 = vunpack.c.l.b16 %v541_v2  ;;  %v6250_v2 = vld [vmem:[%s7990_s0 + $0x84c] sm:$0xff] }
  0xca   :  { %2189 = vmatmul.bf16.vlgmr.msrb.gmra.mxu3 %v6525_v50  ;;  %4397 = vst.msk [vmem:[%s7993_s3] sm:$0xf] %vm4396_vm3, %v4380_v12  ;;  %v4237_v16 = vmax.f32 %v4235_v11, %v4236_v14  ;;  %v6221_v11 = vld [vmem:[%s7990_s0 + $0x758] sm:$0xff]  ;;  %v6212_v12 = vld [vmem:[%s7990_s0 + $0x710] sm:$0xff] }
  0xcb   :  { %2410 = vmatpush.bf16.msra.mxu3 %v2391_v13  ;;  %2398 = vmatpush.bf16.msrb.mxu1 %v6165_v20  ;;  %v6203_v13 = vld [vmem:[%s7990_s0 + $0x6c4] sm:$0xff]  ;;  %v7261_v47 = vpop.f32.mrf.mxu1  ;;  %v6254_v14 = vld [vmem:[%s7990_s0 + $0x86c] sm:$0xff] }
  0xcc   :  { %2728 = vmatpush.bf16.msrb.mxu0 %v2709_v21  ;;  %2519 = vmatpush.bf16.msrb.mxu2 %v6184_v25  ;;  %v4349_v20 = vadd.f32 %v7182_v15, %v4237_v16  ;;  %v6202_v21 = vld [vmem:[%s7990_s0 + $0x6bc] sm:$0xff] }
  0xcd   :  { %2507 = vmatmul.bf16.vlgmr.msra.gmra.mxu0 %v6525_v50  ;;  %v6191_v25 = vld [vmem:[%s7990_s0 + $0x660] sm:$0xff] }
  0xce   :  { %v4365_v22 = vmax.f32 %v4349_v20, 0.0  ;;  %v6257_v20 = vld [vmem:[%s7990_s0 + $0x884] sm:$0xff] }
  0xcf   :  { %2411 = vmatpush.bf16.msra.mxu3 %v6174_v19  ;;  %2399 = vmatpush.bf16.msrb.mxu1 %v6164_v31  ;;  %v6196_v19 = vld [vmem:[%s7990_s0 + $0x688] sm:$0xff]  ;;  %v2894_v31 = vunpack.c.l.b16 %v516_v27 }
  0xd0   :  { %2729 = vmatpush.bf16.msrb.mxu0 %v6210_v28  ;;  %2520 = vmatpush.bf16.msrb.mxu2 %v6183_v34  ;;  %v4381_v28 = vpack.c.bf16 %v4365_v22, %v4365_v22  ;;  %v6200_v34 = vld [vmem:[%s7990_s0 + $0x6ac] sm:$0xff]  ;;  %v6253_v27 = vld [vmem:[%s7990_s0 + $0x864] sm:$0xff] }
  0xd1   :  { %v7203_v23 = vpop.f32.mrf.mxu3  ;;  %v2907_v38 = vpack.c.b16 %v2894_v31, %v2894_v31  ;;  %v6220_v22 = vld [vmem:[%s7990_s0 + $0x750] sm:$0xff] }
  0xd2   :  { %4398 = vst.msk [vmem:[%s7993_s3 + $0x4] sm:$0xf] %vm4396_vm3, %v4381_v28 }
  0xd3   :  { %2412 = vmatpush.bf16.msra.mxu3 %v6173_v29  ;;  %2400 = vmatpush.bf16.msrb.mxu1 %v6163_v44  ;;  %v6201_v29 = vld [vmem:[%s7990_s0 + $0x6b4] sm:$0xff]  ;;  %v2921_v48 = vsel %vm905_vm0, %v2907_v38, 0 }
  0xd4   :  { %2711 = vmatpush.bf16.msra.mxu2 %v6206_v35  ;;  %2730 = vmatpush.bf16.msrb.mxu0 %v6209_v39  ;;  %v6217_v35 = vld [vmem:[%s7990_s0 + $0x738] sm:$0xff]  ;;  %v491_v39 = vld [vmem:[%s7990_s0 + $0x768] sm:$0xf] }
  0xd5   :  { %5208 = vmatmul.msk.bf16.vlgmr.msrb.gmra.mxu2 %vm901_vm1, %v6489_v37  ;;  %v2788_v45 = vunpack.c.l.b16 %v491_v39  ;;  %v6252_v39 = vld [vmem:[%s7990_s0 + $0x85c] sm:$0xff] }
  0xd6   :  { %2401 = vmatmul.bf16.vlgmr.msrb.gmra.mxu1 %v6525_v50 }
  0xd7   :  { %2413 = vmatpush.bf16.msra.mxu3 %v6172_v43  ;;  %2622 = vmatpush.bf16.msra.mxu1 %v2603_v52  ;;  %v6216_v43 = vld [vmem:[%s7990_s0 + $0x730] sm:$0xff]  ;;  %v6188_v52 = vld [vmem:[%s7990_s0 + $0x648] sm:$0xff] }
  0xd8   :  { %2712 = vmatpush.bf16.msra.mxu2 %v6205_v53  ;;  %2731 = vmatpush.bf16.msrb.mxu0 %v6208_v56  ;;  %v6215_v53 = vld [vmem:[%s7990_s0 + $0x728] sm:$0xff]  ;;  %v2801_v56 = vpack.c.b16 %v2788_v45, %v2788_v45 }
  0xd9   :  { %v7239_v36 = vpop.f32.mrf.mxu3 }
  0xdb   :  { %2414 = vmatpush.bf16.msra.mxu3 %v6171_v58  ;;  %2623 = vmatpush.bf16.msra.mxu1 %v6198_v62  ;;  %v2815_v62 = vsel %vm905_vm0, %v2801_v56, 0 }
  0xdc   :  { %2713 = vmatpush.bf16.msra.mxu2 %v6204_v1  ;;  %2732 = vmatpush.bf16.msrb.mxu0 %v6207_v3  ;;  %v1448_v44 = vpop.f32.mrf.mxu2  ;;  %v6223_v1 = vld [vmem:[%s7990_s0 + $0x76c] sm:$0xff]  ;;  %v7296_v3 = vpop.f32.mrf.mxu1 }
  0xde   :  { %5159 = vmatmul.msk.bf16.vlgmr.msra.gmra.mxu3 %vm901_vm1, %v6489_v37 }
  0xdf   :  { %2605 = vmatpush.bf16.msrb.mxu3 %v6194_v61  ;;  %2624 = vmatpush.bf16.msra.mxu1 %v6197_v10  ;;  %v3119_v61 = vpack.c.b16 %v3106_v54, %v3106_v54  ;;  %v6258_v10 = vld [vmem:[%s7990_s0 + $0x88c] sm:$0xff] }
  0xe0   :  { %2923 = vmatpush.bf16.msra.mxu0 %v6230_v7  ;;  %2714 = vmatpush.bf16.msra.mxu2 %v6203_v13  ;;  %v6232_v7 = vld [vmem:[%s7990_s0 + $0x7b4] sm:$0xff]  ;;  %v6231_v13 = vld [vmem:[%s7990_s0 + $0x7ac] sm:$0xff] }
  0xe1   :  { %5306 = vmatmul.msk.bf16.vlgmr.msrb.gmra.mxu0 %vm901_vm1, %v6489_v37  ;;  %v3133_v6 = vsel %vm905_vm0, %v3119_v61, 0 }
  0xe2   :  { %v1660_v16 = vpop.f32.mrf.mxu0 }
  0xe3   :  { %2606 = vmatpush.bf16.msrb.mxu3 %v6193_v9  ;;  %2625 = vmatpush.bf16.msra.mxu1 %v6196_v19 }
  0xe4   :  { %2924 = vmatpush.bf16.msra.mxu0 %v6229_v17  ;;  %2715 = vmatpush.bf16.msra.mxu2 %v6202_v21  ;;  %v1450_v0 = vpop.f32.mrf.mxu2 }
  0xe5   :  { %v1462_v58 = vpop.f32.mrf.mxu3 }
  0xe6   :  { %v1463_v19 = vadd.f32 %v1462_v58, %v1448_v44 }
  0xe7   :  { %2607 = vmatpush.bf16.msrb.mxu3 %v6192_v18  ;;  %2626 = vmatpush.bf16.msra.mxu1 %v6195_v26  ;;  %v3013_v18 = vpack.c.b16 %v3000_v8, %v3000_v8  ;;  %v6239_v8 = vld [vmem:[%s7990_s0 + $0x7f0] sm:$0xff] }
  0xe8   :  { %2925 = vmatpush.bf16.msra.mxu0 %v6228_v24  ;;  %2716 = vmatpush.bf16.msra.mxu2 %v6201_v29  ;;  %v6211_v24 = vld [vmem:[%s7990_s0 + $0x708] sm:$0xff]  ;;  %v4239_v28 = vsel %vm4223_vm2, %v1463_v19, -inf }
  0xe9   :  { %v3027_v26 = vsel %vm905_vm0, %v3013_v18, 0  ;;  %v6238_v18 = vld [vmem:[%s7990_s0 + $0x7e8] sm:$0xff] }
  0xea   :  { %5257 = vmatmul.msk.bf16.vlgmr.msra.gmra.mxu1 %vm901_vm1, %v6489_v37  ;;  %v1662_v45 = vpop.f32.mrf.mxu0 }
  0xeb   :  { %2608 = vmatpush.bf16.msrb.mxu3 %v6191_v25  ;;  %2817 = vmatpush.bf16.msrb.mxu1 %v6218_v30  ;;  %v1554_v21 = vpop.f32.mrf.mxu1  ;;  %v1357_v25 = vadd.f32 %v7261_v47, %v7203_v23  ;;  %v6256_v30 = vld [vmem:[%s7990_s0 + $0x87c] sm:$0xff]  ;;  %v6219_v23 = vld [vmem:[%s7990_s0 + $0x748] sm:$0xff]  ;;  %v6278_v47 = vld [vmem:[%s7990_s0 + $0x934] sm:$0xff] }
  0xec   :  { %2926 = vmatpush.bf16.msra.mxu0 %v6227_v32  ;;  %2717 = vmatpush.bf16.msra.mxu2 %v6200_v34  ;;  %v6242_v34 = vld [vmem:[%s7990_s0 + $0x808] sm:$0xff] }
  0xed   :  { %v1464_v9 = vpop.f32.mrf.mxu3  ;;  %v4238_v32 = vsel %vm4223_vm2, %v1357_v25, -inf }
  0xee   :  { %v4240_v38 = vmax.f32 %v4238_v32, %v4239_v28  ;;  %v6237_v28 = vld [vmem:[%s7990_s0 + $0x7e0] sm:$0xff] }
  0xef   :  { %2609 = vmatpush.bf16.msrb.mxu3 %v6190_v33  ;;  %2818 = vmatpush.bf16.msrb.mxu1 %v6217_v35  ;;  %v6246_v35 = vld [vmem:[%s7990_s0 + $0x828] sm:$0xff] }
  0xf0   :  { %2927 = vmatpush.bf16.msra.mxu0 %v6226_v40  ;;  %2718 = vmatpush.bf16.msra.mxu2 %v6199_v42  ;;  %v1674_v17 = vpop.f32.mrf.mxu2  ;;  %v1465_v40 = vadd.f32 %v1464_v9, %v1450_v0  ;;  %v6243_v9 = vld [vmem:[%s7990_s0 + $0x810] sm:$0xff] }
  0xf1   :  { %v1675_v29 = vadd.f32 %v1674_v17, %v1660_v16  ;;  %v6275_v17 = vld [vmem:[%s7990_s0 + $0x91c] sm:$0xff] }
  0xf2   :  { %v4246_v56 = vsel %vm4223_vm2, %v1465_v40, -inf }
  0xf3   :  { %2610 = vmatpush.bf16.msrb.mxu3 %v6189_v41  ;;  %2819 = vmatpush.bf16.msrb.mxu1 %v6216_v43  ;;  %v4243_v42 = vsel %vm4223_vm2, %v1675_v29, -inf  ;;  %v6255_v43 = vld [vmem:[%s7990_s0 + $0x874] sm:$0xff]  ;;  %v1556_v54 = vpop.f32.mrf.mxu1 }
  0xf4   :  { %2940 = vmatpush.bf16.msrb.mxu2 %v2921_v48  ;;  %2928 = vmatpush.bf16.msra.mxu0 %v6225_v51  ;;  %v1359_v48 = vadd.f32 %v7296_v3, %v7239_v36  ;;  %v6241_v51 = vld [vmem:[%s7990_s0 + $0x800] sm:$0xff]  ;;  %v6247_v29 = vld [vmem:[%s7990_s0 + $0x834] sm:$0xff] }
  0xf5   :  { %2719 = vmatmul.bf16.vlgmr.msra.gmra.mxu2 %v6525_v50 }
  0xf6   :  { %v7435_v25 = vpop.f32.mrf.mxu0 }
  0xf7   :  { %2611 = vmatpush.bf16.msrb.mxu3 %v6188_v52  ;;  %2820 = vmatpush.bf16.msrb.mxu1 %v6215_v53  ;;  %v6245_v52 = vld [vmem:[%s7990_s0 + $0x820] sm:$0xff] }
  0xf8   :  { %2941 = vmatpush.bf16.msrb.mxu2 %v6234_v55  ;;  %2929 = vmatpush.bf16.msra.mxu0 %v6224_v57  ;;  %v1676_v46 = vpop.f32.mrf.mxu2  ;;  %v6251_v55 = vld [vmem:[%s7990_s0 + $0x854] sm:$0xff] }
  0xf9   :  { %v1568_v31 = vpop.f32.mrf.mxu3  ;;  %v1677_v36 = vadd.f32 %v1676_v46, %v1662_v45  ;;  %v6235_v45 = vld [vmem:[%s7990_s0 + $0x7d0] sm:$0xff] }
  0xfa   :  { %v1569_v33 = vadd.f32 %v1568_v31, %v1554_v21  ;;  %v6265_v21 = vld [vmem:[%s7990_s0 + $0x8c8] sm:$0xff]  ;;  %v6262_v46 = vld [vmem:[%s7990_s0 + $0x8b0] sm:$0xff] }
  0xfb   :  { %2612 = vmatpush.bf16.msrb.mxu3 %v6187_v59  ;;  %2821 = vmatpush.bf16.msrb.mxu1 %v6214_v60  ;;  %v6277_v59 = vld [vmem:[%s7990_s0 + $0x92c] sm:$0xff]  ;;  %v4245_v60 = vsel %vm4223_vm2, %v1359_v48, -inf }
  0xfc   :  { %2942 = vmatpush.bf16.msrb.mxu2 %v6233_v63  ;;  %2930 = vmatpush.bf16.msra.mxu0 %v6223_v1  ;;  %v4241_v41 = vsel %vm4223_vm2, %v1569_v33, -inf  ;;  %v6244_v63 = vld [vmem:[%s7990_s0 + $0x818] sm:$0xff]  ;;  %v4247_v0 = vmax.f32 %v4245_v60, %v4246_v56  ;;  %v666_v33 = vld [vmem:[%s7990_s0 + $0xa24] sm:$0xf]  ;;  %v641_v56 = vld [vmem:[%s7990_s0 + $0x9c0] sm:$0xf] }
  0xfd   :  { %v4242_v44 = vmax.f32 %v4240_v38, %v4241_v41  ;;  %v6236_v38 = vld [vmem:[%s7990_s0 + $0x7d8] sm:$0xff]  ;;  %v3530_v40 = vunpack.c.l.b16 %v666_v33  ;;  %v3424_v60 = vunpack.c.l.b16 %v641_v56 }
  0xfe   :  { %2613 = vmatmul.bf16.vlgmr.msrb.gmra.mxu3 %v6525_v50  ;;  %v6282_v41 = vld [vmem:[%s7990_s0 + $0x954] sm:$0xff]  ;;  %v7486_v48 = vpop.f32.mrf.mxu0 }
  0xff   :  { %2834 = vmatpush.bf16.msra.mxu3 %v2815_v62  ;;  %2822 = vmatpush.bf16.msrb.mxu1 %v6213_v5  ;;  %v4244_v53 = vmax.f32 %v4242_v44, %v4243_v42  ;;  %v6240_v62 = vld [vmem:[%s7990_s0 + $0x7f8] sm:$0xff]  ;;  %v1780_v31 = vpop.f32.mrf.mxu1 }
 0x100   :  { %3152 = vmatpush.bf16.msrb.mxu0 %v3133_v6  ;;  %2943 = vmatpush.bf16.msrb.mxu2 %v6232_v7  ;;  %v6276_v7 = vld [vmem:[%s7990_s0 + $0x924] sm:$0xff] }
 0x101   :  { %2931 = vmatmul.bf16.vlgmr.msra.gmra.mxu0 %v6525_v50  ;;  %v4350_v57 = vadd.f32 %v7135_v49, %v4244_v53  ;;  %v1570_v58 = vpop.f32.mrf.mxu3  ;;  %v6281_v53 = vld [vmem:[%s7990_s0 + $0x94c] sm:$0xff] }
 0x102   :  { %v1571_v61 = vadd.f32 %v1570_v58, %v1556_v54 }
 0x103   :  { %2835 = vmatpush.bf16.msra.mxu3 %v6222_v4  ;;  %2823 = vmatpush.bf16.msrb.mxu1 %v6212_v12  ;;  %v4366_v1 = vmax.f32 %v4350_v57, 0.0  ;;  %v4250_v4 = vsel %vm4223_vm2, %v1677_v36, -inf  ;;  %v6249_v12 = vld [vmem:[%s7990_s0 + $0x844] sm:$0xff]  ;;  %v6270_v36 = vld [vmem:[%s7990_s0 + $0x8f0] sm:$0xff] }
 0x104   :  { %3153 = vmatpush.bf16.msrb.mxu0 %v6258_v10  ;;  %2944 = vmatpush.bf16.msrb.mxu2 %v6231_v13  ;;  %v4248_v3 = vsel %vm4223_vm2, %v1571_v61, -inf  ;;  %v616_v10 = vld [vmem:[%s7990_s0 + $0x95c] sm:$0xf]  ;;  %v6266_v13 = vld [vmem:[%s7990_s0 + $0x8d0] sm:$0xff]  ;;  %v6261_v57 = vld [vmem:[%s7990_s0 + $0x8a8] sm:$0xff] }
 0x105   :  { %v4382_v5 = vpack.c.bf16 %v4366_v1, %v4366_v1  ;;  %v4249_v6 = vmax.f32 %v4247_v0, %v4248_v3  ;;  %v3318_v16 = vunpack.c.l.b16 %v616_v10  ;;  %v6260_v0 = vld [vmem:[%s7990_s0 + $0x8a0] sm:$0xff] }
 0x106   :  { %v6279_v3 = vld [vmem:[%s7990_s0 + $0x93c] sm:$0xff] }
 0x107   :  { %2836 = vmatpush.bf16.msra.mxu3 %v6221_v11  ;;  %2824 = vmatpush.bf16.msrb.mxu1 %v6211_v24  ;;  %4399 = vst.msk [vmem:[%s7993_s3 + $0x8] sm:$0xf] %vm4396_vm3, %v4382_v5  ;;  %v4251_v11 = vmax.f32 %v4249_v6, %v4250_v4  ;;  %v3331_v24 = vpack.c.b16 %v3318_v16, %v3318_v16  ;;  %v1782_v54 = vpop.f32.mrf.mxu1  ;;  %v6302_v4 = vld [vmem:[%s7990_s0 + $0x9fc] sm:$0xff]  ;;  %v6301_v16 = vld [vmem:[%s7990_s0 + $0x9f4] sm:$0xff] }
 0x108   :  { %3135 = vmatpush.bf16.msra.mxu2 %v6254_v14  ;;  %3154 = vmatpush.bf16.msrb.mxu0 %v6257_v20  ;;  %v6248_v20 = vld [vmem:[%s7990_s0 + $0x83c] sm:$0xff] }
 0x109   :  { %5404 = vmatmul.msk.bf16.vlgmr.msrb.gmra.mxu2 %vm901_vm1, %v6489_v37  ;;  %v4351_v14 = vadd.f32 %v7182_v15, %v4251_v11  ;;  %v6268_v10 = vld [vmem:[%s7990_s0 + $0x8e0] sm:$0xff]  ;;  %v6259_v11 = vld [vmem:[%s7990_s0 + $0x898] sm:$0xff] }
 0x10a   :  { %2825 = vmatmul.bf16.vlgmr.msrb.gmra.mxu1 %v6525_v50 }
 0x10b   :  { %2837 = vmatpush.bf16.msra.mxu3 %v6220_v22  ;;  %3046 = vmatpush.bf16.msra.mxu1 %v3027_v26  ;;  %v4367_v19 = vmax.f32 %v4351_v14, 0.0  ;;  %v591_v26 = vld [vmem:[%s7990_s0 + $0x8f8] sm:$0xf] }
 0x10c   :  { %3136 = vmatpush.bf16.msra.mxu2 %v6253_v27  ;;  %3155 = vmatpush.bf16.msrb.mxu0 %v6256_v30  ;;  %v6274_v27 = vld [vmem:[%s7990_s0 + $0x914] sm:$0xff]  ;;  %v6264_v30 = vld [vmem:[%s7990_s0 + $0x8c0] sm:$0xff]  ;;  %v3212_v32 = vunpack.c.l.b16 %v591_v26  ;;  %v6300_v26 = vld [vmem:[%s7990_s0 + $0x9ec] sm:$0xff] }
 0x10d   :  { %v4383_v22 = vpack.c.bf16 %v4367_v19, %v4367_v19 }
 0x10e   :  { %v3225_v42 = vpack.c.b16 %v3212_v32, %v3212_v32 }
 0x10f   :  { %2838 = vmatpush.bf16.msra.mxu3 %v6219_v23  ;;  %3047 = vmatpush.bf16.msra.mxu1 %v6246_v35  ;;  %4400 = vst.msk [vmem:[%s7993_s3 + $0xc] sm:$0xf] %vm4396_vm3, %v4383_v22  ;;  %v6273_v35 = vld [vmem:[%s7990_s0 + $0x90c] sm:$0xff] }
 0x110   :  { %3137 = vmatpush.bf16.msra.mxu2 %v6252_v39  ;;  %3156 = vmatpush.bf16.msrb.mxu0 %v6255_v43  ;;  %v1872_v23 = vpop.f32.mrf.mxu2  ;;  %v6263_v39 = vld [vmem:[%s7990_s0 + $0x8b8] sm:$0xff]  ;;  %v6272_v43 = vld [vmem:[%s7990_s0 + $0x904] sm:$0xff] }
 0x112   :  { %5355 = vmatmul.msk.bf16.vlgmr.msra.gmra.mxu3 %vm901_vm1, %v6489_v37 }
 0x113   :  { %3029 = vmatpush.bf16.msrb.mxu3 %v6242_v34  ;;  %3048 = vmatpush.bf16.msra.mxu1 %v6245_v52  ;;  %v3345_v34 = vsel %vm905_vm0, %v3331_v24, 0  ;;  %v3239_v52 = vsel %vm905_vm0, %v3225_v42, 0  ;;  %v6290_v24 = vld [vmem:[%s7990_s0 + $0x998] sm:$0xff] }
 0x114   :  { %3347 = vmatpush.bf16.msra.mxu0 %v6278_v47  ;;  %3138 = vmatpush.bf16.msra.mxu2 %v6251_v55  ;;  %v6271_v55 = vld [vmem:[%s7990_s0 + $0x8fc] sm:$0xff] }
 0x115   :  { %5502 = vmatmul.msk.bf16.vlgmr.msrb.gmra.mxu0 %vm901_vm1, %v6489_v37 }
 0x116   :  { %v2084_v5 = vpop.f32.mrf.mxu0 }
 0x117   :  { %3030 = vmatpush.bf16.msrb.mxu3 %v6241_v51  ;;  %3049 = vmatpush.bf16.msra.mxu1 %v6244_v63  ;;  %v3543_v51 = vpack.c.b16 %v3530_v40, %v3530_v40  ;;  %v6269_v63 = vld [vmem:[%s7990_s0 + $0x8e8] sm:$0xff] }
 0x118   :  { %3348 = vmatpush.bf16.msra.mxu0 %v6277_v59  ;;  %3139 = vmatpush.bf16.msra.mxu2 %v6250_v2  ;;  %v7484_v47 = vpop.f32.mrf.mxu2  ;;  %v6280_v59 = vld [vmem:[%s7990_s0 + $0x944] sm:$0xff]  ;;  %v1887_v2 = vadd.f32 %v7435_v25, %v1872_v23  ;;  %v6294_v25 = vld [vmem:[%s7990_s0 + $0x9b8] sm:$0xff] }
 0x119   :  { %v1766_v44 = vpop.f32.mrf.mxu3  ;;  %v3557_v58 = vsel %vm905_vm0, %v3543_v51, 0  ;;  %v6288_v51 = vld [vmem:[%s7990_s0 + $0x988] sm:$0xff] }
 0x11a   :  { %v1781_v1 = vadd.f32 %v1780_v31, %v1766_v44  ;;  %v6303_v31 = vld [vmem:[%s7990_s0 + $0xa04] sm:$0xff] }
 0x11b   :  { %3031 = vmatpush.bf16.msrb.mxu3 %v6240_v62  ;;  %3050 = vmatpush.bf16.msra.mxu1 %v6243_v9  ;;  %v6306_v62 = vld [vmem:[%s7990_s0 + $0xa1c] sm:$0xff] }
 0x11c   :  { %3349 = vmatpush.bf16.msra.mxu0 %v6276_v7  ;;  %3140 = vmatpush.bf16.msra.mxu2 %v6249_v12  ;;  %v3437_v7 = vpack.c.b16 %v3424_v60, %v3424_v60  ;;  %v4252_v12 = vsel %vm4223_vm2, %v1781_v1, -inf  ;;  %v6287_v60 = vld [vmem:[%s7990_s0 + $0x980] sm:$0xff] }
 0x11d   :  { %v6314_v1 = vld [vmem:[%s7990_s0 + $0xa60] sm:$0xff] }
 0x11e   :  { %5453 = vmatmul.msk.bf16.vlgmr.msra.gmra.mxu1 %vm901_vm1, %v6489_v37  ;;  %v3451_v14 = vsel %vm905_vm0, %v3437_v7, 0  ;;  %v2086_v32 = vpop.f32.mrf.mxu0  ;;  %v6296_v7 = vld [vmem:[%s7990_s0 + $0x9cc] sm:$0xff] }
 0x11f   :  { %3032 = vmatpush.bf16.msrb.mxu3 %v6239_v8  ;;  %3241 = vmatpush.bf16.msrb.mxu1 %v6266_v13  ;;  %v6305_v8 = vld [vmem:[%s7990_s0 + $0xa14] sm:$0xff]  ;;  %v1978_v9 = vpop.f32.mrf.mxu1  ;;  %v4253_v13 = vsel %vm4223_vm2, %v1887_v2, -inf }
 0x120   :  { %3350 = vmatpush.bf16.msra.mxu0 %v6275_v17  ;;  %3141 = vmatpush.bf16.msra.mxu2 %v6248_v20  ;;  %v4254_v19 = vmax.f32 %v4252_v12, %v4253_v13  ;;  %v691_v12 = vld [vmem:[%s7990_s0 + $0xa88] sm:$0xf] }
 0x121   :  { %v1768_v61 = vpop.f32.mrf.mxu3  ;;  %v6322_v13 = vld [vmem:[%s7990_s0 + $0xaa4] sm:$0xff] }
 0x123   :  { %3033 = vmatpush.bf16.msrb.mxu3 %v6238_v18  ;;  %3242 = vmatpush.bf16.msrb.mxu1 %v6265_v21  ;;  %v6304_v18 = vld [vmem:[%s7990_s0 + $0xa0c] sm:$0xff]  ;;  %v6267_v21 = vld [vmem:[%s7990_s0 + $0x8d8] sm:$0xff] }
 0x124   :  { %3351 = vmatpush.bf16.msra.mxu0 %v6274_v27  ;;  %3142 = vmatpush.bf16.msra.mxu2 %v6247_v29  ;;  %v2098_v6 = vpop.f32.mrf.mxu2  ;;  %v1783_v27 = vadd.f32 %v1782_v54, %v1768_v61  ;;  %v6291_v61 = vld [vmem:[%s7990_s0 + $0x9a0] sm:$0xff] }
 0x125   :  { %v2099_v17 = vadd.f32 %v2098_v6, %v2084_v5  ;;  %v6286_v5 = vld [vmem:[%s7990_s0 + $0x978] sm:$0xff] }
 0x126   :  { %v4259_v42 = vsel %vm4223_vm2, %v1783_v27, -inf }
 0x127   :  { %3034 = vmatpush.bf16.msrb.mxu3 %v6237_v28  ;;  %3243 = vmatpush.bf16.msrb.mxu1 %v6264_v30  ;;  %v1889_v28 = vadd.f32 %v7486_v48, %v7484_v47  ;;  %v4257_v30 = vsel %vm4223_vm2, %v2099_v17, -inf  ;;  %v1980_v40 = vpop.f32.mrf.mxu1  ;;  %v6325_v47 = vld [vmem:[%s7990_s0 + $0xabc] sm:$0xff]  ;;  %v6312_v17 = vld [vmem:[%s7990_s0 + $0xa50] sm:$0xff] }
 0x128   :  { %3364 = vmatpush.bf16.msrb.mxu2 %v3345_v34  ;;  %3352 = vmatpush.bf16.msra.mxu0 %v6273_v35  ;;  %v6326_v34 = vld [vmem:[%s7990_s0 + $0xac4] sm:$0xff]  ;;  %v6289_v35 = vld [vmem:[%s7990_s0 + $0x990] sm:$0xff] }
 0x129   :  { %3143 = vmatmul.bf16.vlgmr.msra.gmra.mxu2 %v6525_v50 }
 0x12b   :  { %3035 = vmatpush.bf16.msrb.mxu3 %v6236_v38  ;;  %3244 = vmatpush.bf16.msrb.mxu1 %v6263_v39  ;;  %v6293_v38 = vld [vmem:[%s7990_s0 + $0x9b0] sm:$0xff] }
 0x12c   :  { %3365 = vmatpush.bf16.msrb.mxu2 %v6282_v41  ;;  %3353 = vmatpush.bf16.msra.mxu0 %v6272_v43  ;;  %v2100_v33 = vpop.f32.mrf.mxu2  ;;  %v6299_v41 = vld [vmem:[%s7990_s0 + $0x9e4] sm:$0xff]  ;;  %v4260_v43 = vsel %vm4223_vm2, %v1889_v28, -inf }
 0x12d   :  { %v1992_v20 = vpop.f32.mrf.mxu3  ;;  %v2101_v44 = vadd.f32 %v2100_v33, %v2086_v32  ;;  %v6330_v28 = vld [vmem:[%s7990_s0 + $0xae4] sm:$0xff] }
 0x12e   :  { %v1993_v22 = vadd.f32 %v1992_v20, %v1978_v9  ;;  %v3636_v20 = vunpack.c.l.b16 %v691_v12  ;;  %v6310_v32 = vld [vmem:[%s7990_s0 + $0xa40] sm:$0xff] }
 0x12f   :  { %3036 = vmatpush.bf16.msrb.mxu3 %v6235_v45  ;;  %3245 = vmatpush.bf16.msrb.mxu1 %v6262_v46  ;;  %v6348_v12 = vld [vmem:[%s7990_s0 + $0xb7c] sm:$0xff] }
 0x130   :  { %3366 = vmatpush.bf16.msrb.mxu2 %v6281_v53  ;;  %3354 = vmatpush.bf16.msra.mxu0 %v6271_v55  ;;  %v4255_v29 = vsel %vm4223_vm2, %v1993_v22, -inf  ;;  %v4261_v53 = vmax.f32 %v4259_v42, %v4260_v43  ;;  %v6298_v55 = vld [vmem:[%s7990_s0 + $0x9dc] sm:$0xff]  ;;  %v741_v42 = vld [vmem:[%s7990_s0 + $0xb50] sm:$0xf] }
 0x131   :  { %v4256_v23 = vmax.f32 %v4254_v19, %v4255_v29  ;;  %v3649_v29 = vpack.c.b16 %v3636_v20, %v3636_v20  ;;  %v6318_v43 = vld [vmem:[%s7990_s0 + $0xa80] sm:$0xff] }
 0x132   :  { %3037 = vmatmul.bf16.vlgmr.msrb.gmra.mxu3 %v6525_v50 }
 0x133   :  { %3258 = vmatpush.bf16.msra.mxu3 %v3239_v52  ;;  %3246 = vmatpush.bf16.msrb.mxu1 %v6261_v57  ;;  %v4258_v39 = vmax.f32 %v4256_v23, %v4257_v30  ;;  %v6292_v52 = vld [vmem:[%s7990_s0 + $0x9a8] sm:$0xff]  ;;  %v6320_v30 = vld [vmem:[%s7990_s0 + $0xa94] sm:$0xff]  ;;  %v6283_v23 = vld [vmem:[%s7990_s0 + $0x960] sm:$0xff] }
 0x134   :  { %3576 = vmatpush.bf16.msrb.mxu0 %v3557_v58  ;;  %3367 = vmatpush.bf16.msrb.mxu2 %v6280_v59  ;;  %v6324_v59 = vld [vmem:[%s7990_s0 + $0xab4] sm:$0xff] }
 0x135   :  { %3355 = vmatmul.bf16.vlgmr.msra.gmra.mxu0 %v6525_v50  ;;  %v4352_v45 = vadd.f32 %v7135_v49, %v4258_v39  ;;  %v1994_v46 = vpop.f32.mrf.mxu3  ;;  %v6329_v39 = vld [vmem:[%s7990_s0 + $0xadc] sm:$0xff] }
 0x136   :  { %v1995_v48 = vadd.f32 %v1994_v46, %v1980_v40  ;;  %v6328_v46 = vld [vmem:[%s7990_s0 + $0xad4] sm:$0xff] }
 0x137   :  { %3259 = vmatpush.bf16.msra.mxu3 %v6270_v36  ;;  %3247 = vmatpush.bf16.msrb.mxu1 %v6260_v0  ;;  %v4368_v54 = vmax.f32 %v4352_v45, 0.0  ;;  %v4264_v36 = vsel %vm4223_vm2, %v2101_v44, -inf  ;;  %v6297_v0 = vld [vmem:[%s7990_s0 + $0x9d4] sm:$0xff] }
 0x138   :  { %3577 = vmatpush.bf16.msrb.mxu0 %v6306_v62  ;;  %3368 = vmatpush.bf16.msrb.mxu2 %v6279_v3  ;;  %v4262_v56 = vsel %vm4223_vm2, %v1995_v48, -inf  ;;  %v716_v62 = vld [vmem:[%s7990_s0 + $0xaec] sm:$0xf]  ;;  %v6309_v44 = vld [vmem:[%s7990_s0 + $0xa38] sm:$0xff] }
 0x139   :  { %v4384_v57 = vpack.c.bf16 %v4368_v54, %v4368_v54  ;;  %v4263_v58 = vmax.f32 %v4261_v53, %v4262_v56  ;;  %v3742_v3 = vunpack.c.l.b16 %v716_v62  ;;  %v6308_v53 = vld [vmem:[%s7990_s0 + $0xa30] sm:$0xff] }
 0x13a   :  { %v6327_v56 = vld [vmem:[%s7990_s0 + $0xacc] sm:$0xff] }
 0x13b   :  { %3260 = vmatpush.bf16.msra.mxu3 %v6269_v63  ;;  %3248 = vmatpush.bf16.msrb.mxu1 %v6259_v11  ;;  %4401 = vst.msk [vmem:[%s7993_s3 + $0x10] sm:$0xf] %vm4396_vm3, %v4384_v57  ;;  %v4265_v63 = vmax.f32 %v4263_v58, %v4264_v36  ;;  %v7634_v11 = vpop.f32.mrf.mxu0  ;;  %v6350_v36 = vld [vmem:[%s7990_s0 + $0xb8c] sm:$0xff] }
 0x13c   :  { %3559 = vmatpush.bf16.msra.mxu2 %v6302_v4  ;;  %3578 = vmatpush.bf16.msrb.mxu0 %v6305_v8  ;;  %v6323_v4 = vld [vmem:[%s7990_s0 + $0xaac] sm:$0xff]  ;;  %v6313_v8 = vld [vmem:[%s7990_s0 + $0xa58] sm:$0xff] }
 0x13d   :  { %5600 = vmatmul.msk.bf16.vlgmr.msrb.gmra.mxu2 %vm901_vm1, %v6489_v37  ;;  %v4353_v2 = vadd.f32 %v7182_v15, %v4265_v63  ;;  %v6316_v62 = vld [vmem:[%s7990_s0 + $0xa70] sm:$0xff]  ;;  %v6307_v63 = vld [vmem:[%s7990_s0 + $0xa28] sm:$0xff] }
 0x13e   :  { %3249 = vmatmul.bf16.vlgmr.msrb.gmra.mxu1 %v6525_v50 }
 0x13f   :  { %3261 = vmatpush.bf16.msra.mxu3 %v6268_v10  ;;  %3470 = vmatpush.bf16.msra.mxu1 %v3451_v14  ;;  %v4369_v6 = vmax.f32 %v4353_v2, 0.0  ;;  %v3755_v10 = vpack.c.b16 %v3742_v3, %v3742_v3  ;;  %v6285_v14 = vld [vmem:[%s7990_s0 + $0x970] sm:$0xff]  ;;  %v6349_v3 = vld [vmem:[%s7990_s0 + $0xb84] sm:$0xff] }
 0x140   :  { %3560 = vmatpush.bf16.msra.mxu2 %v6301_v16  ;;  %3579 = vmatpush.bf16.msrb.mxu0 %v6304_v18  ;;  %v6295_v16 = vld [vmem:[%s7990_s0 + $0x9c4] sm:$0xff]  ;;  %v2204_v18 = vpop.f32.mrf.mxu1 }
 0x141   :  { %v4385_v9 = vpack.c.bf16 %v4369_v6, %v4369_v6  ;;  %v3769_v22 = vsel %vm905_vm0, %v3755_v10, 0  ;;  %v6338_v10 = vld [vmem:[%s7990_s0 + $0xb28] sm:$0xff] }
 0x143   :  { %3262 = vmatpush.bf16.msra.mxu3 %v6267_v21  ;;  %3471 = vmatpush.bf16.msra.mxu1 %v6294_v25  ;;  %4402 = vst.msk [vmem:[%s7993_s3 + $0x14] sm:$0xf] %vm4396_vm3, %v4385_v9  ;;  %v766_v21 = vld [vmem:[%s7990_s0 + $0xbb4] sm:$0xf]  ;;  %v6284_v25 = vld [vmem:[%s7990_s0 + $0x968] sm:$0xff] }
 0x144   :  { %3561 = vmatpush.bf16.msra.mxu2 %v6300_v26  ;;  %3580 = vmatpush.bf16.msrb.mxu0 %v6303_v31  ;;  %v2296_v19 = vpop.f32.mrf.mxu2  ;;  %v6311_v26 = vld [vmem:[%s7990_s0 + $0xa48] sm:$0xff]  ;;  %v3954_v27 = vunpack.c.l.b16 %v766_v21 }
 0x146   :  { %5551 = vmatmul.msk.bf16.vlgmr.msra.gmra.mxu3 %vm901_vm1, %v6489_v37 }
 0x147   :  { %3453 = vmatpush.bf16.msrb.mxu3 %v6290_v24  ;;  %3472 = vmatpush.bf16.msra.mxu1 %v6293_v38  ;;  %v6321_v24 = vld [vmem:[%s7990_s0 + $0xa9c] sm:$0xff]  ;;  %v3663_v38 = vsel %vm905_vm0, %v3649_v29, 0 }
 0x148   :  { %3771 = vmatpush.bf16.msra.mxu0 %v6326_v34  ;;  %3562 = vmatpush.bf16.msra.mxu2 %v6299_v41  ;;  %v7685_v34 = vpop.f32.mrf.mxu0  ;;  %v2206_v40 = vpop.f32.mrf.mxu1  ;;  %v6319_v41 = vld [vmem:[%s7990_s0 + $0xa8c] sm:$0xff] }
 0x149   :  { %5698 = vmatmul.msk.bf16.vlgmr.msrb.gmra.mxu0 %vm901_vm1, %v6489_v37 }
 0x14b   :  { %3454 = vmatpush.bf16.msrb.mxu3 %v6289_v35  ;;  %3473 = vmatpush.bf16.msra.mxu1 %v6292_v52  ;;  %v3967_v35 = vpack.c.b16 %v3954_v27, %v3954_v27  ;;  %v6317_v52 = vld [vmem:[%s7990_s0 + $0xa78] sm:$0xff] }
 0x14c   :  { %3772 = vmatpush.bf16.msra.mxu0 %v6325_v47  ;;  %3563 = vmatpush.bf16.msra.mxu2 %v6298_v55  ;;  %v7683_v33 = vpop.f32.mrf.mxu2  ;;  %v3848_v47 = vunpack.c.l.b16 %v741_v42  ;;  %v2311_v55 = vadd.f32 %v7634_v11, %v2296_v19  ;;  %v6342_v11 = vld [vmem:[%s7990_s0 + $0xb48] sm:$0xff] }
 0x14d   :  { %v2190_v31 = vpop.f32.mrf.mxu3  ;;  %v3981_v45 = vsel %vm905_vm0, %v3967_v35, 0  ;;  %v6336_v35 = vld [vmem:[%s7990_s0 + $0xb18] sm:$0xff] }
 0x14e   :  { %v2205_v54 = vadd.f32 %v2204_v18, %v2190_v31  ;;  %v6351_v18 = vld [vmem:[%s7990_s0 + $0xb94] sm:$0xff] }
 0x14f   :  { %3455 = vmatpush.bf16.msrb.mxu3 %v6288_v51  ;;  %3474 = vmatpush.bf16.msra.mxu1 %v6291_v61  ;;  %v6354_v51 = vld [vmem:[%s7990_s0 + $0xbac] sm:$0xff] }
 0x150   :  { %3773 = vmatpush.bf16.msra.mxu0 %v6324_v59  ;;  %3564 = vmatpush.bf16.msra.mxu2 %v6297_v0  ;;  %v2508_v57 = vpop.f32.mrf.mxu0  ;;  %v3861_v59 = vpack.c.b16 %v3848_v47, %v3848_v47  ;;  %v4266_v0 = vsel %vm4223_vm2, %v2205_v54, -inf  ;;  %v6335_v47 = vld [vmem:[%s7990_s0 + $0xb10] sm:$0xff] }
 0x151   :  { %v6362_v54 = vld [vmem:[%s7990_s0 + $0xbf0] sm:$0xff] }
 0x152   :  { %5649 = vmatmul.msk.bf16.vlgmr.msra.gmra.mxu1 %vm901_vm1, %v6489_v37  ;;  %v3875_v2 = vsel %vm905_vm0, %v3861_v59, 0  ;;  %v6344_v59 = vld [vmem:[%s7990_s0 + $0xb5c] sm:$0xff] }
 0x153   :  { %3456 = vmatpush.bf16.msrb.mxu3 %v6287_v60  ;;  %3665 = vmatpush.bf16.msrb.mxu1 %v6314_v1  ;;  %v6353_v60 = vld [vmem:[%s7990_s0 + $0xba4] sm:$0xff]  ;;  %v2402_v61 = vpop.f32.mrf.mxu1  ;;  %v4267_v1 = vsel %vm4223_vm2, %v2311_v55, -inf }
 0x154   :  { %3774 = vmatpush.bf16.msra.mxu0 %v6323_v4  ;;  %3565 = vmatpush.bf16.msra.mxu2 %v6296_v7  ;;  %v4268_v6 = vmax.f32 %v4266_v0, %v4267_v1  ;;  %v791_v0 = vld [vmem:[%s7990_s0 + $0xc18] sm:$0xf] }
 0x155   :  { %v2192_v48 = vpop.f32.mrf.mxu3  ;;  %v6370_v1 = vld [vmem:[%s7990_s0 + $0xc34] sm:$0xff] }
 0x157   :  { %3457 = vmatpush.bf16.msrb.mxu3 %v6286_v5  ;;  %3666 = vmatpush.bf16.msrb.mxu1 %v6313_v8  ;;  %v6352_v5 = vld [vmem:[%s7990_s0 + $0xb9c] sm:$0xff]  ;;  %v6315_v8 = vld [vmem:[%s7990_s0 + $0xa68] sm:$0xff] }
 0x158   :  { %3775 = vmatpush.bf16.msra.mxu0 %v6322_v13  ;;  %3566 = vmatpush.bf16.msra.mxu2 %v6295_v16  ;;  %v2522_v58 = vpop.f32.mrf.mxu2  ;;  %v2207_v13 = vadd.f32 %v2206_v40, %v2192_v48  ;;  %v2510_v20 = vpop.f32.mrf.mxu0  ;;  %v6339_v48 = vld [vmem:[%s7990_s0 + $0xb30] sm:$0xff] }
 0x159   :  { %v2523_v4 = vadd.f32 %v2522_v58, %v2508_v57  ;;  %v6334_v57 = vld [vmem:[%s7990_s0 + $0xb08] sm:$0xff] }
 0x15a   :  { %v4273_v29 = vsel %vm4223_vm2, %v2207_v13, -inf }
 0x15b   :  { %3458 = vmatpush.bf16.msrb.mxu3 %v6285_v14  ;;  %3667 = vmatpush.bf16.msrb.mxu1 %v6312_v17  ;;  %v2313_v14 = vadd.f32 %v7685_v34, %v7683_v33  ;;  %v4271_v17 = vsel %vm4223_vm2, %v2523_v4, -inf  ;;  %v2404_v27 = vpop.f32.mrf.mxu1  ;;  %v6373_v33 = vld [vmem:[%s7990_s0 + $0xc4c] sm:$0xff]  ;;  %v6360_v4 = vld [vmem:[%s7990_s0 + $0xbe0] sm:$0xff] }
 0x15c   :  { %3788 = vmatpush.bf16.msrb.mxu2 %v3769_v22  ;;  %3776 = vmatpush.bf16.msra.mxu0 %v6321_v24  ;;  %v6374_v22 = vld [vmem:[%s7990_s0 + $0xc54] sm:$0xff]  ;;  %v6337_v24 = vld [vmem:[%s7990_s0 + $0xb20] sm:$0xff] }
 0x15d   :  { %3567 = vmatmul.bf16.vlgmr.msra.gmra.mxu2 %v6525_v50 }
 0x15f   :  { %3459 = vmatpush.bf16.msrb.mxu3 %v6284_v25  ;;  %3668 = vmatpush.bf16.msrb.mxu1 %v6311_v26  ;;  %v6341_v25 = vld [vmem:[%s7990_s0 + $0xb40] sm:$0xff] }
 0x160   :  { %3789 = vmatpush.bf16.msrb.mxu2 %v6330_v28  ;;  %3777 = vmatpush.bf16.msra.mxu0 %v6320_v30  ;;  %v2524_v21 = vpop.f32.mrf.mxu2  ;;  %v6347_v28 = vld [vmem:[%s7990_s0 + $0xb74] sm:$0xff]  ;;  %v4274_v30 = vsel %vm4223_vm2, %v2313_v14, -inf  ;;  %v6368_v14 = vld [vmem:[%s7990_s0 + $0xc24] sm:$0xff] }
 0x161   :  { %v2416_v7 = vpop.f32.mrf.mxu3  ;;  %v2525_v31 = vadd.f32 %v2524_v21, %v2510_v20 }
 0x162   :  { %v2417_v9 = vadd.f32 %v2416_v7, %v2402_v61  ;;  %v4060_v7 = vunpack.c.l.b16 %v791_v0 }
 0x163   :  { %3460 = vmatpush.bf16.msrb.mxu3 %v6283_v23  ;;  %3669 = vmatpush.bf16.msrb.mxu1 %v6310_v32 }
 0x164   :  { %3790 = vmatpush.bf16.msrb.mxu2 %v6329_v39  ;;  %3778 = vmatpush.bf16.msra.mxu0 %v6319_v41  ;;  %v4269_v16 = vsel %vm4223_vm2, %v2417_v9, -inf  ;;  %v4275_v39 = vmax.f32 %v4273_v29, %v4274_v30  ;;  %v6346_v41 = vld [vmem:[%s7990_s0 + $0xb6c] sm:$0xff]  ;;  %v4073_v13 = vpack.c.b16 %v4060_v7, %v4060_v7 }
 0x165   :  { %v4270_v19 = vmax.f32 %v4268_v6, %v4269_v16  ;;  %v6369_v9 = vld [vmem:[%s7990_s0 + $0xc2c] sm:$0xff] }
 0x166   :  { %3461 = vmatmul.bf16.vlgmr.msrb.gmra.mxu3 %v6525_v50  ;;  %v4087_v21 = vsel %vm905_vm0, %v4073_v13, 0  ;;  %v6365_v30 = vld [vmem:[%s7990_s0 + $0xc08] sm:$0xff] }
 0x167   :  { %3682 = vmatpush.bf16.msra.mxu3 %v3663_v38  ;;  %3670 = vmatpush.bf16.msrb.mxu1 %v6309_v44  ;;  %v4272_v26 = vmax.f32 %v4270_v19, %v4271_v17  ;;  %v6340_v38 = vld [vmem:[%s7990_s0 + $0xb38] sm:$0xff]  ;;  %v6331_v17 = vld [vmem:[%s7990_s0 + $0xaf0] sm:$0xff] }
 0x168   :  { %4000 = vmatpush.bf16.msrb.mxu0 %v3981_v45  ;;  %3791 = vmatpush.bf16.msrb.mxu2 %v6328_v46  ;;  %v6372_v46 = vld [vmem:[%s7990_s0 + $0xc44] sm:$0xff] }
 0x169   :  { %3779 = vmatmul.bf16.vlgmr.msra.gmra.mxu0 %v6525_v50  ;;  %v4354_v23 = vadd.f32 %v7135_v49, %v4272_v26  ;;  %v2418_v32 = vpop.f32.mrf.mxu3  ;;  %v6366_v26 = vld [vmem:[%s7990_s0 + $0xc10] sm:$0xff] }
 0x16a   :  { %v2419_v34 = vadd.f32 %v2418_v32, %v2404_v27  ;;  %v6357_v27 = vld [vmem:[%s7990_s0 + $0xbc8] sm:$0xff] }
 0x16b   :  { %3683 = vmatpush.bf16.msra.mxu3 %v6318_v43  ;;  %3671 = vmatpush.bf16.msrb.mxu1 %v6308_v53  ;;  %v4370_v40 = vmax.f32 %v4354_v23, 0.0  ;;  %v4278_v43 = vsel %vm4223_vm2, %v2525_v31, -inf  ;;  %v6345_v53 = vld [vmem:[%s7990_s0 + $0xb64] sm:$0xff] }
 0x16c   :  { %4001 = vmatpush.bf16.msrb.mxu0 %v6354_v51  ;;  %3792 = vmatpush.bf16.msrb.mxu2 %v6327_v56  ;;  %v4276_v42 = vsel %vm4223_vm2, %v2419_v34, -inf  ;;  %v816_v51 = vld [vmem:[%s7990_s0 + $0xc7c] sm:$0xf]  ;;  %v6356_v31 = vld [vmem:[%s7990_s0 + $0xbc0] sm:$0xff] }
 0x16d   :  { %v4386_v44 = vpack.c.bf16 %v4370_v40, %v4370_v40  ;;  %v4277_v45 = vmax.f32 %v4275_v39, %v4276_v42  ;;  %v4166_v56 = vunpack.c.l.b16 %v816_v51  ;;  %v6364_v39 = vld [vmem:[%s7990_s0 + $0xc00] sm:$0xff]  ;;  %v6355_v42 = vld [vmem:[%s7990_s0 + $0xbb8] sm:$0xff] }
 0x16f   :  { %3684 = vmatpush.bf16.msra.mxu3 %v6317_v52  ;;  %3672 = vmatpush.bf16.msrb.mxu1 %v6307_v63  ;;  %4403 = vst.msk [vmem:[%s7993_s3 + $0x18] sm:$0xf] %vm4396_vm3, %v4386_v44  ;;  %v4279_v52 = vmax.f32 %v4277_v45, %v4278_v43  ;;  %v2734_v63 = vpop.f32.mrf.mxu0 }
 0x170   :  { %3983 = vmatpush.bf16.msra.mxu2 %v6350_v36  ;;  %4002 = vmatpush.bf16.msrb.mxu0 %v6353_v60  ;;  %v6371_v36 = vld [vmem:[%s7990_s0 + $0xc3c] sm:$0xff]  ;;  %v6361_v60 = vld [vmem:[%s7990_s0 + $0xbe8] sm:$0xff] }
 0x171   :  { %5796 = vmatmul.msk.bf16.vlgmr.msrb.gmra.mxu2 %vm901_vm1, %v6489_v37  ;;  %v4355_v55 = vadd.f32 %v7182_v15, %v4279_v52 }
 0x172   :  { %3673 = vmatmul.bf16.vlgmr.msrb.gmra.mxu1 %v6525_v50 }
 0x173   :  { %3685 = vmatpush.bf16.msra.mxu3 %v6316_v62  ;;  %3894 = vmatpush.bf16.msra.mxu1 %v3875_v2  ;;  %v4371_v58 = vmax.f32 %v4355_v55, 0.0  ;;  %v4179_v62 = vpack.c.b16 %v4166_v56, %v4166_v56  ;;  %v6333_v2 = vld [vmem:[%s7990_s0 + $0xb00] sm:$0xff] }
 0x174   :  { %3984 = vmatpush.bf16.msra.mxu2 %v6349_v3  ;;  %4003 = vmatpush.bf16.msrb.mxu0 %v6352_v5  ;;  %v6343_v3 = vld [vmem:[%s7990_s0 + $0xb54] sm:$0xff]  ;;  %v2628_v5 = vpop.f32.mrf.mxu1 }
 0x175   :  { %v4387_v61 = vpack.c.bf16 %v4371_v58, %v4371_v58 }
 0x177   :  { %3686 = vmatpush.bf16.msra.mxu3 %v6315_v8  ;;  %3895 = vmatpush.bf16.msra.mxu1 %v6342_v11  ;;  %4404 = vst.msk [vmem:[%s7993_s3 + $0x1c] sm:$0xf] %vm4396_vm3, %v4387_v61  ;;  %v4193_v8 = vsel %vm905_vm0, %v4179_v62, 0  ;;  %v6359_v11 = vld [vmem:[%s7990_s0 + $0xbd8] sm:$0xff]  ;;  %v2736_v20 = vpop.f32.mrf.mxu0 }
 0x178   :  { %3985 = vmatpush.bf16.msra.mxu2 %v6348_v12  ;;  %4004 = vmatpush.bf16.msrb.mxu0 %v6351_v18  ;;  %v2720_v6 = vpop.f32.mrf.mxu2  ;;  %v6378_v12 = vld [vmem:[%s7990_s0 + $0xc74] sm:$0xff] }
 0x179   :  { %v6358_v18 = vld [vmem:[%s7990_s0 + $0xbd0] sm:$0xff]  ;;  %v2735_v32 = vadd.f32 %v2734_v63, %v2720_v6 }
 0x17a   :  { %5747 = vmatmul.msk.bf16.vlgmr.msra.gmra.mxu3 %vm901_vm1, %v6489_v37 }
 0x17b   :  { %3877 = vmatpush.bf16.msrb.mxu3 %v6338_v10  ;;  %3896 = vmatpush.bf16.msra.mxu1 %v6341_v25  ;;  %v6332_v10 = vld [vmem:[%s7990_s0 + $0xaf8] sm:$0xff] }
 0x17c   :  { %4195 = vmatpush.bf16.msra.mxu0 %v6374_v22  ;;  %3986 = vmatpush.bf16.msra.mxu2 %v6347_v28  ;;  %v6377_v22 = vld [vmem:[%s7990_s0 + $0xc6c] sm:$0xff]  ;;  %v6367_v25 = vld [vmem:[%s7990_s0 + $0xc1c] sm:$0xff]  ;;  %v6376_v28 = vld [vmem:[%s7990_s0 + $0xc64] sm:$0xff] }
 0x17d   :  { %5894 = vmatmul.msk.bf16.vlgmr.msrb.gmra.mxu0 %vm901_vm1, %v6489_v37 }
 0x17f   :  { %3878 = vmatpush.bf16.msrb.mxu3 %v6337_v24  ;;  %3897 = vmatpush.bf16.msra.mxu1 %v6340_v38  ;;  %v2630_v24 = vpop.f32.mrf.mxu1  ;;  %v2932_v34 = vpop.f32.mrf.mxu0 }
 0x180   :  { %4196 = vmatpush.bf16.msra.mxu0 %v6373_v33  ;;  %3987 = vmatpush.bf16.msra.mxu2 %v6346_v41  ;;  %v2722_v19 = vpop.f32.mrf.mxu2  ;;  %v6375_v33 = vld [vmem:[%s7990_s0 + $0xc5c] sm:$0xff]  ;;  %v4281_v41 = vsel %vm4223_vm2, %v2735_v32, -inf }
 0x181   :  { %v2614_v16 = vpop.f32.mrf.mxu3  ;;  %v2737_v51 = vadd.f32 %v2736_v20, %v2722_v19 }
 0x182   :  { %v2629_v23 = vadd.f32 %v2628_v5, %v2614_v16 }
 0x183   :  { %3879 = vmatpush.bf16.msrb.mxu3 %v6336_v35  ;;  %3898 = vmatpush.bf16.msra.mxu1 %v6339_v48 }
 0x184   :  { %4197 = vmatpush.bf16.msra.mxu0 %v6372_v46  ;;  %3988 = vmatpush.bf16.msra.mxu2 %v6345_v53  ;;  %v4280_v40 = vsel %vm4223_vm2, %v2629_v23, -inf  ;;  %v6363_v46 = vld [vmem:[%s7990_s0 + $0xbf8] sm:$0xff] }
 0x185   :  { %v4282_v44 = vmax.f32 %v4280_v40, %v4281_v41 }
 0x186   :  { %5845 = vmatmul.msk.bf16.vlgmr.msra.gmra.mxu1 %vm901_vm1, %v6489_v37 }
 0x187   :  { %3880 = vmatpush.bf16.msrb.mxu3 %v6335_v47  ;;  %4089 = vmatpush.bf16.msrb.mxu1 %v6362_v54  ;;  %v2826_v38 = vpop.f32.mrf.mxu1  ;;  %v2934_v55 = vpop.f32.mrf.mxu0 }
 0x188   :  { %4198 = vmatpush.bf16.msra.mxu0 %v6371_v36  ;;  %3989 = vmatpush.bf16.msra.mxu2 %v6344_v59  ;;  %v4288_v59 = vsel %vm4223_vm2, %v2737_v51, -inf }
 0x189   :  { %v2616_v29 = vpop.f32.mrf.mxu3 }
 0x18a   :  { %v2631_v48 = vadd.f32 %v2630_v24, %v2616_v29 }
 0x18b   :  { %3881 = vmatpush.bf16.msrb.mxu3 %v6334_v57  ;;  %4090 = vmatpush.bf16.msrb.mxu1 %v6361_v60 }
 0x18c   :  { %4199 = vmatpush.bf16.msra.mxu0 %v6370_v1  ;;  %3990 = vmatpush.bf16.msra.mxu2 %v6343_v3  ;;  %v2946_v35 = vpop.f32.mrf.mxu2  ;;  %v4287_v58 = vsel %vm4223_vm2, %v2631_v48, -inf }
 0x18d   :  { %v2947_v43 = vadd.f32 %v2946_v35, %v2932_v34  ;;  %v4289_v0 = vmax.f32 %v4287_v58, %v4288_v59 }
 0x18f   :  { %3882 = vmatpush.bf16.msrb.mxu3 %v6333_v2  ;;  %4091 = vmatpush.bf16.msrb.mxu1 %v6360_v4  ;;  %v4285_v53 = vsel %vm4223_vm2, %v2947_v43, -inf  ;;  %v2828_v57 = vpop.f32.mrf.mxu1 }
 0x190   :  { %4212 = vmatpush.bf16.msrb.mxu2 %v4193_v8  ;;  %4200 = vmatpush.bf16.msra.mxu0 %v6369_v9 }
 0x191   :  { %3991 = vmatmul.bf16.vlgmr.msra.gmra.mxu2 %v6525_v50 }
 0x192   :  { %v3158_v8 = vpop.f32.mrf.mxu0 }
 0x193   :  { %3883 = vmatpush.bf16.msrb.mxu3 %v6332_v10  ;;  %4092 = vmatpush.bf16.msrb.mxu1 %v6359_v11 }
 0x194   :  { %4213 = vmatpush.bf16.msrb.mxu2 %v6378_v12  ;;  %4201 = vmatpush.bf16.msra.mxu0 %v6368_v14  ;;  %v2948_v56 = vpop.f32.mrf.mxu2 }
 0x195   :  { %v2840_v45 = vpop.f32.mrf.mxu3  ;;  %v2949_v60 = vadd.f32 %v2948_v56, %v2934_v55 }
 0x196   :  { %v2841_v47 = vadd.f32 %v2840_v45, %v2826_v38 }
 0x197   :  { %3884 = vmatpush.bf16.msrb.mxu3 %v6331_v17  ;;  %4093 = vmatpush.bf16.msrb.mxu1 %v6358_v18  ;;  %v4292_v2 = vsel %vm4223_vm2, %v2949_v60, -inf }
 0x198   :  { %4214 = vmatpush.bf16.msrb.mxu2 %v6377_v22  ;;  %4202 = vmatpush.bf16.msra.mxu0 %v6367_v25  ;;  %v4283_v52 = vsel %vm4223_vm2, %v2841_v47, -inf }
 0x199   :  { %v4284_v54 = vmax.f32 %v4282_v44, %v4283_v52 }
 0x19a   :  { %3885 = vmatmul.bf16.vlgmr.msrb.gmra.mxu3 %v6525_v50  ;;  %v3160_v13 = vpop.f32.mrf.mxu0 }
 0x19b   :  { %4106 = vmatpush.bf16.msra.mxu3 %v4087_v21  ;;  %4094 = vmatpush.bf16.msrb.mxu1 %v6357_v27  ;;  %v4286_v36 = vmax.f32 %v4284_v54, %v4285_v53  ;;  %v3052_v9 = vpop.f32.mrf.mxu1 }
 0x19c   :  { %4215 = vmatpush.bf16.msrb.mxu2 %v6376_v28  ;;  %4203 = vmatmul.bf16.vlgmr.msra.gmra.mxu0 %v6525_v50 }
 0x19d   :  { %v4356_v61 = vadd.f32 %v7135_v49, %v4286_v36  ;;  %v2842_v62 = vpop.f32.mrf.mxu3 }
 0x19e   :  { %v2843_v63 = vadd.f32 %v2842_v62, %v2828_v57 }
 0x19f   :  { %4107 = vmatpush.bf16.msra.mxu3 %v6366_v26  ;;  %4095 = vmatpush.bf16.msrb.mxu1 %v6356_v31  ;;  %v4372_v1 = vmax.f32 %v4356_v61, 0.0 }
 0x1a0   :  { %4216 = vmatpush.bf16.msrb.mxu2 %v6375_v33 }
 0x1a1   :  { %v4388_v3 = vpack.c.bf16 %v4372_v1, %v4372_v1 }
 0x1a3   :  { %4108 = vmatpush.bf16.msra.mxu3 %v6365_v30  ;;  %5992 = vmatmul.msk.bf16.vlgmr.msrb.gmra.mxu2 %vm901_vm1, %v6489_v37  ;;  %4405 = vst.msk [vmem:[%s7993_s3 + $0x20] sm:$0xf] %vm4396_vm3, %v4388_v3  ;;  %v3054_v14 = vpop.f32.mrf.mxu1 }
 0x1a4   :  { %4096 = vmatpush.bf16.msrb.mxu1 %v6355_v42 }
 0x1a7   :  { %4109 = vmatpush.bf16.msra.mxu3 %v6364_v39  ;;  %4097 = vmatmul.bf16.vlgmr.msrb.gmra.mxu1 %v6525_v50  ;;  %v4290_v50 = vsel %vm4223_vm2, %v2843_v63, -inf }
 0x1a8   :  { %v4291_v4 = vmax.f32 %v4289_v0, %v4290_v50 }
 0x1aa   :  { %v4293_v5 = vmax.f32 %v4291_v4, %v4292_v2 }
 0x1ab   :  { %4110 = vmatpush.bf16.msra.mxu3 %v6363_v46 }
 0x1ac   :  { %v3144_v10 = vpop.f32.mrf.mxu2 }
 0x1ad   :  { %v3159_v18 = vadd.f32 %v3158_v8, %v3144_v10 }
 0x1ae   :  { %5943 = vmatmul.msk.bf16.vlgmr.msra.gmra.mxu3 %vm901_vm1, %v6489_v37  ;;  %v4357_v37 = vadd.f32 %v7182_v15, %v4293_v5 }
 0x1af   :  { %v4295_v24 = vsel %vm4223_vm2, %v3159_v18, -inf }
 0x1b0   :  { %v4373_v6 = vmax.f32 %v4357_v37, 0.0 }
 0x1b2   :  { %v4389_v7 = vpack.c.bf16 %v4373_v6, %v4373_v6  ;;  %v3356_v19 = vpop.f32.mrf.mxu0 }
 0x1b4   :  { %4406 = vst.msk [vmem:[%s7993_s3 + $0x24] sm:$0xf] %vm4396_vm3, %v4389_v7  ;;  %v3146_v12 = vpop.f32.mrf.mxu2 }
 0x1b5   :  { %v3038_v11 = vpop.f32.mrf.mxu3  ;;  %v3161_v30 = vadd.f32 %v3160_v13, %v3146_v12 }
 0x1b6   :  { %v3053_v17 = vadd.f32 %v3052_v9, %v3038_v11 }
 0x1b7   :  { %v4302_v40 = vsel %vm4223_vm2, %v3161_v30, -inf }
 0x1b8   :  { %v4294_v22 = vsel %vm4223_vm2, %v3053_v17, -inf }
 0x1b9   :  { %v4296_v26 = vmax.f32 %v4294_v22, %v4295_v24 }
 0x1ba   :  { %v3358_v33 = vpop.f32.mrf.mxu0 }
 0x1bb   :  { %v3250_v21 = vpop.f32.mrf.mxu1 }
 0x1bd   :  { %v3040_v16 = vpop.f32.mrf.mxu3 }
 0x1be   :  { %v3055_v29 = vadd.f32 %v3054_v14, %v3040_v16 }
 0x1c0   :  { %v3370_v20 = vpop.f32.mrf.mxu2  ;;  %v4301_v39 = vsel %vm4223_vm2, %v3055_v29, -inf }
 0x1c1   :  { %v3371_v25 = vadd.f32 %v3370_v20, %v3356_v19  ;;  %v4303_v45 = vmax.f32 %v4301_v39, %v4302_v40 }
 0x1c3   :  { %v4299_v23 = vsel %vm4223_vm2, %v3371_v25, -inf  ;;  %v3252_v38 = vpop.f32.mrf.mxu1 }
 0x1c6   :  { %v3582_v36 = vpop.f32.mrf.mxu0 }
 0x1c8   :  { %v3372_v34 = vpop.f32.mrf.mxu2 }
 0x1c9   :  { %v3264_v27 = vpop.f32.mrf.mxu3  ;;  %v3373_v41 = vadd.f32 %v3372_v34, %v3358_v33 }
 0x1ca   :  { %v3265_v28 = vadd.f32 %v3264_v27, %v3250_v21 }
 0x1cb   :  { %v4306_v48 = vsel %vm4223_vm2, %v3373_v41, -inf }
 0x1cc   :  { %v4297_v31 = vsel %vm4223_vm2, %v3265_v28, -inf }
 0x1cd   :  { %v4298_v32 = vmax.f32 %v4296_v26, %v4297_v31 }
 0x1ce   :  { %v3584_v61 = vpop.f32.mrf.mxu0 }
 0x1cf   :  { %v4300_v35 = vmax.f32 %v4298_v32, %v4299_v23  ;;  %v3476_v57 = vpop.f32.mrf.mxu1 }
 0x1d1   :  { %v4358_v42 = vadd.f32 %v7135_v49, %v4300_v35  ;;  %v3266_v43 = vpop.f32.mrf.mxu3 }
 0x1d2   :  { %v3267_v44 = vadd.f32 %v3266_v43, %v3252_v38 }
 0x1d3   :  { %v4374_v46 = vmax.f32 %v4358_v42, 0.0 }
 0x1d4   :  { %v4304_v47 = vsel %vm4223_vm2, %v3267_v44, -inf }
 0x1d5   :  { %v4390_v51 = vpack.c.bf16 %v4374_v46, %v4374_v46  ;;  %v4305_v52 = vmax.f32 %v4303_v45, %v4304_v47 }
 0x1d7   :  { %4407 = vst.msk [vmem:[%s7993_s3 + $0x28] sm:$0xf] %vm4396_vm3, %v4390_v51  ;;  %v4307_v53 = vmax.f32 %v4305_v52, %v4306_v48  ;;  %v3478_v62 = vpop.f32.mrf.mxu1 }
 0x1d9   :  { %v4359_v54 = vadd.f32 %v7182_v15, %v4307_v53 }
 0x1db   :  { %v4375_v55 = vmax.f32 %v4359_v54, 0.0 }
 0x1dd   :  { %v4391_v56 = vpack.c.bf16 %v4375_v55, %v4375_v55 }
 0x1df   :  { %4408 = vst.msk [vmem:[%s7993_s3 + $0x2c] sm:$0xf] %vm4396_vm3, %v4391_v56 }
 0x1e0   :  { %v3568_v58 = vpop.f32.mrf.mxu2 }
 0x1e1   :  { %v3583_v1 = vadd.f32 %v3582_v36, %v3568_v58 }
 0x1e3   :  { %v4309_v5 = vsel %vm4223_vm2, %v3583_v1, -inf }
 0x1e6   :  { %v3780_v50 = vpop.f32.mrf.mxu0 }
 0x1e8   :  { %v3570_v60 = vpop.f32.mrf.mxu2 }
 0x1e9   :  { %v3462_v59 = vpop.f32.mrf.mxu3  ;;  %v3585_v10 = vadd.f32 %v3584_v61, %v3570_v60 }
 0x1ea   :  { %v3477_v0 = vadd.f32 %v3476_v57, %v3462_v59 }
 0x1eb   :  { %v4316_v20 = vsel %vm4223_vm2, %v3585_v10, -inf }
 0x1ec   :  { %v4308_v4 = vsel %vm4223_vm2, %v3477_v0, -inf }
 0x1ed   :  { %v4310_v6 = vmax.f32 %v4308_v4, %v4309_v5 }
 0x1ee   :  { %v3782_v14 = vpop.f32.mrf.mxu0 }
 0x1ef   :  { %v3674_v3 = vpop.f32.mrf.mxu1 }
 0x1f1   :  { %v3464_v63 = vpop.f32.mrf.mxu3 }
 0x1f2   :  { %v3479_v9 = vadd.f32 %v3478_v62, %v3464_v63 }
 0x1f4   :  { %v3794_v2 = vpop.f32.mrf.mxu2  ;;  %v4315_v19 = vsel %vm4223_vm2, %v3479_v9, -inf }
 0x1f5   :  { %v3795_v37 = vadd.f32 %v3794_v2, %v3780_v50  ;;  %v4317_v26 = vmax.f32 %v4315_v19, %v4316_v20 }
 0x1f7   :  { %v4313_v12 = vsel %vm4223_vm2, %v3795_v37, -inf  ;;  %v3676_v18 = vpop.f32.mrf.mxu1 }
 0x1fa   :  { %v4006_v38 = vpop.f32.mrf.mxu0 }
 0x1fc   :  { %v3796_v16 = vpop.f32.mrf.mxu2 }
 0x1fd   :  { %v3688_v7 = vpop.f32.mrf.mxu3  ;;  %v3797_v21 = vadd.f32 %v3796_v16, %v3782_v14 }
 0x1fe   :  { %v3689_v8 = vadd.f32 %v3688_v7, %v3674_v3 }
 0x1ff   :  { %v4320_v29 = vsel %vm4223_vm2, %v3797_v21, -inf }
 0x200   :  { %v4311_v11 = vsel %vm4223_vm2, %v3689_v8, -inf }
 0x201   :  { %v4312_v13 = vmax.f32 %v4310_v6, %v4311_v11 }
 0x202   :  { %v4008_v42 = vpop.f32.mrf.mxu0 }
 0x203   :  { %v4314_v17 = vmax.f32 %v4312_v13, %v4313_v12  ;;  %v3900_v39 = vpop.f32.mrf.mxu1 }
 0x205   :  { %v4360_v22 = vadd.f32 %v7135_v49, %v4314_v17  ;;  %v3690_v24 = vpop.f32.mrf.mxu3 }
 0x206   :  { %v3691_v25 = vadd.f32 %v3690_v24, %v3676_v18 }
 0x207   :  { %v4376_v27 = vmax.f32 %v4360_v22, 0.0 }
 0x208   :  { %v4318_v28 = vsel %vm4223_vm2, %v3691_v25, -inf }
 0x209   :  { %v4392_v30 = vpack.c.bf16 %v4376_v27, %v4376_v27  ;;  %v4319_v31 = vmax.f32 %v4317_v26, %v4318_v28 }
 0x20b   :  { %4409 = vst.msk [vmem:[%s7993_s3 + $0x30] sm:$0xf] %vm4396_vm3, %v4392_v30  ;;  %v4321_v23 = vmax.f32 %v4319_v31, %v4320_v29  ;;  %v3902_v43 = vpop.f32.mrf.mxu1 }
 0x20d   :  { %v4361_v32 = vadd.f32 %v7182_v15, %v4321_v23 }
 0x20f   :  { %v4377_v33 = vmax.f32 %v4361_v32, 0.0 }
 0x211   :  { %v4393_v34 = vpack.c.bf16 %v4377_v33, %v4377_v33 }
 0x213   :  { %4410 = vst.msk [vmem:[%s7993_s3 + $0x34] sm:$0xf] %vm4396_vm3, %v4393_v34 }
 0x214   :  { %v3992_v35 = vpop.f32.mrf.mxu2 }
 0x215   :  { %v4007_v45 = vadd.f32 %v4006_v38, %v3992_v35 }
 0x217   :  { %v4323_v52 = vsel %vm4223_vm2, %v4007_v45, -inf }
 0x219   :  { %v4204_v47 = vpop.f32.mrf.mxu0 }
 0x21c   :  { %v3994_v41 = vpop.f32.mrf.mxu2 }
 0x21d   :  { %v3886_v40 = vpop.f32.mrf.mxu3  ;;  %v4009_v61 = vadd.f32 %v4008_v42, %v3994_v41 }
 0x21e   :  { %v3901_v46 = vadd.f32 %v3900_v39, %v3886_v40 }
 0x21f   :  { %v4330_v4 = vsel %vm4223_vm2, %v4009_v61, -inf }
 0x220   :  { %v4322_v53 = vsel %vm4223_vm2, %v3901_v46, -inf }
 0x221   :  { %v4324_v36 = vmax.f32 %v4322_v53, %v4323_v52  ;;  %v4206_v63 = vpop.f32.mrf.mxu0 }
 0x224   :  { %v4098_v51 = vpop.f32.mrf.mxu1 }
 0x225   :  { %v3888_v44 = vpop.f32.mrf.mxu3 }
 0x226   :  { %v4218_v48 = vpop.f32.mrf.mxu2  ;;  %v3903_v57 = vadd.f32 %v3902_v43, %v3888_v44 }
 0x227   :  { %v4219_v54 = vadd.f32 %v4218_v48, %v4204_v47 }
 0x228   :  { %v4329_v1 = vsel %vm4223_vm2, %v3903_v57, -inf }
 0x229   :  { %v4327_v58 = vsel %vm4223_vm2, %v4219_v54, -inf  ;;  %v4331_v6 = vmax.f32 %v4329_v1, %v4330_v4 }
 0x22c   :  { %v4100_v50 = vpop.f32.mrf.mxu1 }
 0x22e   :  { %v4220_v0 = vpop.f32.mrf.mxu2 }
 0x22f   :  { %v4221_v5 = vadd.f32 %v4220_v0, %v4206_v63 }
 0x231   :  { %v4112_v55 = vpop.f32.mrf.mxu3  ;;  %v4334_v11 = vsel %vm4223_vm2, %v4221_v5, -inf }
 0x232   :  { %v4113_v56 = vadd.f32 %v4112_v55, %v4098_v51 }
 0x234   :  { %v4325_v59 = vsel %vm4223_vm2, %v4113_v56, -inf }
 0x235   :  { %v4326_v60 = vmax.f32 %v4324_v36, %v4325_v59 }
 0x237   :  { %v4328_v62 = vmax.f32 %v4326_v60, %v4327_v58 }
 0x239   :  { %v4362_v2 = vadd.f32 %v7135_v49, %v4328_v62  ;;  %v4114_v3 = vpop.f32.mrf.mxu3 }
 0x23a   :  { %v4115_v37 = vadd.f32 %v4114_v3, %v4100_v50 }
 0x23b   :  { %v4378_v7 = vmax.f32 %v4362_v2, 0.0 }
 0x23c   :  { %v4332_v8 = vsel %vm4223_vm2, %v4115_v37, -inf }
 0x23d   :  { %v4394_v9 = vpack.c.bf16 %v4378_v7, %v4378_v7  ;;  %v4333_v10 = vmax.f32 %v4331_v6, %v4332_v8 }
 0x23f   :  { %4411 = vst.msk [vmem:[%s7993_s3 + $0x38] sm:$0xf] %vm4396_vm3, %v4394_v9  ;;  %v4335_v12 = vmax.f32 %v4333_v10, %v4334_v11 }
 0x241   :  { %v4363_v49 = vadd.f32 %v7182_v15, %v4335_v12 }
 0x243   :  { %v4379_v13 = vmax.f32 %v4363_v49, 0.0 }
 0x245   :  { %v4395_v14 = vpack.c.bf16 %v4379_v13, %v4379_v13 }
 0x247   :  { %4412 = vst.msk [vmem:[%s7993_s3 + $0x3c] sm:$0xf] %vm4396_vm3, %v4395_v14 }

// kernel: cnn_model2_forward.5
= control target key start
LH: loop header
LB: loop body
LE: loop exit
PB: predicated region body
PF: predicated region fallthrough
CT: control target
= control target key end

     0   :  { %vm643_vm0 = vcmask 130048   ;;  %vm941_vm1 = vcmask 1041408   ;;  %vm937_vm2 = vcmask 556032   ;;  %s2238_s1 = inlined_call_operand.vmem [shape: bf16[784,196], index: 1, kind: input, shape index: {}]   ;;  %s2239_s0 = inlined_call_operand.vmem [shape: bf16[8,784], index: 0, kind: input, shape index: {}]   ;;  %s2240_s4 = inlined_call_operand.vmem [shape: f32[1,128], index: 4, kind: input, shape index: {}]   ;;  %s2241_s3 = inlined_call_operand.vmem [shape: bf16[196,128], index: 3, kind: input, shape index: {}]   ;;  %s2242_s2 = inlined_call_operand.vmem [shape: f32[1,196], index: 2, kind: input, shape index: {}]   ;;  %s2243_s5 = inlined_call_operand.vmem [shape: f32[8,128], index: 5, kind: output, shape index: {}]  }
   0x1   :  { %v1034_v0 = vld [vmem:[%s2238_s1 + $0x70] sm:$0xf]  ;;  %v1434_v1 = vld [vmem:[%s2238_s1 + $0x74] sm:$0xf0]  ;;  %v1026_v11 = vld [vmem:[%s2238_s1 + $0x60] sm:$0xf] }
   0x2   :  { %v1162_v2 = vld [vmem:[%s2238_s1 + $0x170] sm:$0xf]  ;;  %v1035_v3 = vor.u32 %v1434_v1, %v1034_v0  ;;  %v1466_v4 = vld [vmem:[%s2238_s1 + $0x174] sm:$0xf0]  ;;  %v1432_v13 = vld [vmem:[%s2238_s1 + $0x64] sm:$0xf0] }
   0x3   :  { %v1226_v5 = vld [vmem:[%s2238_s1 + $0x1f0] sm:$0xf]  ;;  %v1482_v6 = vld [vmem:[%s2238_s1 + $0x1f4] sm:$0xf0]  ;;  %v1163_v7 = vor.u32 %v1466_v4, %v1162_v2  ;;  %v1154_v14 = vld [vmem:[%s2238_s1 + $0x160] sm:$0xf]  ;;  %v1027_v16 = vor.u32 %v1432_v13, %v1026_v11 }
   0x4   :  { %v1227_v8 = vor.u32 %v1482_v6, %v1226_v5  ;;  %v1098_v9 = vld [vmem:[%s2238_s1 + $0xf0] sm:$0xf]  ;;  %v1450_v10 = vld [vmem:[%s2238_s1 + $0xf4] sm:$0xf0]  ;;  %647 = vmatpush.bf16.msra.mxu0 %v1035_v3  ;;  %v1464_v15 = vld [vmem:[%s2238_s1 + $0x164] sm:$0xf0] }
   0x5   :  { %v1099_v12 = vor.u32 %v1450_v10, %v1098_v9  ;;  %673 = vmatpush.bf16.msra.mxu2 %v1163_v7  ;;  %v1155_v17 = vor.u32 %v1464_v15, %v1154_v14  ;;  %v1218_v18 = vld [vmem:[%s2238_s1 + $0x1e0] sm:$0xf]  ;;  %v1480_v19 = vld [vmem:[%s2238_s1 + $0x1e4] sm:$0xf0]  ;;  %v1018_v23 = vld [vmem:[%s2238_s1 + $0x50] sm:$0xf] }
   0x6   :  { %686 = vmatpush.bf16.msra.mxu3 %v1227_v8  ;;  %v1090_v20 = vld [vmem:[%s2238_s1 + $0xe0] sm:$0xf]  ;;  %v1219_v21 = vor.u32 %v1480_v19, %v1218_v18  ;;  %v1448_v22 = vld [vmem:[%s2238_s1 + $0xe4] sm:$0xf0]  ;;  %v1430_v24 = vld [vmem:[%s2238_s1 + $0x54] sm:$0xf0] }
   0x7   :  { %660 = vmatpush.bf16.msra.mxu1 %v1099_v12  ;;  %v1091_v25 = vor.u32 %v1448_v22, %v1090_v20  ;;  %v1146_v26 = vld [vmem:[%s2238_s1 + $0x150] sm:$0xf]  ;;  %v1462_v27 = vld [vmem:[%s2238_s1 + $0x154] sm:$0xf0]  ;;  %v1019_v29 = vor.u32 %v1430_v24, %v1018_v23  ;;  %v1010_v35 = vld [vmem:[%s2238_s1 + $0x40] sm:$0xf] }
   0x8   :  { %v1210_v28 = vld [vmem:[%s2238_s1 + $0x1d0] sm:$0xf]  ;;  %648 = vmatpush.bf16.msra.mxu0 %v1027_v16  ;;  %v1478_v30 = vld [vmem:[%s2238_s1 + $0x1d4] sm:$0xf0]  ;;  %v1147_v33 = vor.u32 %v1462_v27, %v1146_v26  ;;  %v1428_v36 = vld [vmem:[%s2238_s1 + $0x44] sm:$0xf0] }
   0x9   :  { %v1082_v31 = vld [vmem:[%s2238_s1 + $0xd0] sm:$0xf]  ;;  %v1446_v32 = vld [vmem:[%s2238_s1 + $0xd4] sm:$0xf0]  ;;  %674 = vmatpush.bf16.msra.mxu2 %v1155_v17  ;;  %v1211_v34 = vor.u32 %v1478_v30, %v1210_v28  ;;  %v1138_v37 = vld [vmem:[%s2238_s1 + $0x140] sm:$0xf]  ;;  %v1011_v44 = vor.u32 %v1428_v36, %v1010_v35 }
   0xa   :  { %687 = vmatpush.bf16.msra.mxu3 %v1219_v21  ;;  %v1083_v38 = vor.u32 %v1446_v32, %v1082_v31  ;;  %v1460_v39 = vld [vmem:[%s2238_s1 + $0x144] sm:$0xf0]  ;;  %v1202_v40 = vld [vmem:[%s2238_s1 + $0x1c0] sm:$0xf]  ;;  %v1002_v47 = vld [vmem:[%s2238_s1 + $0x30] sm:$0xf] }
   0xb   :  { %661 = vmatpush.bf16.msra.mxu1 %v1091_v25  ;;  %v1476_v41 = vld [vmem:[%s2238_s1 + $0x1c4] sm:$0xf0]  ;;  %v1074_v42 = vld [vmem:[%s2238_s1 + $0xc0] sm:$0xf]  ;;  %v1139_v45 = vor.u32 %v1460_v39, %v1138_v37  ;;  %v1426_v48 = vld [vmem:[%s2238_s1 + $0x34] sm:$0xf0] }
   0xc   :  { %v1444_v43 = vld [vmem:[%s2238_s1 + $0xc4] sm:$0xf0]  ;;  %649 = vmatpush.bf16.msra.mxu0 %v1019_v29  ;;  %v1203_v46 = vor.u32 %v1476_v41, %v1202_v40  ;;  %v1130_v49 = vld [vmem:[%s2238_s1 + $0x130] sm:$0xf]  ;;  %v1458_v51 = vld [vmem:[%s2238_s1 + $0x134] sm:$0xf0]  ;;  %v1003_v56 = vor.u32 %v1426_v48, %v1002_v47 }
   0xd   :  { %675 = vmatpush.bf16.msra.mxu2 %v1147_v33  ;;  %v1075_v50 = vor.u32 %v1444_v43, %v1074_v42  ;;  %v1194_v52 = vld [vmem:[%s2238_s1 + $0x1b0] sm:$0xf]  ;;  %v1474_v53 = vld [vmem:[%s2238_s1 + $0x1b4] sm:$0xf0]  ;;  %v1131_v57 = vor.u32 %v1458_v51, %v1130_v49  ;;  %v994_v59 = vld [vmem:[%s2238_s1 + $0x20] sm:$0xf] }
   0xe   :  { %688 = vmatpush.bf16.msra.mxu3 %v1211_v34  ;;  %v1066_v54 = vld [vmem:[%s2238_s1 + $0xb0] sm:$0xf]  ;;  %v1442_v55 = vld [vmem:[%s2238_s1 + $0xb4] sm:$0xf0]  ;;  %v1195_v58 = vor.u32 %v1474_v53, %v1194_v52  ;;  %v1424_v60 = vld [vmem:[%s2238_s1 + $0x24] sm:$0xf0] }
   0xf   :  { %662 = vmatpush.bf16.msra.mxu1 %v1083_v38  ;;  %v1122_v61 = vld [vmem:[%s2238_s1 + $0x120] sm:$0xf]  ;;  %v1067_v62 = vor.u32 %v1442_v55, %v1066_v54  ;;  %v1456_v63 = vld [vmem:[%s2238_s1 + $0x124] sm:$0xf0]  ;;  %v995_v4 = vor.u32 %v1424_v60, %v994_v59  ;;  %v986_v7 = vld [vmem:[%s2238_s1 + $0x10] sm:$0xf] }
  0x10   :  { %650 = vmatpush.bf16.msra.mxu0 %v1011_v44  ;;  %v1186_v0 = vld [vmem:[%s2238_s1 + $0x1a0] sm:$0xf]  ;;  %v1472_v1 = vld [vmem:[%s2238_s1 + $0x1a4] sm:$0xf0]  ;;  %v1123_v5 = vor.u32 %v1456_v63, %v1122_v61  ;;  %v1422_v8 = vld [vmem:[%s2238_s1 + $0x14] sm:$0xf0] }
  0x11   :  { %676 = vmatpush.bf16.msra.mxu2 %v1139_v45  ;;  %v1058_v2 = vld [vmem:[%s2238_s1 + $0xa0] sm:$0xf]  ;;  %v1440_v3 = vld [vmem:[%s2238_s1 + $0xa4] sm:$0xf0]  ;;  %v1187_v6 = vor.u32 %v1472_v1, %v1186_v0  ;;  %v1114_v9 = vld [vmem:[%s2238_s1 + $0x110] sm:$0xf]  ;;  %v987_v17 = vor.u32 %v1422_v8, %v986_v7 }
  0x12   :  { %689 = vmatpush.bf16.msra.mxu3 %v1203_v46  ;;  %v1059_v10 = vor.u32 %v1440_v3, %v1058_v2  ;;  %v1454_v11 = vld [vmem:[%s2238_s1 + $0x114] sm:$0xf0]  ;;  %v1178_v12 = vld [vmem:[%s2238_s1 + $0x190] sm:$0xf]  ;;  %v978_v16 = vld [vmem:[%s2238_s1] sm:$0xf] }
  0x13   :  { %663 = vmatpush.bf16.msra.mxu1 %v1075_v50  ;;  %v1470_v13 = vld [vmem:[%s2238_s1 + $0x194] sm:$0xf0]  ;;  %v1050_v14 = vld [vmem:[%s2238_s1 + $0x90] sm:$0xf]  ;;  %v1420_v18 = vld [vmem:[%s2238_s1 + $0x4] sm:$0xf0]  ;;  %v1115_v21 = vor.u32 %v1454_v11, %v1114_v9 }
  0x14   :  { %651 = vmatpush.bf16.msra.mxu0 %v1003_v56  ;;  %v1438_v15 = vld [vmem:[%s2238_s1 + $0x94] sm:$0xf0]  ;;  %v1106_v19 = vld [vmem:[%s2238_s1 + $0x100] sm:$0xf]  ;;  %v1452_v20 = vld [vmem:[%s2238_s1 + $0x104] sm:$0xf0]  ;;  %v1179_v22 = vor.u32 %v1470_v13, %v1178_v12  ;;  %v979_v33 = vor.u32 %v1420_v18, %v978_v16 }
  0x15   :  { %677 = vmatpush.bf16.msra.mxu2 %v1131_v57  ;;  %v1170_v23 = vld [vmem:[%s2238_s1 + $0x180] sm:$0xf]  ;;  %v1468_v24 = vld [vmem:[%s2238_s1 + $0x184] sm:$0xf0]  ;;  %v1051_v26 = vor.u32 %v1438_v15, %v1050_v14  ;;  %v1290_v27 = vld [vmem:[%s2238_s1 + $0x270] sm:$0xf]  ;;  %v1107_v37 = vor.u32 %v1452_v20, %v1106_v19 }
  0x16   :  { %690 = vmatpush.bf16.msra.mxu3 %v1195_v58  ;;  %v22_v25 = vld [vmem:[%s2239_s0 + $0x8] sm:$0xff]  ;;  %v1498_v28 = vld [vmem:[%s2238_s1 + $0x274] sm:$0xf0]  ;;  %v1433_v29 = vld [vmem:[%s2238_s1 + $0x74] sm:$0xf]  ;;  %v1171_v38 = vor.u32 %v1468_v24, %v1170_v23 }
  0x17   :  { %664 = vmatpush.bf16.msra.mxu1 %v1067_v62  ;;  %v1036_v30 = vld [vmem:[%s2238_s1 + $0x78] sm:$0xf0]  ;;  %v1042_v31 = vld [vmem:[%s2238_s1 + $0x80] sm:$0xf]  ;;  %v1436_v32 = vld [vmem:[%s2238_s1 + $0x84] sm:$0xf0]  ;;  %v135_v34 = vunpack.c.l.b16 %v22_v25  ;;  %v1291_v42 = vor.u32 %v1498_v28, %v1290_v27  ;;  %v136_v53 = vunpack.c.h.b16 %v22_v25 }
  0x18   :  { %652 = vmatpush.bf16.msra.mxu0 %v995_v4  ;;  %v1362_v35 = vld [vmem:[%s2238_s1 + $0x300] sm:$0xf]  ;;  %v1516_v36 = vld [vmem:[%s2238_s1 + $0x304] sm:$0xf0]  ;;  %v1354_v39 = vld [vmem:[%s2238_s1 + $0x2f0] sm:$0xf]  ;;  %v1039_v43 = vor.u32 %v1433_v29, %v1036_v30  ;;  %v1043_v44 = vor.u32 %v1436_v32, %v1042_v31 }
  0x19   :  { %678 = vmatpush.bf16.msra.mxu2 %v1123_v5  ;;  %v1514_v40 = vld [vmem:[%s2238_s1 + $0x2f4] sm:$0xf0]  ;;  %v1449_v41 = vld [vmem:[%s2238_s1 + $0xf4] sm:$0xf]  ;;  %v1100_v45 = vld [vmem:[%s2238_s1 + $0xf8] sm:$0xf0]  ;;  %v1363_v48 = vor.u32 %v1516_v36, %v1362_v35  ;;  %v1800_v55 = vpack.c.b16 %v135_v34, %v135_v34  ;;  %v1828_v5 = vpack.c.b16 %v136_v53, %v136_v53 }
  0x1a   :  { %691 = vmatpush.bf16.msra.mxu3 %v1187_v6  ;;  %v1282_v46 = vld [vmem:[%s2238_s1 + $0x260] sm:$0xf]  ;;  %v1496_v49 = vld [vmem:[%s2238_s1 + $0x264] sm:$0xf0]  ;;  %v1431_v50 = vld [vmem:[%s2238_s1 + $0x64] sm:$0xf]  ;;  %v1355_v56 = vor.u32 %v1514_v40, %v1354_v39  ;;  %v1103_v57 = vor.u32 %v1449_v41, %v1100_v45 }
  0x1b   :  { %665 = vmatpush.bf16.msra.mxu1 %v1059_v10  ;;  %v21_v47 = vld [vmem:[%s2239_s0] sm:$0xff]  ;;  %v1028_v51 = vld [vmem:[%s2238_s1 + $0x68] sm:$0xf0]  ;;  %v1512_v59 = vld [vmem:[%s2238_s1 + $0x2e4] sm:$0xf0]  ;;  %v1283_v61 = vor.u32 %v1496_v49, %v1282_v46 }
  0x1c   :  { %653 = vmatpush.bf16.msra.mxu0 %v987_v17  ;;  %v133_v52 = vunpack.c.l.b16 %v21_v47  ;;  %v134_v54 = vunpack.c.h.b16 %v21_v47  ;;  %v1346_v58 = vld [vmem:[%s2238_s1 + $0x2e0] sm:$0xf]  ;;  %v1031_v62 = vor.u32 %v1431_v50, %v1028_v51  ;;  %v1447_v63 = vld [vmem:[%s2238_s1 + $0xe4] sm:$0xf]  ;;  %v1092_v0 = vld [vmem:[%s2238_s1 + $0xe8] sm:$0xf0] }
  0x1d   :  { %679 = vmatpush.bf16.msra.mxu2 %v1115_v21  ;;  %v1274_v1 = vld [vmem:[%s2238_s1 + $0x250] sm:$0xf]  ;;  %v1494_v2 = vld [vmem:[%s2238_s1 + $0x254] sm:$0xf0]  ;;  %v1429_v3 = vld [vmem:[%s2238_s1 + $0x54] sm:$0xf]  ;;  %v1347_v7 = vor.u32 %v1512_v59, %v1346_v58  ;;  %v1095_v8 = vor.u32 %v1447_v63, %v1092_v0 }
  0x1e   :  { %692 = vmatpush.bf16.msra.mxu3 %v1179_v22  ;;  %v1808_v60 = vpack.c.b16 %v133_v52, %v133_v52  ;;  %v1020_v4 = vld [vmem:[%s2238_s1 + $0x58] sm:$0xf0]  ;;  %v1830_v6 = vpack.c.b16 %v134_v54, %v134_v54  ;;  %v1338_v9 = vld [vmem:[%s2238_s1 + $0x2d0] sm:$0xf]  ;;  %v1510_v10 = vld [vmem:[%s2238_s1 + $0x2d4] sm:$0xf0]  ;;  %v1275_v11 = vor.u32 %v1494_v2, %v1274_v1 }
  0x1f   :  { %666 = vmatpush.bf16.msra.mxu1 %v1051_v26  ;;  %v1023_v12 = vor.u32 %v1429_v3, %v1020_v4  ;;  %v1445_v13 = vld [vmem:[%s2238_s1 + $0xd4] sm:$0xf]  ;;  %v1084_v14 = vld [vmem:[%s2238_s1 + $0xd8] sm:$0xf0]  ;;  %v1266_v15 = vld [vmem:[%s2238_s1 + $0x240] sm:$0xf]  ;;  %v1339_v19 = vor.u32 %v1510_v10, %v1338_v9 }
  0x20   :  { %654 = vmatpush.bf16.msra.mxu0 %v979_v33  ;;  %v1492_v16 = vld [vmem:[%s2238_s1 + $0x244] sm:$0xf0]  ;;  %v1427_v17 = vld [vmem:[%s2238_s1 + $0x44] sm:$0xf]  ;;  %v1012_v18 = vld [vmem:[%s2238_s1 + $0x48] sm:$0xf0]  ;;  %v1087_v20 = vor.u32 %v1445_v13, %v1084_v14 }
  0x21   :  { %680 = vmatpush.bf16.msra.mxu2 %v1107_v37  ;;  %v1330_v21 = vld [vmem:[%s2238_s1 + $0x2c0] sm:$0xf]  ;;  %v1508_v22 = vld [vmem:[%s2238_s1 + $0x2c4] sm:$0xf0]  ;;  %v1443_v23 = vld [vmem:[%s2238_s1 + $0xc4] sm:$0xf]  ;;  %v1267_v24 = vor.u32 %v1492_v16, %v1266_v15  ;;  %v1015_v25 = vor.u32 %v1427_v17, %v1012_v18 }
  0x22   :  { %693 = vmatpush.bf16.msra.mxu3 %v1171_v38  ;;  %v1076_v26 = vld [vmem:[%s2238_s1 + $0xc8] sm:$0xf0]  ;;  %v1258_v27 = vld [vmem:[%s2238_s1 + $0x230] sm:$0xf]  ;;  %v1490_v28 = vld [vmem:[%s2238_s1 + $0x234] sm:$0xf0]  ;;  %v1331_v32 = vor.u32 %v1508_v22, %v1330_v21 }
  0x23   :  { %667 = vmatpush.bf16.msra.mxu1 %v1043_v44  ;;  %655 = vmatmul.bf16.vlgmr.msra.gmra.mxu0 %v1808_v60  ;;  %v1425_v29 = vld [vmem:[%s2238_s1 + $0x34] sm:$0xf]  ;;  %v1004_v30 = vld [vmem:[%s2238_s1 + $0x38] sm:$0xf0]  ;;  %v24_v31 = vld [vmem:[%s2239_s0 + $0x18] sm:$0xf]  ;;  %v1079_v34 = vor.u32 %v1443_v23, %v1076_v26  ;;  %v1259_v37 = vor.u32 %v1490_v28, %v1258_v27 }
  0x24   :  { %699 = vmatpush.bf16.msrb.mxu0 %v1291_v42  ;;  %681 = vmatmul.bf16.vlgmr.msra.gmra.mxu2 %v1800_v55  ;;  %v139_v33 = vunpack.c.l.b16 %v24_v31  ;;  %v1322_v35 = vld [vmem:[%s2238_s1 + $0x2b0] sm:$0xf]  ;;  %v1506_v36 = vld [vmem:[%s2238_s1 + $0x2b4] sm:$0xf0]  ;;  %v1007_v38 = vor.u32 %v1425_v29, %v1004_v30  ;;  %v1441_v39 = vld [vmem:[%s2238_s1 + $0xb4] sm:$0xf] }
  0x25   :  { %732 = vmatpush.bf16.msrb.mxu2 %v1363_v48  ;;  %694 = vmatmul.bf16.vlgmr.msra.gmra.mxu3 %v1828_v5  ;;  %v1068_v40 = vld [vmem:[%s2238_s1 + $0xb8] sm:$0xf0]  ;;  %v1250_v41 = vld [vmem:[%s2238_s1 + $0x220] sm:$0xf]  ;;  %v1488_v42 = vld [vmem:[%s2238_s1 + $0x224] sm:$0xf0]  ;;  %v1323_v45 = vor.u32 %v1506_v36, %v1322_v35 }
  0x26   :  { %738 = vmatpush.bf16.msrb.mxu3 %v1039_v43  ;;  %668 = vmatmul.bf16.vlgmr.msra.gmra.mxu1 %v1830_v6  ;;  %v1423_v43 = vld [vmem:[%s2238_s1 + $0x24] sm:$0xf]  ;;  %v996_v44 = vld [vmem:[%s2238_s1 + $0x28] sm:$0xf0]  ;;  %v1911_v46 = vpack.c.b16 %v139_v33, %v139_v33  ;;  %v1071_v47 = vor.u32 %v1441_v39, %v1068_v40  ;;  %v1314_v48 = vld [vmem:[%s2238_s1 + $0x2a0] sm:$0xf]  ;;  %v1251_v50 = vor.u32 %v1488_v42, %v1250_v41 }
  0x27   :  { %712 = vmatpush.bf16.msrb.mxu1 %v1355_v56  ;;  %v1504_v49 = vld [vmem:[%s2238_s1 + $0x2a4] sm:$0xf0]  ;;  %v999_v51 = vor.u32 %v1423_v43, %v996_v44  ;;  %v1439_v52 = vld [vmem:[%s2238_s1 + $0xa4] sm:$0xf]  ;;  %v1060_v53 = vld [vmem:[%s2238_s1 + $0xa8] sm:$0xf0] }
  0x28   :  { %700 = vmatpush.bf16.msrb.mxu0 %v1283_v61  ;;  %v1242_v54 = vld [vmem:[%s2238_s1 + $0x210] sm:$0xf]  ;;  %v1486_v56 = vld [vmem:[%s2238_s1 + $0x214] sm:$0xf0]  ;;  %v988_v58 = vld [vmem:[%s2238_s1 + $0x18] sm:$0xf0]  ;;  %v1315_v59 = vor.u32 %v1504_v49, %v1314_v48 }
  0x29   :  { %751 = vmatpush.bf16.msra.mxu2 %v1103_v57  ;;  %v1421_v57 = vld [vmem:[%s2238_s1 + $0x14] sm:$0xf]  ;;  %v1306_v61 = vld [vmem:[%s2238_s1 + $0x290] sm:$0xf]  ;;  %v1502_v63 = vld [vmem:[%s2238_s1 + $0x294] sm:$0xf0]  ;;  %v1243_v2 = vor.u32 %v1486_v56, %v1242_v54 }
  0x2a   :  { %739 = vmatpush.bf16.msrb.mxu3 %v1031_v62  ;;  %v1063_v62 = vor.u32 %v1439_v52, %v1060_v53  ;;  %v1437_v0 = vld [vmem:[%s2238_s1 + $0x94] sm:$0xf]  ;;  %v1052_v1 = vld [vmem:[%s2238_s1 + $0x98] sm:$0xf0]  ;;  %v991_v3 = vor.u32 %v1421_v57, %v988_v58  ;;  %v1234_v4 = vld [vmem:[%s2238_s1 + $0x200] sm:$0xf] }
  0x2b   :  { %713 = vmatpush.bf16.msrb.mxu1 %v1347_v7  ;;  %v1484_v7 = vld [vmem:[%s2238_s1 + $0x204] sm:$0xf0]  ;;  %v1419_v9 = vld [vmem:[%s2238_s1 + $0x4] sm:$0xf]  ;;  %v980_v10 = vld [vmem:[%s2238_s1 + $0x8] sm:$0xf0]  ;;  %v1055_v16 = vor.u32 %v1437_v0, %v1052_v1 }
  0x2c   :  { %701 = vmatpush.bf16.msrb.mxu0 %v1275_v11  ;;  %v1465_v11 = vld [vmem:[%s2238_s1 + $0x174] sm:$0xf]  ;;  %v1164_v13 = vld [vmem:[%s2238_s1 + $0x178] sm:$0xf0]  ;;  %v1298_v17 = vld [vmem:[%s2238_s1 + $0x280] sm:$0xf]  ;;  %v983_v21 = vor.u32 %v1419_v9, %v980_v10 }
  0x2d   :  { %752 = vmatpush.bf16.msra.mxu2 %v1095_v8  ;;  %v23_v8 = vld [vmem:[%s2239_s0 + $0x10] sm:$0xff]  ;;  %v1292_v15 = vld [vmem:[%s2238_s1 + $0x278] sm:$0xf0]  ;;  %v1500_v18 = vld [vmem:[%s2238_s1 + $0x284] sm:$0xf0] }
  0x2e   :  { %740 = vmatpush.bf16.msrb.mxu3 %v1023_v12  ;;  %v1307_v12 = vor.u32 %v1502_v63, %v1306_v61  ;;  %v1497_v14 = vld [vmem:[%s2238_s1 + $0x274] sm:$0xf]  ;;  %v1435_v22 = vld [vmem:[%s2238_s1 + $0x84] sm:$0xf]  ;;  %v1044_v23 = vld [vmem:[%s2238_s1 + $0x88] sm:$0xf0]  ;;  %v138_v30 = vunpack.c.h.b16 %v23_v8  ;;  %v1299_v31 = vor.u32 %v1500_v18, %v1298_v17 }
  0x2f   :  { %714 = vmatpush.bf16.msrb.mxu1 %v1339_v19  ;;  %v137_v19 = vunpack.c.l.b16 %v23_v8  ;;  %v1295_v26 = vor.u32 %v1497_v14, %v1292_v15  ;;  %v1228_v27 = vld [vmem:[%s2238_s1 + $0x1f8] sm:$0xf0]  ;;  %v1513_v28 = vld [vmem:[%s2238_s1 + $0x2f4] sm:$0xf]  ;;  %v1156_v33 = vld [vmem:[%s2238_s1 + $0x168] sm:$0xf0]  ;;  %v1047_v35 = vor.u32 %v1435_v22, %v1044_v23 }
  0x30   :  { %702 = vmatpush.bf16.msrb.mxu0 %v1267_v24  ;;  %v1481_v24 = vld [vmem:[%s2238_s1 + $0x1f4] sm:$0xf]  ;;  %v1356_v29 = vld [vmem:[%s2238_s1 + $0x2f8] sm:$0xf0]  ;;  %v1495_v36 = vld [vmem:[%s2238_s1 + $0x264] sm:$0xf]  ;;  %v2019_v41 = vpack.c.b16 %v138_v30, %v138_v30 }
  0x31   :  { %753 = vmatpush.bf16.msra.mxu2 %v1087_v20  ;;  %v1235_v20 = vor.u32 %v1484_v7, %v1234_v4  ;;  %v1359_v39 = vor.u32 %v1513_v28, %v1356_v29  ;;  %v1479_v40 = vld [vmem:[%s2238_s1 + $0x1e4] sm:$0xf]  ;;  %v1220_v43 = vld [vmem:[%s2238_s1 + $0x1e8] sm:$0xf0]  ;;  %v1461_v48 = vld [vmem:[%s2238_s1 + $0x154] sm:$0xf] }
  0x32   :  { %741 = vmatpush.bf16.msrb.mxu3 %v1015_v25  ;;  %v1167_v25 = vor.u32 %v1465_v11, %v1164_v13  ;;  %v1511_v44 = vld [vmem:[%s2238_s1 + $0x2e4] sm:$0xf]  ;;  %v1148_v49 = vld [vmem:[%s2238_s1 + $0x158] sm:$0xf0]  ;;  %v1223_v52 = vor.u32 %v1479_v40, %v1220_v43  ;;  %v1477_v54 = vld [vmem:[%s2238_s1 + $0x1d4] sm:$0xf] }
  0x33   :  { %715 = vmatpush.bf16.msrb.mxu1 %v1331_v32  ;;  %v1463_v32 = vld [vmem:[%s2238_s1 + $0x164] sm:$0xf]  ;;  %v1151_v56 = vor.u32 %v1461_v48, %v1148_v49  ;;  %v1212_v57 = vld [vmem:[%s2238_s1 + $0x1d8] sm:$0xf0]  ;;  %v1509_v58 = vld [vmem:[%s2238_s1 + $0x2d4] sm:$0xf] }
  0x34   :  { %703 = vmatpush.bf16.msrb.mxu0 %v1259_v37  ;;  %1368 = vmatmul.msk.bf16.vlgmr.msrb.gmra.mxu2 %vm643_vm0, %v1911_v46  ;;  %v1284_v37 = vld [vmem:[%s2238_s1 + $0x268] sm:$0xf0]  ;;  %v1159_v42 = vor.u32 %v1463_v32, %v1156_v33  ;;  %v1491_v0 = vld [vmem:[%s2238_s1 + $0x244] sm:$0xf]  ;;  %v1457_v10 = vld [vmem:[%s2238_s1 + $0x134] sm:$0xf] }
  0x35   :  { %754 = vmatpush.bf16.msra.mxu2 %v1079_v34  ;;  %v2008_v34 = vpack.c.b16 %v137_v19, %v137_v19  ;;  %v1140_v63 = vld [vmem:[%s2238_s1 + $0x148] sm:$0xf0]  ;;  %v1475_v4 = vld [vmem:[%s2238_s1 + $0x1c4] sm:$0xf]  ;;  %v1132_v11 = vld [vmem:[%s2238_s1 + $0x138] sm:$0xf0] }
  0x36   :  { %742 = vmatpush.bf16.msrb.mxu3 %v1007_v38  ;;  %v1231_v38 = vor.u32 %v1481_v24, %v1228_v27  ;;  %v1268_v1 = vld [vmem:[%s2238_s1 + $0x248] sm:$0xf0]  ;;  %v1507_v8 = vld [vmem:[%s2238_s1 + $0x2c4] sm:$0xf]  ;;  %v1260_v13 = vld [vmem:[%s2238_s1 + $0x238] sm:$0xf0]  ;;  %v1135_v17 = vor.u32 %v1457_v10, %v1132_v11 }
  0x37   :  { %716 = vmatpush.bf16.msrb.mxu1 %v1323_v45  ;;  %v1348_v45 = vld [vmem:[%s2238_s1 + $0x2e8] sm:$0xf0]  ;;  %v1271_v9 = vor.u32 %v1491_v0, %v1268_v1  ;;  %v1196_v18 = vld [vmem:[%s2238_s1 + $0x1b8] sm:$0xf0]  ;;  %v1505_v19 = vld [vmem:[%s2238_s1 + $0x2b4] sm:$0xf] }
  0x38   :  { %704 = vmatpush.bf16.msrb.mxu0 %v1251_v50  ;;  %v1493_v50 = vld [vmem:[%s2238_s1 + $0x254] sm:$0xf]  ;;  %v1351_v53 = vor.u32 %v1511_v44, %v1348_v45  ;;  %v1204_v7 = vld [vmem:[%s2238_s1 + $0x1c8] sm:$0xf0]  ;;  %v1455_v22 = vld [vmem:[%s2238_s1 + $0x124] sm:$0xf] }
  0x39   :  { %755 = vmatpush.bf16.msra.mxu2 %v1071_v47  ;;  %v1287_v47 = vor.u32 %v1495_v36, %v1284_v37  ;;  %v1207_v14 = vor.u32 %v1475_v4, %v1204_v7  ;;  %v1124_v23 = vld [vmem:[%s2238_s1 + $0x128] sm:$0xf0]  ;;  %v1487_v24 = vld [vmem:[%s2238_s1 + $0x224] sm:$0xf]  ;;  %v1116_v36 = vld [vmem:[%s2238_s1 + $0x118] sm:$0xf0] }
  0x3a   :  { %743 = vmatpush.bf16.msrb.mxu3 %v999_v51  ;;  %v1276_v51 = vld [vmem:[%s2238_s1 + $0x258] sm:$0xf0]  ;;  %v1471_v28 = vld [vmem:[%s2238_s1 + $0x1a4] sm:$0xf]  ;;  %v1127_v29 = vor.u32 %v1455_v22, %v1124_v23  ;;  %v1188_v30 = vld [vmem:[%s2238_s1 + $0x1a8] sm:$0xf0] }
  0x3b   :  { %717 = vmatpush.bf16.msrb.mxu1 %v1315_v59  ;;  %v1340_v59 = vld [vmem:[%s2238_s1 + $0x2d8] sm:$0xf0]  ;;  %v1279_v61 = vor.u32 %v1493_v50, %v1276_v51  ;;  %v1316_v32 = vld [vmem:[%s2238_s1 + $0x2a8] sm:$0xf0]  ;;  %v1485_v37 = vld [vmem:[%s2238_s1 + $0x214] sm:$0xf] }
  0x3c   :  { %705 = vmatpush.bf16.msrb.mxu0 %v1243_v2  ;;  %v1215_v2 = vor.u32 %v1477_v54, %v1212_v57  ;;  %v1180_v44 = vld [vmem:[%s2238_s1 + $0x198] sm:$0xf0]  ;;  %v1501_v45 = vld [vmem:[%s2238_s1 + $0x294] sm:$0xf]  ;;  %v1451_v49 = vld [vmem:[%s2238_s1 + $0x104] sm:$0xf] }
  0x3d   :  { %756 = vmatpush.bf16.msra.mxu2 %v1063_v62  ;;  %v1459_v62 = vld [vmem:[%s2238_s1 + $0x144] sm:$0xf]  ;;  %v1108_v50 = vld [vmem:[%s2238_s1 + $0x108] sm:$0xf0]  ;;  %v1524_v4 = vld [vmem:[%s2241_s3 + $0x38] sm:$0xff] }
  0x3e   :  { %744 = vmatpush.bf16.msrb.mxu3 %v991_v3  ;;  %v1343_v3 = vor.u32 %v1509_v58, %v1340_v59  ;;  %v1483_v51 = vld [vmem:[%s2238_s1 + $0x204] sm:$0xf]  ;;  %v1364_v54 = vld [vmem:[%s2238_s1 + $0x308] sm:$0xf0]  ;;  %v1111_v58 = vor.u32 %v1451_v49, %v1108_v50  ;;  %v123_v10 = vld [vmem:[%s2242_s2] sm:$0x3] }
  0x3f   :  { %718 = vmatpush.bf16.msrb.mxu1 %v1307_v12  ;;  %v1489_v12 = vld [vmem:[%s2238_s1 + $0x234] sm:$0xf]  ;;  %v1467_v59 = vld [vmem:[%s2238_s1 + $0x184] sm:$0xf]  ;;  %v1300_v0 = vld [vmem:[%s2238_s1 + $0x288] sm:$0xf0] }
  0x40   :  { %706 = vmatpush.bf16.msrb.mxu0 %v1235_v20  ;;  %v1324_v20 = vld [vmem:[%s2238_s1 + $0x2b8] sm:$0xf0] }
  0x41   :  { %757 = vmatpush.bf16.msra.mxu2 %v1055_v16  ;;  %v1473_v16 = vld [vmem:[%s2238_s1 + $0x1b4] sm:$0xf]  ;;  %v1327_v27 = vor.u32 %v1505_v19, %v1324_v20 }
  0x42   :  { %745 = vmatpush.bf16.msrb.mxu3 %v983_v21  ;;  %v1263_v21 = vor.u32 %v1489_v12, %v1260_v13 }
  0x43   :  { %719 = vmatpush.bf16.msrb.mxu1 %v1299_v31  ;;  %707 = vmatmul.bf16.vlgmr.msrb.gmra.mxu0 %v2008_v34  ;;  %v1503_v31 = vld [vmem:[%s2238_s1 + $0x2a4] sm:$0xf] }
  0x44   :  { %764 = vmatpush.bf16.msra.mxu0 %v1167_v25  ;;  %v1252_v25 = vld [vmem:[%s2238_s1 + $0x228] sm:$0xf0]  ;;  %v1319_v40 = vor.u32 %v1503_v31, %v1316_v32  ;;  %v1528_v31 = vld [vmem:[%s2241_s3 + $0x58] sm:$0xff] }
  0x45   :  { %758 = vmatpush.bf16.msra.mxu2 %v1047_v35  ;;  %746 = vmatmul.bf16.vlgmr.msrb.gmra.mxu3 %v1808_v60  ;;  %v1332_v60 = vld [vmem:[%s2238_s1 + $0x2c8] sm:$0xf0]  ;;  %v1255_v33 = vor.u32 %v1487_v24, %v1252_v25  ;;  %v1453_v35 = vld [vmem:[%s2238_s1 + $0x114] sm:$0xf] }
  0x46   :  { %790 = vmatpush.bf16.msra.mxu3 %v1295_v26  ;;  %720 = vmatmul.bf16.vlgmr.msrb.gmra.mxu1 %v2019_v41  ;;  %v1335_v15 = vor.u32 %v1507_v8, %v1332_v60  ;;  %v1199_v26 = vor.u32 %v1473_v16, %v1196_v18  ;;  %v1119_v43 = vor.u32 %v1453_v35, %v1116_v36  ;;  %v1517_v60 = vld [vmem:[%s2241_s3] sm:$0xff]  ;;  %v1527_v36 = vld [vmem:[%s2241_s3 + $0x50] sm:$0xff] }
  0x47   :  { %777 = vmatpush.bf16.msra.mxu1 %v1231_v38  ;;  %v1244_v38 = vld [vmem:[%s2238_s1 + $0x218] sm:$0xf0] }
  0x48   :  { %765 = vmatpush.bf16.msra.mxu0 %v1159_v42  ;;  %759 = vmatmul.bf16.vlgmr.msra.gmra.mxu2 %v1830_v6  ;;  %v1143_v6 = vor.u32 %v1459_v62, %v1140_v63  ;;  %v1469_v42 = vld [vmem:[%s2238_s1 + $0x194] sm:$0xf]  ;;  %v1247_v48 = vor.u32 %v1485_v37, %v1244_v38  ;;  %v1499_v63 = vld [vmem:[%s2238_s1 + $0x284] sm:$0xf] }
  0x49   :  { %803 = vmatpush.bf16.msrb.mxu2 %v1359_v39  ;;  %v1191_v39 = vor.u32 %v1471_v28, %v1188_v30 }
  0x4a   :  { %791 = vmatpush.bf16.msra.mxu3 %v1287_v47  ;;  %v1308_v47 = vld [vmem:[%s2238_s1 + $0x298] sm:$0xf0] }
  0x4b   :  { %778 = vmatpush.bf16.msra.mxu1 %v1223_v52  ;;  %v1236_v52 = vld [vmem:[%s2238_s1 + $0x208] sm:$0xf0]  ;;  %v1311_v57 = vor.u32 %v1501_v45, %v1308_v47  ;;  %v126_v47 = vperm.slane %v123_v10, 1 }
  0x4c   :  { %766 = vmatpush.bf16.msra.mxu0 %v1151_v56  ;;  %v1183_v56 = vor.u32 %v1469_v42, %v1180_v44  ;;  %v1239_v62 = vor.u32 %v1483_v51, %v1236_v52  ;;  %v1526_v42 = vld [vmem:[%s2241_s3 + $0x48] sm:$0xff] }
  0x4d   :  { %804 = vmatpush.bf16.msrb.mxu2 %v1351_v53  ;;  %v1515_v53 = vld [vmem:[%s2238_s1 + $0x304] sm:$0xf] }
  0x4e   :  { %792 = vmatpush.bf16.msra.mxu3 %v1279_v61  ;;  %v1172_v61 = vld [vmem:[%s2238_s1 + $0x188] sm:$0xf0]  ;;  %v1367_v1 = vor.u32 %v1515_v53, %v1364_v54 }
  0x4f   :  { %779 = vmatpush.bf16.msra.mxu1 %v1215_v2  ;;  %v1175_v2 = vor.u32 %v1467_v59, %v1172_v61 }
  0x50   :  { %767 = vmatpush.bf16.msra.mxu0 %v1143_v6  ;;  %v1523_v6 = vld [vmem:[%s2241_s3 + $0x30] sm:$0xff] }
  0x51   :  { %805 = vmatpush.bf16.msrb.mxu2 %v1343_v3  ;;  %v1303_v3 = vor.u32 %v1499_v63, %v1300_v0 }
  0x52   :  { %793 = vmatpush.bf16.msra.mxu3 %v1271_v9 }
  0x53   :  { %780 = vmatpush.bf16.msra.mxu1 %v1207_v14  ;;  %v125_v14 = vperm.slane %v123_v10, 0 }
  0x54   :  { %768 = vmatpush.bf16.msra.mxu0 %v1135_v17 }
  0x55   :  { %806 = vmatpush.bf16.msrb.mxu2 %v1335_v15 }
  0x56   :  { %794 = vmatpush.bf16.msra.mxu3 %v1263_v21  ;;  %v857_v21 = vld [vmem:[%s2241_s3 + $0x60] sm:$0x3] }
  0x57   :  { %781 = vmatpush.bf16.msra.mxu1 %v1199_v26  ;;  %v911_v22 = vunpack.c.l.b16 %v857_v21 }
  0x58   :  { %769 = vmatpush.bf16.msra.mxu0 %v1127_v29 }
  0x59   :  { %807 = vmatpush.bf16.msrb.mxu2 %v1327_v27  ;;  %v924_v24 = vpack.c.b16 %v911_v22, %v911_v22 }
  0x5a   :  { %795 = vmatpush.bf16.msra.mxu3 %v1255_v33 }
  0x5b   :  { %782 = vmatpush.bf16.msra.mxu1 %v1191_v39  ;;  %v943_v28 = vsel %vm941_vm1, %v924_v24, 0 }
  0x5c   :  { %770 = vmatpush.bf16.msra.mxu0 %v1119_v43  ;;  %v1525_v43 = vld [vmem:[%s2241_s3 + $0x40] sm:$0xff] }
  0x5d   :  { %808 = vmatpush.bf16.msrb.mxu2 %v1319_v40 }
  0x5e   :  { %796 = vmatpush.bf16.msra.mxu3 %v1247_v48 }
  0x5f   :  { %783 = vmatpush.bf16.msra.mxu1 %v1183_v56 }
  0x60   :  { %771 = vmatpush.bf16.msra.mxu0 %v1111_v58 }
  0x61   :  { %809 = vmatpush.bf16.msrb.mxu2 %v1311_v57 }
  0x62   :  { %797 = vmatpush.bf16.msra.mxu3 %v1239_v62 }
  0x63   :  { %784 = vmatpush.bf16.msra.mxu1 %v1175_v2  ;;  %772 = vmatmul.bf16.vlgmr.msra.gmra.mxu0 %v1800_v55  ;;  %v1522_v55 = vld [vmem:[%s2241_s3 + $0x28] sm:$0xff] }
  0x64   :  { %823 = vmatpush.bf16.msrb.mxu0 %v1367_v1 }
  0x65   :  { %798 = vmatmul.bf16.vlgmr.msra.gmra.mxu3 %v2008_v34  ;;  %810 = vmatpush.bf16.msrb.mxu2 %v1303_v3  ;;  %v1519_v34 = vld [vmem:[%s2241_s3 + $0x10] sm:$0xff] }
  0x66   :  { %785 = vmatmul.bf16.vlgmr.msra.gmra.mxu1 %v1828_v5  ;;  %v1521_v5 = vld [vmem:[%s2241_s3 + $0x20] sm:$0xff]  ;;  %961 = vmatpush.bf16.msrb.mxu3 %v943_v28 }
  0x67   :  { %945 = vmatpush.bf16.msrb.mxu1 %v1524_v4 }
  0x68   :  { %811 = vmatmul.bf16.vlgmr.msrb.gmra.mxu2 %v2019_v41  ;;  %v1518_v41 = vld [vmem:[%s2241_s3 + $0x8] sm:$0xff] }
  0x6a   :  { %962 = vmatpush.bf16.msrb.mxu3 %v1528_v31 }
  0x6b   :  { %946 = vmatpush.bf16.msrb.mxu1 %v1523_v6 }
  0x6e   :  { %963 = vmatpush.bf16.msrb.mxu3 %v1527_v36 }
  0x6f   :  { %947 = vmatpush.bf16.msrb.mxu1 %v1522_v55 }
  0x72   :  { %964 = vmatpush.bf16.msrb.mxu3 %v1526_v42 }
  0x73   :  { %1369 = vmatmul.msk.bf16.vlgmr.msrb.gmra.mxu0 %vm643_vm0, %v1911_v46  ;;  %948 = vmatpush.bf16.msrb.mxu1 %v1521_v5  ;;  %v1520_v46 = vld [vmem:[%s2241_s3 + $0x18] sm:$0xff]  ;;  %v1529_v5 = vld [vmem:[%s2240_s4] ss:$0 sm:$0xff] }
  0x76   :  { %965 = vmatpush.bf16.msrb.mxu3 %v1525_v43 }
  0x77   :  { %949 = vmatpush.bf16.msrb.mxu1 %v1520_v46 }
  0x7b   :  { %950 = vmatpush.bf16.msrb.mxu1 %v1519_v34 }
  0x7f   :  { %951 = vmatpush.bf16.msrb.mxu1 %v1518_v41 }
  0x83   :  { %952 = vmatpush.bf16.msrb.mxu1 %v1517_v60 }
  0xa0   :  { %v656_v7 = vpop.f32.mrf.mxu0 }
  0xa1   :  { %v657_v16 = vadd.f32 %v656_v7, %v125_v14 }
  0xa3   :  { %v669_v8 = vpop.f32.mrf.mxu1 }
  0xa4   :  { %v670_v18 = vadd.f32 %v669_v8, %v657_v16 }
  0xa7   :  { %v682_v9 = vpop.f32.mrf.mxu2 }
  0xa8   :  { %v695_v11 = vpop.f32.mrf.mxu3  ;;  %v658_v12 = vpop.f32.mrf.mxu0  ;;  %v683_v20 = vadd.f32 %v682_v9, %v670_v18 }
  0xaa   :  { %v696_v23 = vadd.f32 %v695_v11, %v683_v20 }
  0xab   :  { %v671_v13 = vpop.f32.mrf.mxu1 }
  0xaf   :  { %v684_v15 = vpop.f32.mrf.mxu2 }
  0xb0   :  { %v697_v17 = vpop.f32.mrf.mxu3 }
  0xb7   :  { %v734_v19 = vpop.f32.mrf.mxu2 }
  0xbf   :  { %v736_v27 = vpop.f32.mrf.mxu2 }
  0xc0   :  { %v708_v25 = vpop.f32.mrf.mxu0 }
  0xc1   :  { %v709_v26 = vadd.f32 %v708_v25, %v696_v23 }
  0xc3   :  { %v721_v29 = vpop.f32.mrf.mxu1 }
  0xc4   :  { %v722_v30 = vadd.f32 %v721_v29, %v709_v26 }
  0xc6   :  { %v735_v32 = vadd.f32 %v734_v19, %v722_v30 }
  0xc8   :  { %v829_v33 = vmax.f32 %v735_v32, 0.0  ;;  %v710_v35 = vpop.f32.mrf.mxu0  ;;  %v747_v39 = vpop.f32.mrf.mxu3 }
  0xc9   :  { %v748_v48 = vadd.f32 %v747_v39, %v126_v47 }
  0xca   :  { %v831_v37 = vpack.c.bf16 %v829_v33, %v829_v33 }
  0xcb   :  { %v760_v38 = vpop.f32.mrf.mxu2  ;;  %v723_v40 = vpop.f32.mrf.mxu1 }
  0xcc   :  { %953 = vmatmul.bf16.vlgmr.msrb.gmra.mxu1 %v831_v37  ;;  %v761_v50 = vadd.f32 %v760_v38, %v748_v48 }
  0xd0   :  { %v749_v45 = vpop.f32.mrf.mxu3 }
  0xd3   :  { %v762_v44 = vpop.f32.mrf.mxu2 }
  0xe0   :  { %v773_v49 = vpop.f32.mrf.mxu0 }
  0xe1   :  { %v774_v52 = vadd.f32 %v773_v49, %v761_v50 }
  0xe3   :  { %v786_v51 = vpop.f32.mrf.mxu1 }
  0xe4   :  { %v787_v56 = vadd.f32 %v786_v51, %v774_v52 }
  0xe8   :  { %v799_v53 = vpop.f32.mrf.mxu3  ;;  %v775_v54 = vpop.f32.mrf.mxu0 }
  0xe9   :  { %v800_v58 = vadd.f32 %v799_v53, %v787_v56 }
  0xeb   :  { %v812_v57 = vpop.f32.mrf.mxu2  ;;  %v788_v59 = vpop.f32.mrf.mxu1 }
  0xec   :  { %v813_v61 = vadd.f32 %v812_v57, %v800_v58 }
  0xf0   :  { %v801_v62 = vpop.f32.mrf.mxu3  ;;  %v825_v63 = vpop.f32.mrf.mxu0 }
  0xf1   :  { %v826_v0 = vadd.f32 %v825_v63, %v813_v61 }
  0xf3   :  { %v814_v1 = vpop.f32.mrf.mxu2  ;;  %v830_v2 = vmax.f32 %v826_v0, 0.0 }
  0xf5   :  { %v832_v3 = vpack.c.bf16 %v830_v2, %v830_v2 }
  0xf7   :  { %1418 = vmatmul.msk.bf16.vlgmr.msrb.gmra.mxu3 %vm937_vm2, %v832_v3 }
  0xf8   :  { %v827_v4 = vpop.f32.mrf.mxu0 }
 0x149   :  { %v954_v6 = vpop.f32.mrf.mxu1 }
 0x14a   :  { %v955_v46 = vadd.f32 %v1529_v5, %v954_v6 }
 0x151   :  { %v956_v55 = vpop.f32.mrf.mxu1 }
 0x17a   :  { %v967_v34 = vpop.f32.mrf.mxu3 }
 0x17b   :  { %v968_v41 = vadd.f32 %v967_v34, %v955_v46 }
 0x17d   :  { %971 = vst [vmem:[%s2243_s5] sm:$0xff] %v968_v41 }
 0x182   :  { %v969_v7 = vpop.f32.mrf.mxu3 }

</bundles_post_ra>
